<compile_context>
chip_gen: v7x
topology: tpu7x:2x2x1
jax: 0.10.0
libtpu: 0.0.40
codegen_flags: <defaults>
</compile_context>

<pallas_src>
import math

import jax
import jax.numpy as jnp
from jax import lax
from jax.experimental import pallas as pl
from jax.experimental.pallas import tpu as pltpu

# ----------------------------- model constants -----------------------------
B = 2                    # batch
V = 2                    # number of camera views
MV_IN = 4                # multiview in_channels
IMG_H, IMG_W = 16, 16    # per-view image size
OCC_IN = 16              # occupancy voxel channels
D0 = H0 = W0 = 8         # occupancy spatial
D1 = H1 = W1 = 4         # occupancy latent spatial (after encoder2 downsample)
N_TOK = D1 * H1 * W1     # 64 voxel tokens
R = 8                    # radius_channels
C_OCC = 64               # occupancy latent channels (encoder2 output)
C_MV = 32                # multiview cartesian channels
T_EMB = 32               # time-embedding width
HIDDEN = C_OCC + C_MV + T_EMB   # 128 == transformer hidden size
MLP = 4 * HIDDEN                # 512
M_TOK = 8                # cond latent tokens (2 x 4 spatial positions)
COND_C = C_MV * R        # 256 cond latent channels
DEC_DH = 64              # decoder cross-attention head dim
OUT_C = 16               # decoder output channels

_INV_SQRT_H = 1.0 / math.sqrt(HIDDEN)
_INV_SQRT_D = 1.0 / math.sqrt(DEC_DH)


# ------------------------------ kernel helpers ------------------------------
def _layernorm(x, g, b, eps=1e-5):
    mu = jnp.mean(x, axis=-1, keepdims=True)
    var = jnp.mean(jnp.square(x - mu), axis=-1, keepdims=True)
    return (x - mu) * jax.lax.rsqrt(var + eps) * g + b


# ------------------------------ fused kernel --------------------------------
def _fused_kernel(occ_ref, mv_ref, t_ref, *refs):
    (e3w, e3b, e2w, e2b, tw, tb,
     g1, be1, wqkv, bqkv, wo, bo, g2, be2, w1, b1, w2, b2,
     dwq, dwkv, dwo, dwout, dbout,
     o_ref, lat_ref) = refs

    f32, bf16 = jnp.float32, jnp.bfloat16

    # ---- encoder2 (UnetEncoder3d, pointwise part): (64,16)@(16,64)+b, relu --
    occ_lat = jnp.maximum(
        jnp.dot(occ_ref[0], e3w[...], preferred_element_type=f32) + e3b[...], 0.0)
    lat_ref[:, 0:C_OCC] = occ_lat

    # ---- encoder (UnetEncoder2d, pointwise part): (8,4)@(4,256)+b, relu -----
    # enc2d channel axis is laid out (radius, c_mv) so the cartesian re-view
    # below is contiguous lane slices only.
    cond = jnp.maximum(
        jnp.dot(mv_ref[0], e2w[...], preferred_element_type=f32) + e2b[...], 0.0)  # (8,256)

    # ---- ops.view_as_cartesian surrogate: (radius, pos) -> voxel token rows -
    # TODO(synk): true polar->cartesian resample replaced by this re-indexing.
    for r in range(R):
        lat_ref[r * M_TOK:(r + 1) * M_TOK, C_OCC:C_OCC + C_MV] = (
            cond[:, r * C_MV:(r + 1) * C_MV])

    # ---- time embedding: Linear(1, T_EMB) applied to t/1000 ------------------
    t_emb = t_ref[0] * tw[...] + tb[...]                        # (1, T_EMB)
    lat_ref[:, C_OCC + C_MV:HIDDEN] = jnp.broadcast_to(t_emb, (N_TOK, T_EMB))

    # ---- transformer block (pre-LN, single head, fused QKV) ------------------
    x = lat_ref[...]                                            # (64, 128) f32
    h = _layernorm(x, g1[...], be1[...])
    qkv = jnp.dot(h.astype(bf16), wqkv[...], preferred_element_type=f32) + bqkv[...]
    q = qkv[:, 0:HIDDEN]
    k = qkv[:, HIDDEN:2 * HIDDEN]
    v = qkv[:, 2 * HIDDEN:3 * HIDDEN]
    s = lax.dot_general(q.astype(bf16), k.astype(bf16),
                        (((1,), (1,)), ((), ())),
                        preferred_element_type=f32) * _INV_SQRT_H
    s = s - jnp.max(s, axis=-1, keepdims=True)
    p = jnp.exp(s)
    p = p * pl.reciprocal(jnp.sum(p, axis=-1, keepdims=True), approx=True)
    a = jnp.dot(p.astype(bf16), v.astype(bf16), preferred_element_type=f32)
    x = x + jnp.dot(a.astype(bf16), wo[...], preferred_element_type=f32) + bo[...]
    h = _layernorm(x, g2[...], be2[...])
    m = jnp.dot(h.astype(bf16), w1[...], preferred_element_type=f32) + b1[...]
    m = jax.nn.gelu(m, approximate=True)  # TODO(synk): PyTorch default GELU is erf-exact.
    x = x + jnp.dot(m.astype(bf16), w2[...], preferred_element_type=f32) + b2[...]

    # ---- conditional decoder (synthetic): cross-attn on cond + head ----------
    # TODO(synk): UnetConditionalAttentionDecoderWithoutShortcut3d simplified to
    # a single cross-attention over cond_latent + pointwise output head.
    qd = jnp.dot(x.astype(bf16), dwq[...], preferred_element_type=f32)           # (64,64)
    kv = jnp.dot(cond.astype(bf16), dwkv[...], preferred_element_type=f32)       # (8,128)
    kd = kv[:, 0:DEC_DH]
    vd = kv[:, DEC_DH:2 * DEC_DH]
    sd = lax.dot_general(qd.astype(bf16), kd.astype(bf16),
                         (((1,), (1,)), ((), ())),
                         preferred_element_type=f32) * _INV_SQRT_D               # (64,8)
    sd = sd - jnp.max(sd, axis=-1, keepdims=True)
    pd = jnp.exp(sd)
    pd = pd * pl.reciprocal(jnp.sum(pd, axis=-1, keepdims=True), approx=True)
    ad = jnp.dot(pd.astype(bf16), vd.astype(bf16), preferred_element_type=f32)   # (64,64)
    hd = x + jnp.dot(ad.astype(bf16), dwo[...], preferred_element_type=f32)      # (64,128)
    out = jnp.dot(hd.astype(bf16), dwout[...], preferred_element_type=f32) + dbout[...]
    o_ref[0] = out                                                               # (64,16)


# -------------------------------- parameters --------------------------------
WEIGHT_NAMES = ("enc3d_w", "enc3d_b", "enc2d_w", "enc2d_b", "t_w", "t_b",
                "ln1_g", "ln1_b", "wqkv", "bqkv", "wo", "bo",
                "ln2_g", "ln2_b", "w_mlp1", "b_mlp1", "w_mlp2", "b_mlp2",
                "dec_wq", "dec_wkv", "dec_wo", "dec_wout", "dec_bout")


def init_params(key):
    ks = iter(jax.random.split(key, 16))
    s = 0.02

    def nrm(shape, dtype=jnp.bfloat16):   # matmul weights live in bf16 (MXU-native)
        return (s * jax.random.normal(next(ks), shape, jnp.float32)).astype(dtype)

    def zeros(shape):
        return jnp.zeros(shape, jnp.float32)

    def ones(shape):
        return jnp.ones(shape, jnp.float32)

    return {
        # UnetEncoder3d (simplified): strided pointwise conv 16 -> C_OCC.
        "enc3d_w": nrm((OCC_IN, C_OCC)), "enc3d_b": zeros((1, C_OCC)),
        # UnetEncoder2d (simplified): strided pointwise conv 4 -> COND_C.
        # Channel axis ordered (radius, c_mv) for the in-kernel cartesian view.
        "enc2d_w": nrm((MV_IN, COND_C)), "enc2d_b": zeros((1, COND_C)),
        # time_embeds: Linear(1, T_EMB) on timestep/1000.
        "t_w": nrm((1, T_EMB), jnp.float32), "t_b": zeros((1, T_EMB)),
        # transformer block (fused QKV projection).
        "ln1_g": ones((1, HIDDEN)), "ln1_b": zeros((1, HIDDEN)),
        "wqkv": nrm((HIDDEN, 3 * HIDDEN)), "bqkv": zeros((1, 3 * HIDDEN)),
        "wo": nrm((HIDDEN, HIDDEN)), "bo": zeros((1, HIDDEN)),
        "ln2_g": ones((1, HIDDEN)), "ln2_b": zeros((1, HIDDEN)),
        "w_mlp1": nrm((HIDDEN, MLP)), "b_mlp1": zeros((1, MLP)),
        "w_mlp2": nrm((MLP, HIDDEN)), "b_mlp2": zeros((1, HIDDEN)),
        # conditional decoder (simplified): cross-attn (fused KV) + output head.
        "dec_wq": nrm((HIDDEN, DEC_DH)), "dec_wkv": nrm((COND_C, 2 * DEC_DH)),
        "dec_wo": nrm((DEC_DH, HIDDEN)),
        "dec_wout": nrm((HIDDEN, OUT_C)), "dec_bout": zeros((1, OUT_C)),
    }


# --------------------------------- forward ----------------------------------
def _zero_map(nd):
    return lambda b: (0,) * nd


@jax.jit
def forward(params, occupancy, multiview, timestep):
    bsz = occupancy.shape[0]

    # --- encoder spatial stand-ins: strided downsample + channels-last tokens.
    # TODO(synk): UnetEncoder3d/UnetEncoder2d conv stacks reduced to a strided
    # pointwise conv; only the pointwise matmul runs inside the fused kernel.
    occ_ds = occupancy[:, :, ::2, ::2, ::2]                                # (B,16,4,4,4)
    occ_tok = jnp.transpose(occ_ds, (0, 2, 3, 4, 1)).reshape(bsz, N_TOK, OCC_IN)
    occ_tok = occ_tok.astype(jnp.bfloat16)

    mv = jnp.concatenate([multiview[:, i] for i in range(multiview.shape[1])],
                         axis=-1)                                          # (B,4,16,32)
    mv_ds = mv[:, :, ::8, ::8]                                             # (B,4,2,4)
    mv_tok = jnp.transpose(mv_ds, (0, 2, 3, 1)).reshape(bsz, M_TOK, MV_IN)
    mv_tok = mv_tok.astype(jnp.bfloat16)

    t = (timestep.astype(jnp.float32) / 1000.0).reshape(bsz, 1, 1)

    weights = [params[k] for k in WEIGHT_NAMES]

    in_specs = [
        pl.BlockSpec((1, N_TOK, OCC_IN), lambda b: (b, 0, 0)),
        pl.BlockSpec((1, M_TOK, MV_IN), lambda b: (b, 0, 0)),
        pl.BlockSpec((1, 1, 1), lambda b: (b, 0, 0)),
    ]
    in_specs += [pl.BlockSpec(w.shape, _zero_map(w.ndim)) for w in weights]

    out_tok = pl.pallas_call(
        _fused_kernel,
        grid=(bsz,),
        in_specs=in_specs,
        out_specs=pl.BlockSpec((1, N_TOK, OUT_C), lambda b: (b, 0, 0)),
        out_shape=jax.ShapeDtypeStruct((bsz, N_TOK, OUT_C), jnp.float32),
        scratch_shapes=[pltpu.VMEM((N_TOK, HIDDEN), jnp.float32)],
        compiler_params=pltpu.CompilerParams(dimension_semantics=("parallel",)),
    )(occ_tok, mv_tok, t, *weights)

    # --- decoder tail: nearest x2 upsample + NCDHW layout (tiny, plain XLA).
    vox = out_tok.reshape(bsz, D1, 1, H1, 1, W1, 1, OUT_C)
    vox = jnp.broadcast_to(vox, (bsz, D1, 2, H1, 2, W1, 2, OUT_C))
    vox = vox.reshape(bsz, D0, H0, W0, OUT_C)
    return jnp.transpose(vox, (0, 4, 1, 2, 3))                             # NCDHW


# ----------------------------------- main ------------------------------------
if __name__ == "__main__":
    key = jax.random.PRNGKey(0)
    k_p, k_occ, k_mv, k_t = jax.random.split(key, 4)

    params = init_params(k_p)
    occupancy = jax.random.normal(k_occ, (B, OCC_IN, D0, H0, W0), jnp.float32)
    multiview = jax.random.normal(k_mv, (B, V, MV_IN, IMG_H, IMG_W), jnp.float32)
    timestep = jax.random.uniform(k_t, (B,), jnp.float32, 0.0, 1000.0)

    out = forward(params, occupancy, multiview, timestep)
    out = jax.block_until_ready(out)
    assert out.shape == (B, OUT_C, D0, H0, W0), out.shape
    assert bool(jnp.all(jnp.isfinite(out)))
    print("KERNEL_OK")
</pallas_src>

<mosaic_0001>
module attributes {stable_mosaic.version = 11 : i64} {
  func.func @_fused_kernel(%arg0: i32, %arg1: memref<1x64x16xbf16, #tpu.memory_space<vmem>>, %arg2: memref<1x8x4xbf16, #tpu.memory_space<vmem>>, %arg3: memref<1x1x1xf32, #tpu.memory_space<vmem>>, %arg4: memref<16x64xbf16, #tpu.memory_space<vmem>>, %arg5: memref<1x64xf32, #tpu.memory_space<vmem>>, %arg6: memref<4x256xbf16, #tpu.memory_space<vmem>>, %arg7: memref<1x256xf32, #tpu.memory_space<vmem>>, %arg8: memref<1x32xf32, #tpu.memory_space<vmem>>, %arg9: memref<1x32xf32, #tpu.memory_space<vmem>>, %arg10: memref<1x128xf32, #tpu.memory_space<vmem>>, %arg11: memref<1x128xf32, #tpu.memory_space<vmem>>, %arg12: memref<128x384xbf16, #tpu.memory_space<vmem>>, %arg13: memref<1x384xf32, #tpu.memory_space<vmem>>, %arg14: memref<128x128xbf16, #tpu.memory_space<vmem>>, %arg15: memref<1x128xf32, #tpu.memory_space<vmem>>, %arg16: memref<1x128xf32, #tpu.memory_space<vmem>>, %arg17: memref<1x128xf32, #tpu.memory_space<vmem>>, %arg18: memref<128x512xbf16, #tpu.memory_space<vmem>>, %arg19: memref<1x512xf32, #tpu.memory_space<vmem>>, %arg20: memref<512x128xbf16, #tpu.memory_space<vmem>>, %arg21: memref<1x128xf32, #tpu.memory_space<vmem>>, %arg22: memref<128x64xbf16, #tpu.memory_space<vmem>>, %arg23: memref<256x128xbf16, #tpu.memory_space<vmem>>, %arg24: memref<64x128xbf16, #tpu.memory_space<vmem>>, %arg25: memref<128x16xbf16, #tpu.memory_space<vmem>>, %arg26: memref<1x16xf32, #tpu.memory_space<vmem>>, %arg27: memref<1x64x16xf32, #tpu.memory_space<vmem>>, %arg28: memref<64x128xf32, #tpu.memory_space<vmem>>) attributes {dimension_semantics = [#tpu.dimension_semantics<parallel>], iteration_bounds = array<i64: 2>, scalar_prefetch = 0 : i64, scratch_operands = 1 : i64, tpu.core_type = #tpu.core_type<tc>, window_params = [{transform_indices = @transform_0, window_bounds = array<i64: 1, 64, 16>}, {transform_indices = @transform_1, window_bounds = array<i64: 1, 8, 4>}, {transform_indices = @transform_2, window_bounds = array<i64: 1, 1, 1>}, {pipeline_mode = #tpu.pipeline_mode<synchronous>, transform_indices = @transform_3, window_bounds = array<i64: 16, 64>}, {pipeline_mode = #tpu.pipeline_mode<synchronous>, transform_indices = @transform_4, window_bounds = array<i64: 1, 64>}, {pipeline_mode = #tpu.pipeline_mode<synchronous>, transform_indices = @transform_5, window_bounds = array<i64: 4, 256>}, {pipeline_mode = #tpu.pipeline_mode<synchronous>, transform_indices = @transform_6, window_bounds = array<i64: 1, 256>}, {pipeline_mode = #tpu.pipeline_mode<synchronous>, transform_indices = @transform_7, window_bounds = array<i64: 1, 32>}, {pipeline_mode = #tpu.pipeline_mode<synchronous>, transform_indices = @transform_8, window_bounds = array<i64: 1, 32>}, {pipeline_mode = #tpu.pipeline_mode<synchronous>, transform_indices = @transform_9, window_bounds = array<i64: 1, 128>}, {pipeline_mode = #tpu.pipeline_mode<synchronous>, transform_indices = @transform_10, window_bounds = array<i64: 1, 128>}, {pipeline_mode = #tpu.pipeline_mode<synchronous>, transform_indices = @transform_11, window_bounds = array<i64: 128, 384>}, {pipeline_mode = #tpu.pipeline_mode<synchronous>, transform_indices = @transform_12, window_bounds = array<i64: 1, 384>}, {pipeline_mode = #tpu.pipeline_mode<synchronous>, transform_indices = @transform_13, window_bounds = array<i64: 128, 128>}, {pipeline_mode = #tpu.pipeline_mode<synchronous>, transform_indices = @transform_14, window_bounds = array<i64: 1, 128>}, {pipeline_mode = #tpu.pipeline_mode<synchronous>, transform_indices = @transform_15, window_bounds = array<i64: 1, 128>}, {pipeline_mode = #tpu.pipeline_mode<synchronous>, transform_indices = @transform_16, window_bounds = array<i64: 1, 128>}, {pipeline_mode = #tpu.pipeline_mode<synchronous>, transform_indices = @transform_17, window_bounds = array<i64: 128, 512>}, {pipeline_mode = #tpu.pipeline_mode<synchronous>, transform_indices = @transform_18, window_bounds = array<i64: 1, 512>}, {pipeline_mode = #tpu.pipeline_mode<synchronous>, transform_indices = @transform_19, window_bounds = array<i64: 512, 128>}, {pipeline_mode = #tpu.pipeline_mode<synchronous>, transform_indices = @transform_20, window_bounds = array<i64: 1, 128>}, {pipeline_mode = #tpu.pipeline_mode<synchronous>, transform_indices = @transform_21, window_bounds = array<i64: 128, 64>}, {pipeline_mode = #tpu.pipeline_mode<synchronous>, transform_indices = @transform_22, window_bounds = array<i64: 256, 128>}, {pipeline_mode = #tpu.pipeline_mode<synchronous>, transform_indices = @transform_23, window_bounds = array<i64: 64, 128>}, {pipeline_mode = #tpu.pipeline_mode<synchronous>, transform_indices = @transform_24, window_bounds = array<i64: 128, 16>}, {pipeline_mode = #tpu.pipeline_mode<synchronous>, transform_indices = @transform_25, window_bounds = array<i64: 1, 16>}, {transform_indices = @transform_26, window_bounds = array<i64: 1, 64, 16>}]} {
    %c0 = arith.constant 0 : index
    %c0_0 = arith.constant 0 : index
    %c0_1 = arith.constant 0 : index
    %0 = vector.load %arg1[%c0, %c0_0, %c0_1] : memref<1x64x16xbf16, #tpu.memory_space<vmem>>, vector<1x64x16xbf16>
    %1 = vector.shape_cast %0 : vector<1x64x16xbf16> to vector<64x16xbf16>
    %c0_2 = arith.constant 0 : index
    %c0_3 = arith.constant 0 : index
    %2 = vector.load %arg4[%c0_2, %c0_3] : memref<16x64xbf16, #tpu.memory_space<vmem>>, vector<16x64xbf16>
    %cst = arith.constant dense<0.000000e+00> : vector<64x64xf32>
    %3 = tpu.matmul %1, %2, %cst {dimension_numbers = #tpu.dot_dimension_numbers<[1], [0], [0], [1], [0, 0, 1, 1], [], []>} : vector<64x16xbf16>, vector<16x64xbf16>, vector<64x64xf32> -> vector<64x64xf32>
    %c0_4 = arith.constant 0 : index
    %c0_5 = arith.constant 0 : index
    %4 = vector.load %arg5[%c0_4, %c0_5] : memref<1x64xf32, #tpu.memory_space<vmem>>, vector<1x64xf32>
    %5 = vector.broadcast %4 : vector<1x64xf32> to vector<64x64xf32>
    %6 = arith.addf %3, %5 : vector<64x64xf32>
    %cst_6 = arith.constant 0.000000e+00 : f32
    %7 = vector.broadcast %cst_6 : f32 to vector<64x64xf32>
    %8 = arith.maximumf %6, %7 : vector<64x64xf32>
    %c0_7 = arith.constant 0 : index
    %c0_8 = arith.constant 0 : index
    %9 = vector.load %arg28[%c0_7, %c0_8] : memref<64x128xf32, #tpu.memory_space<vmem>>, vector<64x64xf32>
    tpu.vector_store %arg28[%c0_7, %c0_8], %8 {strides = array<i32>} : memref<64x128xf32, #tpu.memory_space<vmem>>, vector<64x64xf32>,
    %c0_9 = arith.constant 0 : index
    %c0_10 = arith.constant 0 : index
    %c0_11 = arith.constant 0 : index
    %10 = vector.load %arg2[%c0_9, %c0_10, %c0_11] : memref<1x8x4xbf16, #tpu.memory_space<vmem>>, vector<1x8x4xbf16>
    %11 = vector.shape_cast %10 : vector<1x8x4xbf16> to vector<8x4xbf16>
    %c0_12 = arith.constant 0 : index
    %c0_13 = arith.constant 0 : index
    %12 = vector.load %arg6[%c0_12, %c0_13] : memref<4x256xbf16, #tpu.memory_space<vmem>>, vector<4x256xbf16>
    %cst_14 = arith.constant dense<0.000000e+00> : vector<8x256xf32>
    %13 = tpu.matmul %11, %12, %cst_14 {dimension_numbers = #tpu.dot_dimension_numbers<[1], [0], [0], [1], [0, 0, 1, 1], [], []>} : vector<8x4xbf16>, vector<4x256xbf16>, vector<8x256xf32> -> vector<8x256xf32>
    %c0_15 = arith.constant 0 : index
    %c0_16 = arith.constant 0 : index
    %14 = vector.load %arg7[%c0_15, %c0_16] : memref<1x256xf32, #tpu.memory_space<vmem>>, vector<1x256xf32>
    %15 = vector.broadcast %14 : vector<1x256xf32> to vector<8x256xf32>
    %16 = arith.addf %13, %15 : vector<8x256xf32>
    %cst_17 = arith.constant 0.000000e+00 : f32
    %17 = vector.broadcast %cst_17 : f32 to vector<8x256xf32>
    %18 = arith.maximumf %16, %17 : vector<8x256xf32>
    %19 = vector.extract_strided_slice %18 {offsets = [0, 0], sizes = [8, 32], strides = [1, 1]} : vector<8x256xf32> to vector<8x32xf32>
    %c0_18 = arith.constant 0 : index
    %c64 = arith.constant 64 : index
    %20 = vector.load %arg28[%c0_18, %c64] : memref<64x128xf32, #tpu.memory_space<vmem>>, vector<8x32xf32>
    tpu.vector_store %arg28[%c0_18, %c64], %19 {strides = array<i32>} : memref<64x128xf32, #tpu.memory_space<vmem>>, vector<8x32xf32>,
    %21 = vector.extract_strided_slice %18 {offsets = [0, 32], sizes = [8, 32], strides = [1, 1]} : vector<8x256xf32> to vector<8x32xf32>
    %c8 = arith.constant 8 : index
    %c64_19 = arith.constant 64 : index
    %22 = vector.load %arg28[%c8, %c64_19] : memref<64x128xf32, #tpu.memory_space<vmem>>, vector<8x32xf32>
    tpu.vector_store %arg28[%c8, %c64_19], %21 {strides = array<i32>} : memref<64x128xf32, #tpu.memory_space<vmem>>, vector<8x32xf32>,
    %23 = vector.extract_strided_slice %18 {offsets = [0, 64], sizes = [8, 32], strides = [1, 1]} : vector<8x256xf32> to vector<8x32xf32>
    %c16 = arith.constant 16 : index
    %c64_20 = arith.constant 64 : index
    %24 = vector.load %arg28[%c16, %c64_20] : memref<64x128xf32, #tpu.memory_space<vmem>>, vector<8x32xf32>
    tpu.vector_store %arg28[%c16, %c64_20], %23 {strides = array<i32>} : memref<64x128xf32, #tpu.memory_space<vmem>>, vector<8x32xf32>,
    %25 = vector.extract_strided_slice %18 {offsets = [0, 96], sizes = [8, 32], strides = [1, 1]} : vector<8x256xf32> to vector<8x32xf32>
    %c24 = arith.constant 24 : index
    %c64_21 = arith.constant 64 : index
    %26 = vector.load %arg28[%c24, %c64_21] : memref<64x128xf32, #tpu.memory_space<vmem>>, vector<8x32xf32>
    tpu.vector_store %arg28[%c24, %c64_21], %25 {strides = array<i32>} : memref<64x128xf32, #tpu.memory_space<vmem>>, vector<8x32xf32>,
    %27 = vector.extract_strided_slice %18 {offsets = [0, 128], sizes = [8, 32], strides = [1, 1]} : vector<8x256xf32> to vector<8x32xf32>
    %c32 = arith.constant 32 : index
    %c64_22 = arith.constant 64 : index
    %28 = vector.load %arg28[%c32, %c64_22] : memref<64x128xf32, #tpu.memory_space<vmem>>, vector<8x32xf32>
    tpu.vector_store %arg28[%c32, %c64_22], %27 {strides = array<i32>} : memref<64x128xf32, #tpu.memory_space<vmem>>, vector<8x32xf32>,
    %29 = vector.extract_strided_slice %18 {offsets = [0, 160], sizes = [8, 32], strides = [1, 1]} : vector<8x256xf32> to vector<8x32xf32>
    %c40 = arith.constant 40 : index
    %c64_23 = arith.constant 64 : index
    %30 = vector.load %arg28[%c40, %c64_23] : memref<64x128xf32, #tpu.memory_space<vmem>>, vector<8x32xf32>
    tpu.vector_store %arg28[%c40, %c64_23], %29 {strides = array<i32>} : memref<64x128xf32, #tpu.memory_space<vmem>>, vector<8x32xf32>,
    %31 = vector.extract_strided_slice %18 {offsets = [0, 192], sizes = [8, 32], strides = [1, 1]} : vector<8x256xf32> to vector<8x32xf32>
    %c48 = arith.constant 48 : index
    %c64_24 = arith.constant 64 : index
    %32 = vector.load %arg28[%c48, %c64_24] : memref<64x128xf32, #tpu.memory_space<vmem>>, vector<8x32xf32>
    tpu.vector_store %arg28[%c48, %c64_24], %31 {strides = array<i32>} : memref<64x128xf32, #tpu.memory_space<vmem>>, vector<8x32xf32>,
    %33 = vector.extract_strided_slice %18 {offsets = [0, 224], sizes = [8, 32], strides = [1, 1]} : vector<8x256xf32> to vector<8x32xf32>
    %c56 = arith.constant 56 : index
    %c64_25 = arith.constant 64 : index
    %34 = vector.load %arg28[%c56, %c64_25] : memref<64x128xf32, #tpu.memory_space<vmem>>, vector<8x32xf32>
    tpu.vector_store %arg28[%c56, %c64_25], %33 {strides = array<i32>} : memref<64x128xf32, #tpu.memory_space<vmem>>, vector<8x32xf32>,
    %c0_26 = arith.constant 0 : index
    %c0_27 = arith.constant 0 : index
    %c0_28 = arith.constant 0 : index
    %35 = vector.load %arg3[%c0_26, %c0_27, %c0_28] : memref<1x1x1xf32, #tpu.memory_space<vmem>>, vector<1x1x1xf32>
    %36 = vector.shape_cast %35 : vector<1x1x1xf32> to vector<1x1xf32>
    %c0_29 = arith.constant 0 : index
    %c0_30 = arith.constant 0 : index
    %37 = vector.load %arg8[%c0_29, %c0_30] : memref<1x32xf32, #tpu.memory_space<vmem>>, vector<1x32xf32>
    %38 = vector.broadcast %36 : vector<1x1xf32> to vector<1x32xf32>
    %39 = arith.mulf %38, %37 : vector<1x32xf32>
    %c0_31 = arith.constant 0 : index
    %c0_32 = arith.constant 0 : index
    %40 = vector.load %arg9[%c0_31, %c0_32] : memref<1x32xf32, #tpu.memory_space<vmem>>, vector<1x32xf32>
    %41 = arith.addf %39, %40 : vector<1x32xf32>
    %42 = vector.shape_cast %41 : vector<1x32xf32> to vector<1x32xf32>
    %43 = vector.broadcast %42 : vector<1x32xf32> to vector<64x32xf32>
    %c0_33 = arith.constant 0 : index
    %c96 = arith.constant 96 : index
    %44 = vector.load %arg28[%c0_33, %c96] : memref<64x128xf32, #tpu.memory_space<vmem>>, vector<64x32xf32>
    tpu.vector_store %arg28[%c0_33, %c96], %43 {strides = array<i32>} : memref<64x128xf32, #tpu.memory_space<vmem>>, vector<64x32xf32>,
    %c0_34 = arith.constant 0 : index
    %c0_35 = arith.constant 0 : index
    %45 = vector.load %arg28[%c0_34, %c0_35] : memref<64x128xf32, #tpu.memory_space<vmem>>, vector<64x128xf32>
    %c0_36 = arith.constant 0 : index
    %c0_37 = arith.constant 0 : index
    %46 = vector.load %arg10[%c0_36, %c0_37] : memref<1x128xf32, #tpu.memory_space<vmem>>, vector<1x128xf32>
    %c0_38 = arith.constant 0 : index
    %c0_39 = arith.constant 0 : index
    %47 = vector.load %arg11[%c0_38, %c0_39] : memref<1x128xf32, #tpu.memory_space<vmem>>, vector<1x128xf32>
    %cst_40 = arith.constant dense<0.000000e+00> : vector<64xf32>
    %48 = vector.multi_reduction <add>, %45, %cst_40 [1] : vector<64x128xf32> to vector<64xf32>
    %49 = vector.shape_cast %48 : vector<64xf32> to vector<64x1xf32>
    %cst_41 = arith.constant 1.280000e+02 : f32
    %50 = vector.broadcast %cst_41 : f32 to vector<64x1xf32>
    %51 = arith.divf %49, %50 : vector<64x1xf32>
    %52 = vector.broadcast %51 : vector<64x1xf32> to vector<64x128xf32>
    %53 = arith.subf %45, %52 : vector<64x128xf32>
    %54 = arith.mulf %53, %53 : vector<64x128xf32>
    %cst_42 = arith.constant dense<0.000000e+00> : vector<64xf32>
    %55 = vector.multi_reduction <add>, %54, %cst_42 [1] : vector<64x128xf32> to vector<64xf32>
    %56 = vector.shape_cast %55 : vector<64xf32> to vector<64x1xf32>
    %cst_43 = arith.constant 1.280000e+02 : f32
    %57 = vector.broadcast %cst_43 : f32 to vector<64x1xf32>
    %58 = arith.divf %56, %57 : vector<64x1xf32>
    %59 = vector.broadcast %51 : vector<64x1xf32> to vector<64x128xf32>
    %60 = arith.subf %45, %59 : vector<64x128xf32>
    %cst_44 = arith.constant 9.99999974E-6 : f32
    %61 = vector.broadcast %cst_44 : f32 to vector<64x1xf32>
    %62 = arith.addf %58, %61 : vector<64x1xf32>
    %63 = math.rsqrt %62 : vector<64x1xf32>
    %64 = vector.broadcast %63 : vector<64x1xf32> to vector<64x128xf32>
    %65 = arith.mulf %60, %64 : vector<64x128xf32>
    %66 = vector.broadcast %46 : vector<1x128xf32> to vector<64x128xf32>
    %67 = arith.mulf %65, %66 : vector<64x128xf32>
    %68 = vector.broadcast %47 : vector<1x128xf32> to vector<64x128xf32>
    %69 = arith.addf %67, %68 : vector<64x128xf32>
    %70 = arith.truncf %69 : vector<64x128xf32> to vector<64x128xbf16>
    %c0_45 = arith.constant 0 : index
    %c0_46 = arith.constant 0 : index
    %71 = vector.load %arg12[%c0_45, %c0_46] : memref<128x384xbf16, #tpu.memory_space<vmem>>, vector<128x384xbf16>
    %cst_47 = arith.constant dense<0.000000e+00> : vector<64x384xf32>
    %72 = tpu.matmul %70, %71, %cst_47 {dimension_numbers = #tpu.dot_dimension_numbers<[1], [0], [0], [1], [0, 0, 1, 1], [], []>} : vector<64x128xbf16>, vector<128x384xbf16>, vector<64x384xf32> -> vector<64x384xf32>
    %c0_48 = arith.constant 0 : index
    %c0_49 = arith.constant 0 : index
    %73 = vector.load %arg13[%c0_48, %c0_49] : memref<1x384xf32, #tpu.memory_space<vmem>>, vector<1x384xf32>
    %74 = vector.broadcast %73 : vector<1x384xf32> to vector<64x384xf32>
    %75 = arith.addf %72, %74 : vector<64x384xf32>
    %76 = vector.extract_strided_slice %75 {offsets = [0, 0], sizes = [64, 128], strides = [1, 1]} : vector<64x384xf32> to vector<64x128xf32>
    %77 = vector.extract_strided_slice %75 {offsets = [0, 128], sizes = [64, 128], strides = [1, 1]} : vector<64x384xf32> to vector<64x128xf32>
    %78 = vector.extract_strided_slice %75 {offsets = [0, 256], sizes = [64, 128], strides = [1, 1]} : vector<64x384xf32> to vector<64x128xf32>
    %79 = arith.truncf %76 : vector<64x128xf32> to vector<64x128xbf16>
    %80 = arith.truncf %77 : vector<64x128xf32> to vector<64x128xbf16>
    %cst_50 = arith.constant dense<0.000000e+00> : vector<64x64xf32>
    %81 = tpu.matmul %79, %80, %cst_50 {dimension_numbers = #tpu.dot_dimension_numbers<[1], [1], [0], [0], [0, 0, 1, 0], [], []>} : vector<64x128xbf16>, vector<64x128xbf16>, vector<64x64xf32> -> vector<64x64xf32>
    %cst_51 = arith.constant 0.0883883461 : f32
    %82 = vector.broadcast %cst_51 : f32 to vector<64x64xf32>
    %83 = arith.mulf %81, %82 : vector<64x64xf32>
    %cst_52 = arith.constant dense<0xFF800000> : vector<64xf32>
    %84 = vector.multi_reduction <maximumf>, %83, %cst_52 [1] : vector<64x64xf32> to vector<64xf32>
    %85 = vector.shape_cast %84 : vector<64xf32> to vector<64x1xf32>
    %86 = vector.broadcast %85 : vector<64x1xf32> to vector<64x64xf32>
    %87 = arith.subf %83, %86 : vector<64x64xf32>
    %88 = math.exp %87 : vector<64x64xf32>
    %cst_53 = arith.constant dense<0.000000e+00> : vector<64xf32>
    %89 = vector.multi_reduction <add>, %88, %cst_53 [1] : vector<64x64xf32> to vector<64xf32>
    %90 = vector.shape_cast %89 : vector<64xf32> to vector<64x1xf32>
    %91 = tpu.reciprocal %90 {approx = true} : vector<64x1xf32> -> vector<64x1xf32>
    %92 = vector.broadcast %91 : vector<64x1xf32> to vector<64x64xf32>
    %93 = arith.mulf %88, %92 : vector<64x64xf32>
    %94 = arith.truncf %93 : vector<64x64xf32> to vector<64x64xbf16>
    %95 = arith.truncf %78 : vector<64x128xf32> to vector<64x128xbf16>
    %cst_54 = arith.constant dense<0.000000e+00> : vector<64x128xf32>
    %96 = tpu.matmul %94, %95, %cst_54 {dimension_numbers = #tpu.dot_dimension_numbers<[1], [0], [0], [1], [0, 0, 1, 1], [], []>} : vector<64x64xbf16>, vector<64x128xbf16>, vector<64x128xf32> -> vector<64x128xf32>
    %97 = arith.truncf %96 : vector<64x128xf32> to vector<64x128xbf16>
    %c0_55 = arith.constant 0 : index
    %c0_56 = arith.constant 0 : index
    %98 = vector.load %arg14[%c0_55, %c0_56] : memref<128x128xbf16, #tpu.memory_space<vmem>>, vector<128x128xbf16>
    %cst_57 = arith.constant dense<0.000000e+00> : vector<64x128xf32>
    %99 = tpu.matmul %97, %98, %cst_57 {dimension_numbers = #tpu.dot_dimension_numbers<[1], [0], [0], [1], [0, 0, 1, 1], [], []>} : vector<64x128xbf16>, vector<128x128xbf16>, vector<64x128xf32> -> vector<64x128xf32>
    %100 = arith.addf %45, %99 : vector<64x128xf32>
    %c0_58 = arith.constant 0 : index
    %c0_59 = arith.constant 0 : index
    %101 = vector.load %arg15[%c0_58, %c0_59] : memref<1x128xf32, #tpu.memory_space<vmem>>, vector<1x128xf32>
    %102 = vector.broadcast %101 : vector<1x128xf32> to vector<64x128xf32>
    %103 = arith.addf %100, %102 : vector<64x128xf32>
    %c0_60 = arith.constant 0 : index
    %c0_61 = arith.constant 0 : index
    %104 = vector.load %arg16[%c0_60, %c0_61] : memref<1x128xf32, #tpu.memory_space<vmem>>, vector<1x128xf32>
    %c0_62 = arith.constant 0 : index
    %c0_63 = arith.constant 0 : index
    %105 = vector.load %arg17[%c0_62, %c0_63] : memref<1x128xf32, #tpu.memory_space<vmem>>, vector<1x128xf32>
    %cst_64 = arith.constant dense<0.000000e+00> : vector<64xf32>
    %106 = vector.multi_reduction <add>, %103, %cst_64 [1] : vector<64x128xf32> to vector<64xf32>
    %107 = vector.shape_cast %106 : vector<64xf32> to vector<64x1xf32>
    %cst_65 = arith.constant 1.280000e+02 : f32
    %108 = vector.broadcast %cst_65 : f32 to vector<64x1xf32>
    %109 = arith.divf %107, %108 : vector<64x1xf32>
    %110 = vector.broadcast %109 : vector<64x1xf32> to vector<64x128xf32>
    %111 = arith.subf %103, %110 : vector<64x128xf32>
    %112 = arith.mulf %111, %111 : vector<64x128xf32>
    %cst_66 = arith.constant dense<0.000000e+00> : vector<64xf32>
    %113 = vector.multi_reduction <add>, %112, %cst_66 [1] : vector<64x128xf32> to vector<64xf32>
    %114 = vector.shape_cast %113 : vector<64xf32> to vector<64x1xf32>
    %cst_67 = arith.constant 1.280000e+02 : f32
    %115 = vector.broadcast %cst_67 : f32 to vector<64x1xf32>
    %116 = arith.divf %114, %115 : vector<64x1xf32>
    %117 = vector.broadcast %109 : vector<64x1xf32> to vector<64x128xf32>
    %118 = arith.subf %103, %117 : vector<64x128xf32>
    %cst_68 = arith.constant 9.99999974E-6 : f32
    %119 = vector.broadcast %cst_68 : f32 to vector<64x1xf32>
    %120 = arith.addf %116, %119 : vector<64x1xf32>
    %121 = math.rsqrt %120 : vector<64x1xf32>
    %122 = vector.broadcast %121 : vector<64x1xf32> to vector<64x128xf32>
    %123 = arith.mulf %118, %122 : vector<64x128xf32>
    %124 = vector.broadcast %104 : vector<1x128xf32> to vector<64x128xf32>
    %125 = arith.mulf %123, %124 : vector<64x128xf32>
    %126 = vector.broadcast %105 : vector<1x128xf32> to vector<64x128xf32>
    %127 = arith.addf %125, %126 : vector<64x128xf32>
    %128 = arith.truncf %127 : vector<64x128xf32> to vector<64x128xbf16>
    %c0_69 = arith.constant 0 : index
    %c0_70 = arith.constant 0 : index
    %129 = vector.load %arg18[%c0_69, %c0_70] : memref<128x512xbf16, #tpu.memory_space<vmem>>, vector<128x512xbf16>
    %cst_71 = arith.constant dense<0.000000e+00> : vector<64x512xf32>
    %130 = tpu.matmul %128, %129, %cst_71 {dimension_numbers = #tpu.dot_dimension_numbers<[1], [0], [0], [1], [0, 0, 1, 1], [], []>} : vector<64x128xbf16>, vector<128x512xbf16>, vector<64x512xf32> -> vector<64x512xf32>
    %c0_72 = arith.constant 0 : index
    %c0_73 = arith.constant 0 : index
    %131 = vector.load %arg19[%c0_72, %c0_73] : memref<1x512xf32, #tpu.memory_space<vmem>>, vector<1x512xf32>
    %132 = vector.broadcast %131 : vector<1x512xf32> to vector<64x512xf32>
    %133 = arith.addf %130, %132 : vector<64x512xf32>
    %134 = arith.mulf %133, %133 : vector<64x512xf32>
    %135 = arith.mulf %133, %134 : vector<64x512xf32>
    %cst_74 = arith.constant 4.471500e-02 : f32
    %136 = vector.broadcast %cst_74 : f32 to vector<64x512xf32>
    %137 = arith.mulf %136, %135 : vector<64x512xf32>
    %138 = arith.addf %133, %137 : vector<64x512xf32>
    %cst_75 = arith.constant 0.797884583 : f32
    %139 = vector.broadcast %cst_75 : f32 to vector<64x512xf32>
    %140 = arith.mulf %139, %138 : vector<64x512xf32>
    %141 = math.tanh %140 : vector<64x512xf32>
    %cst_76 = arith.constant 1.000000e+00 : f32
    %142 = vector.broadcast %cst_76 : f32 to vector<64x512xf32>
    %143 = arith.addf %142, %141 : vector<64x512xf32>
    %cst_77 = arith.constant 5.000000e-01 : f32
    %144 = vector.broadcast %cst_77 : f32 to vector<64x512xf32>
    %145 = arith.mulf %144, %143 : vector<64x512xf32>
    %146 = arith.mulf %133, %145 : vector<64x512xf32>
    %147 = arith.truncf %146 : vector<64x512xf32> to vector<64x512xbf16>
    %c0_78 = arith.constant 0 : index
    %c0_79 = arith.constant 0 : index
    %148 = vector.load %arg20[%c0_78, %c0_79] : memref<512x128xbf16, #tpu.memory_space<vmem>>, vector<512x128xbf16>
    %cst_80 = arith.constant dense<0.000000e+00> : vector<64x128xf32>
    %149 = tpu.matmul %147, %148, %cst_80 {dimension_numbers = #tpu.dot_dimension_numbers<[1], [0], [0], [1], [0, 0, 1, 1], [], []>} : vector<64x512xbf16>, vector<512x128xbf16>, vector<64x128xf32> -> vector<64x128xf32>
    %150 = arith.addf %103, %149 : vector<64x128xf32>
    %c0_81 = arith.constant 0 : index
    %c0_82 = arith.constant 0 : index
    %151 = vector.load %arg21[%c0_81, %c0_82] : memref<1x128xf32, #tpu.memory_space<vmem>>, vector<1x128xf32>
    %152 = vector.broadcast %151 : vector<1x128xf32> to vector<64x128xf32>
    %153 = arith.addf %150, %152 : vector<64x128xf32>
    %154 = arith.truncf %153 : vector<64x128xf32> to vector<64x128xbf16>
    %c0_83 = arith.constant 0 : index
    %c0_84 = arith.constant 0 : index
    %155 = vector.load %arg22[%c0_83, %c0_84] : memref<128x64xbf16, #tpu.memory_space<vmem>>, vector<128x64xbf16>
    %cst_85 = arith.constant dense<0.000000e+00> : vector<64x64xf32>
    %156 = tpu.matmul %154, %155, %cst_85 {dimension_numbers = #tpu.dot_dimension_numbers<[1], [0], [0], [1], [0, 0, 1, 1], [], []>} : vector<64x128xbf16>, vector<128x64xbf16>, vector<64x64xf32> -> vector<64x64xf32>
    %157 = arith.truncf %18 : vector<8x256xf32> to vector<8x256xbf16>
    %c0_86 = arith.constant 0 : index
    %c0_87 = arith.constant 0 : index
    %158 = vector.load %arg23[%c0_86, %c0_87] : memref<256x128xbf16, #tpu.memory_space<vmem>>, vector<256x128xbf16>
    %cst_88 = arith.constant dense<0.000000e+00> : vector<8x128xf32>
    %159 = tpu.matmul %157, %158, %cst_88 {dimension_numbers = #tpu.dot_dimension_numbers<[1], [0], [0], [1], [0, 0, 1, 1], [], []>} : vector<8x256xbf16>, vector<256x128xbf16>, vector<8x128xf32> -> vector<8x128xf32>
    %160 = vector.extract_strided_slice %159 {offsets = [0, 0], sizes = [8, 64], strides = [1, 1]} : vector<8x128xf32> to vector<8x64xf32>
    %161 = vector.extract_strided_slice %159 {offsets = [0, 64], sizes = [8, 64], strides = [1, 1]} : vector<8x128xf32> to vector<8x64xf32>
    %162 = arith.truncf %156 : vector<64x64xf32> to vector<64x64xbf16>
    %163 = arith.truncf %160 : vector<8x64xf32> to vector<8x64xbf16>
    %cst_89 = arith.constant dense<0.000000e+00> : vector<64x8xf32>
    %164 = tpu.matmul %162, %163, %cst_89 {dimension_numbers = #tpu.dot_dimension_numbers<[1], [1], [0], [0], [0, 0, 1, 0], [], []>} : vector<64x64xbf16>, vector<8x64xbf16>, vector<64x8xf32> -> vector<64x8xf32>
    %cst_90 = arith.constant 1.250000e-01 : f32
    %165 = vector.broadcast %cst_90 : f32 to vector<64x8xf32>
    %166 = arith.mulf %164, %165 : vector<64x8xf32>
    %cst_91 = arith.constant dense<0xFF800000> : vector<64xf32>
    %167 = vector.multi_reduction <maximumf>, %166, %cst_91 [1] : vector<64x8xf32> to vector<64xf32>
    %168 = vector.shape_cast %167 : vector<64xf32> to vector<64x1xf32>
    %169 = vector.broadcast %168 : vector<64x1xf32> to vector<64x8xf32>
    %170 = arith.subf %166, %169 : vector<64x8xf32>
    %171 = math.exp %170 : vector<64x8xf32>
    %cst_92 = arith.constant dense<0.000000e+00> : vector<64xf32>
    %172 = vector.multi_reduction <add>, %171, %cst_92 [1] : vector<64x8xf32> to vector<64xf32>
    %173 = vector.shape_cast %172 : vector<64xf32> to vector<64x1xf32>
    %174 = tpu.reciprocal %173 {approx = true} : vector<64x1xf32> -> vector<64x1xf32>
    %175 = vector.broadcast %174 : vector<64x1xf32> to vector<64x8xf32>
    %176 = arith.mulf %171, %175 : vector<64x8xf32>
    %177 = arith.truncf %176 : vector<64x8xf32> to vector<64x8xbf16>
    %178 = arith.truncf %161 : vector<8x64xf32> to vector<8x64xbf16>
    %cst_93 = arith.constant dense<0.000000e+00> : vector<64x64xf32>
    %179 = tpu.matmul %177, %178, %cst_93 {dimension_numbers = #tpu.dot_dimension_numbers<[1], [0], [0], [1], [0, 0, 1, 1], [], []>} : vector<64x8xbf16>, vector<8x64xbf16>, vector<64x64xf32> -> vector<64x64xf32>
    %180 = arith.truncf %179 : vector<64x64xf32> to vector<64x64xbf16>
    %c0_94 = arith.constant 0 : index
    %c0_95 = arith.constant 0 : index
    %181 = vector.load %arg24[%c0_94, %c0_95] : memref<64x128xbf16, #tpu.memory_space<vmem>>, vector<64x128xbf16>
    %cst_96 = arith.constant dense<0.000000e+00> : vector<64x128xf32>
    %182 = tpu.matmul %180, %181, %cst_96 {dimension_numbers = #tpu.dot_dimension_numbers<[1], [0], [0], [1], [0, 0, 1, 1], [], []>} : vector<64x64xbf16>, vector<64x128xbf16>, vector<64x128xf32> -> vector<64x128xf32>
    %183 = arith.addf %153, %182 : vector<64x128xf32>
    %184 = arith.truncf %183 : vector<64x128xf32> to vector<64x128xbf16>
    %c0_97 = arith.constant 0 : index
    %c0_98 = arith.constant 0 : index
    %185 = vector.load %arg25[%c0_97, %c0_98] : memref<128x16xbf16, #tpu.memory_space<vmem>>, vector<128x16xbf16>
    %cst_99 = arith.constant dense<0.000000e+00> : vector<64x16xf32>
    %186 = tpu.matmul %184, %185, %cst_99 {dimension_numbers = #tpu.dot_dimension_numbers<[1], [0], [0], [1], [0, 0, 1, 1], [], []>} : vector<64x128xbf16>, vector<128x16xbf16>, vector<64x16xf32> -> vector<64x16xf32>
    %c0_100 = arith.constant 0 : index
    %c0_101 = arith.constant 0 : index
    %187 = vector.load %arg26[%c0_100, %c0_101] : memref<1x16xf32, #tpu.memory_space<vmem>>, vector<1x16xf32>
    %188 = vector.broadcast %187 : vector<1x16xf32> to vector<64x16xf32>
    %189 = arith.addf %186, %188 : vector<64x16xf32>
    %c0_102 = arith.constant 0 : index
    %c0_103 = arith.constant 0 : index
    %c0_104 = arith.constant 0 : index
    %190 = vector.load %arg27[%c0_102, %c0_103, %c0_104] : memref<1x64x16xf32, #tpu.memory_space<vmem>>, vector<1x64x16xf32>
    %191 = vector.shape_cast %190 : vector<1x64x16xf32> to vector<64x16xf32>
    %192 = vector.shape_cast %189 : vector<64x16xf32> to vector<1x64x16xf32>
    tpu.vector_store %arg27[%c0_102, %c0_103, %c0_104], %192 {strides = array<i32>} : memref<1x64x16xf32, #tpu.memory_space<vmem>>, vector<1x64x16xf32>,
    return
  }
  func.func @transform_0(%arg0: i32) -> (i32, i32, i32) {
    %c0_i32 = arith.constant 0 : i32
    %c0_i32_0 = arith.constant 0 : i32
    %c0_i32_1 = arith.constant 0 : i32
    return %arg0, %c0_i32, %c0_i32_0 : i32, i32, i32
  }
  func.func @transform_1(%arg0: i32) -> (i32, i32, i32) {
    %c0_i32 = arith.constant 0 : i32
    %c0_i32_0 = arith.constant 0 : i32
    %c0_i32_1 = arith.constant 0 : i32
    return %arg0, %c0_i32, %c0_i32_0 : i32, i32, i32
  }
  func.func @transform_2(%arg0: i32) -> (i32, i32, i32) {
    %c0_i32 = arith.constant 0 : i32
    %c0_i32_0 = arith.constant 0 : i32
    %c0_i32_1 = arith.constant 0 : i32
    return %arg0, %c0_i32, %c0_i32_0 : i32, i32, i32
  }
  func.func @transform_3(%arg0: i32) -> (i32, i32) {
    %c0_i32 = arith.constant 0 : i32
    %c0_i32_0 = arith.constant 0 : i32
    %c0_i32_1 = arith.constant 0 : i32
    return %c0_i32, %c0_i32_0 : i32, i32
  }
  func.func @transform_4(%arg0: i32) -> (i32, i32) {
    %c0_i32 = arith.constant 0 : i32
    %c0_i32_0 = arith.constant 0 : i32
    %c0_i32_1 = arith.constant 0 : i32
    return %c0_i32, %c0_i32_0 : i32, i32
  }
  func.func @transform_5(%arg0: i32) -> (i32, i32) {
    %c0_i32 = arith.constant 0 : i32
    %c0_i32_0 = arith.constant 0 : i32
    %c0_i32_1 = arith.constant 0 : i32
    return %c0_i32, %c0_i32_0 : i32, i32
  }
  func.func @transform_6(%arg0: i32) -> (i32, i32) {
    %c0_i32 = arith.constant 0 : i32
    %c0_i32_0 = arith.constant 0 : i32
    %c0_i32_1 = arith.constant 0 : i32
    return %c0_i32, %c0_i32_0 : i32, i32
  }
  func.func @transform_7(%arg0: i32) -> (i32, i32) {
    %c0_i32 = arith.constant 0 : i32
    %c0_i32_0 = arith.constant 0 : i32
    %c0_i32_1 = arith.constant 0 : i32
    return %c0_i32, %c0_i32_0 : i32, i32
  }
  func.func @transform_8(%arg0: i32) -> (i32, i32) {
    %c0_i32 = arith.constant 0 : i32
    %c0_i32_0 = arith.constant 0 : i32
    %c0_i32_1 = arith.constant 0 : i32
    return %c0_i32, %c0_i32_0 : i32, i32
  }
  func.func @transform_9(%arg0: i32) -> (i32, i32) {
    %c0_i32 = arith.constant 0 : i32
    %c0_i32_0 = arith.constant 0 : i32
    %c0_i32_1 = arith.constant 0 : i32
    return %c0_i32, %c0_i32_0 : i32, i32
  }
  func.func @transform_10(%arg0: i32) -> (i32, i32) {
    %c0_i32 = arith.constant 0 : i32
    %c0_i32_0 = arith.constant 0 : i32
    %c0_i32_1 = arith.constant 0 : i32
    return %c0_i32, %c0_i32_0 : i32, i32
  }
  func.func @transform_11(%arg0: i32) -> (i32, i32) {
    %c0_i32 = arith.constant 0 : i32
    %c0_i32_0 = arith.constant 0 : i32
    %c0_i32_1 = arith.constant 0 : i32
    return %c0_i32, %c0_i32_0 : i32, i32
  }
  func.func @transform_12(%arg0: i32) -> (i32, i32) {
    %c0_i32 = arith.constant 0 : i32
    %c0_i32_0 = arith.constant 0 : i32
    %c0_i32_1 = arith.constant 0 : i32
    return %c0_i32, %c0_i32_0 : i32, i32
  }
  func.func @transform_13(%arg0: i32) -> (i32, i32) {
    %c0_i32 = arith.constant 0 : i32
    %c0_i32_0 = arith.constant 0 : i32
    %c0_i32_1 = arith.constant 0 : i32
    return %c0_i32, %c0_i32_0 : i32, i32
  }
  func.func @transform_14(%arg0: i32) -> (i32, i32) {
    %c0_i32 = arith.constant 0 : i32
    %c0_i32_0 = arith.constant 0 : i32
    %c0_i32_1 = arith.constant 0 : i32
    return %c0_i32, %c0_i32_0 : i32, i32
  }
  func.func @transform_15(%arg0: i32) -> (i32, i32) {
    %c0_i32 = arith.constant 0 : i32
    %c0_i32_0 = arith.constant 0 : i32
    %c0_i32_1 = arith.constant 0 : i32
    return %c0_i32, %c0_i32_0 : i32, i32
  }
  func.func @transform_16(%arg0: i32) -> (i32, i32) {
    %c0_i32 = arith.constant 0 : i32
    %c0_i32_0 = arith.constant 0 : i32
    %c0_i32_1 = arith.constant 0 : i32
    return %c0_i32, %c0_i32_0 : i32, i32
  }
  func.func @transform_17(%arg0: i32) -> (i32, i32) {
    %c0_i32 = arith.constant 0 : i32
    %c0_i32_0 = arith.constant 0 : i32
    %c0_i32_1 = arith.constant 0 : i32
    return %c0_i32, %c0_i32_0 : i32, i32
  }
  func.func @transform_18(%arg0: i32) -> (i32, i32) {
    %c0_i32 = arith.constant 0 : i32
    %c0_i32_0 = arith.constant 0 : i32
    %c0_i32_1 = arith.constant 0 : i32
    return %c0_i32, %c0_i32_0 : i32, i32
  }
  func.func @transform_19(%arg0: i32) -> (i32, i32) {
    %c0_i32 = arith.constant 0 : i32
    %c0_i32_0 = arith.constant 0 : i32
    %c0_i32_1 = arith.constant 0 : i32
    return %c0_i32, %c0_i32_0 : i32, i32
  }
  func.func @transform_20(%arg0: i32) -> (i32, i32) {
    %c0_i32 = arith.constant 0 : i32
    %c0_i32_0 = arith.constant 0 : i32
    %c0_i32_1 = arith.constant 0 : i32
    return %c0_i32, %c0_i32_0 : i32, i32
  }
  func.func @transform_21(%arg0: i32) -> (i32, i32) {
    %c0_i32 = arith.constant 0 : i32
    %c0_i32_0 = arith.constant 0 : i32
    %c0_i32_1 = arith.constant 0 : i32
    return %c0_i32, %c0_i32_0 : i32, i32
  }
  func.func @transform_22(%arg0: i32) -> (i32, i32) {
    %c0_i32 = arith.constant 0 : i32
    %c0_i32_0 = arith.constant 0 : i32
    %c0_i32_1 = arith.constant 0 : i32
    return %c0_i32, %c0_i32_0 : i32, i32
  }
  func.func @transform_23(%arg0: i32) -> (i32, i32) {
    %c0_i32 = arith.constant 0 : i32
    %c0_i32_0 = arith.constant 0 : i32
    %c0_i32_1 = arith.constant 0 : i32
    return %c0_i32, %c0_i32_0 : i32, i32
  }
  func.func @transform_24(%arg0: i32) -> (i32, i32) {
    %c0_i32 = arith.constant 0 : i32
    %c0_i32_0 = arith.constant 0 : i32
    %c0_i32_1 = arith.constant 0 : i32
    return %c0_i32, %c0_i32_0 : i32, i32
  }
  func.func @transform_25(%arg0: i32) -> (i32, i32) {
    %c0_i32 = arith.constant 0 : i32
    %c0_i32_0 = arith.constant 0 : i32
    %c0_i32_1 = arith.constant 0 : i32
    return %c0_i32, %c0_i32_0 : i32, i32
  }
  func.func @transform_26(%arg0: i32) -> (i32, i32, i32) {
    %c0_i32 = arith.constant 0 : i32
    %c0_i32_0 = arith.constant 0 : i32
    %c0_i32_1 = arith.constant 0 : i32
    return %arg0, %c0_i32, %c0_i32_0 : i32, i32, i32
  }
}

</mosaic_0001>

<bundles_post_ra>
// kernel: forward.1
= control target key start
LH: loop header
LB: loop body
LE: loop exit
PB: predicated region body
PF: predicated region fallthrough
CT: control target
= control target key end

     0   :  { %s5096_s27 = smov 0   ;;  %s6370_s0 = inlined_call_operand.vmem [shape: bf16[2,64,16], index: 0, kind: input, shape index: {}]   ;;  %s6371_s1 = inlined_call_operand.vmem [shape: bf16[2,8,4], index: 1, kind: input, shape index: {}]   ;;  %s6372_s2 = inlined_call_operand.vmem [shape: f32[2,1,1], index: 2, kind: input, shape index: {}]   ;;  %s6373_s3 = inlined_call_operand.vmem [shape: bf16[16,64], index: 3, kind: input, shape index: {}]   ;;  %s6374_s4 = inlined_call_operand.vmem [shape: f32[1,64], index: 4, kind: input, shape index: {}]   ;;  %s6375_s5 = inlined_call_operand.vmem [shape: bf16[4,256], index: 5, kind: input, shape index: {}]   ;;  %s6376_s6 = inlined_call_operand.vmem [shape: f32[1,256], index: 6, kind: input, shape index: {}]   ;;  %s6377_s7 = inlined_call_operand.vmem [shape: f32[1,32], index: 7, kind: input, shape index: {}]   ;;  %s6378_s8 = inlined_call_operand.vmem [shape: f32[1,32], index: 8, kind: input, shape index: {}]   ;;  %s6379_s9 = inlined_call_operand.vmem [shape: f32[1,128], index: 9, kind: input, shape index: {}]   ;;  %s6380_s10 = inlined_call_operand.vmem [shape: f32[1,128], index: 10, kind: input, shape index: {}]   ;;  %s6381_s11 = inlined_call_operand.vmem [shape: bf16[128,384], index: 11, kind: input, shape index: {}]   ;;  %s6382_s12 = inlined_call_operand.vmem [shape: f32[1,384], index: 12, kind: input, shape index: {}]   ;;  %s6383_s13 = inlined_call_operand.vmem [shape: bf16[128,128], index: 13, kind: input, shape index: {}]   ;;  %s6384_s14 = inlined_call_operand.vmem [shape: f32[1,128], index: 14, kind: input, shape index: {}]   ;;  %s6385_s15 = inlined_call_operand.vmem [shape: f32[1,128], index: 15, kind: input, shape index: {}]   ;;  %s6386_s16 = inlined_call_operand.vmem [shape: f32[1,128], index: 16, kind: input, shape index: {}]   ;;  %s6387_s17 = inlined_call_operand.vmem [shape: bf16[128,512], index: 17, kind: input, shape index: {}]   ;;  %s6388_s18 = inlined_call_operand.vmem [shape: f32[1,512], index: 18, kind: input, shape index: {}]   ;;  %s6389_s19 = inlined_call_operand.vmem [shape: bf16[512,128], index: 19, kind: input, shape index: {}]   ;;  %s6390_s20 = inlined_call_operand.vmem [shape: f32[1,128], index: 20, kind: input, shape index: {}]   ;;  %s6391_s21 = inlined_call_operand.vmem [shape: bf16[128,64], index: 21, kind: input, shape index: {}]   ;;  %s6392_s22 = inlined_call_operand.vmem [shape: bf16[256,128], index: 22, kind: input, shape index: {}]   ;;  %s6393_s23 = inlined_call_operand.vmem [shape: bf16[64,128], index: 23, kind: input, shape index: {}]   ;;  %s6394_s24 = inlined_call_operand.vmem [shape: bf16[128,16], index: 24, kind: input, shape index: {}]   ;;  %s6395_s25 = inlined_call_operand.vmem [shape: f32[1,16], index: 25, kind: input, shape index: {}]   ;;  %s6396_s26 = inlined_call_operand.vmem [shape: f32[2,64,16], index: 26, kind: output, shape index: {}]  }
   0x1   :  { %6412 = sst [smem:[#allocation18_spill]] %s6370_s0 }
   0x2   :  { %6413 = sst [smem:[#allocation19_spill]] %s6371_s1 }
   0x3   :  { %6414 = sst [smem:[#allocation20_spill]] %s6372_s2 }
   0x4   :  { %6415 = sst [smem:[#allocation21_spill]] %s6373_s3 }
   0x5   :  { %6416 = sst [smem:[#allocation22_spill]] %s6374_s4 }
   0x6   :  { %6417 = sst [smem:[#allocation23_spill]] %s6375_s5 }
   0x7   :  { %6418 = sst [smem:[#allocation24_spill]] %s6376_s6 }
   0x8   :  { %6419 = sst [smem:[#allocation25_spill]] %s6377_s7 }
   0x9   :  { %6420 = sst [smem:[#allocation26_spill]] %s6378_s8 }
   0xa   :  { %6421 = sst [smem:[#allocation27_spill]] %s6379_s9 }
   0xb   :  { %6422 = sst [smem:[#allocation28_spill]] %s6380_s10 }
   0xc LB: > { %6423 = sst [smem:[#allocation3_spill]] %s4955_s27  ;;  %s4068_s3 = sadd.s32 4294967295, %s4955_s27   ;;  %s4955_s27 = sphi %s5096_s27, %s36_s27  }
   0xd   : > { %p4072_p0 = scmp.ge.s32.totalorder %s4955_s27, 1  ;;  %p729_p1 = scmp.lt.s32.totalorder %s4955_s27, 3 }
   0xf   : > { %p730_p2 = pnand %p4072_p0, %p729_p1 }
  0x11   : > { %733 = sbr.rel (%p730_p2) target bundleno = 4177 (0x1051), region = 124 }
  0x18   : > { %s6424_s8 = sld [smem:[#allocation23_spill]]  ;;  %vm989_vm0 = vcmask 1041408   ;;  %s6425_s0 = sld [smem:[#allocation21_spill]]  ;;  %v4957_v4 = vmov 0   ;;  %vm985_vm1 = vcmask 31744   ;;  %vm867_vm2 = vcmask 130048  }
  0x19   : > { %1028 = vmatprep.mubr.bf16.mxu1 %v4957_v4  ;;  %p806_p3 = scmp.lt.s32.totalorder %s4068_s3, 1  ;;  %4627 = vset.pattern.permute.xlu0 %v4957_v4  ;;  %s6426_s5 = sld [smem:[#allocation19_spill]]  ;;  %v966_v11 = vlaneseq  ;;  %vm953_vm3 = vcmask 523264   ;;  %vm1043_vm4 = vcmask 785920   ;;  %vm1090_vm5 = vcmask 1048320  }
  0x1a   : > { %s6427_s28 = sld [smem:[#allocation20_spill]]  ;;  %s6429_s2 = sld [smem:[#allocation25_spill]]  ;;  %vm3546_vm6 = vcmask 64512   ;;  %vm3654_vm7 = vcmask 1043456  }
  0x1b   : > { %s6467_s3 = smov (!%p806_p3, %s4068_s3), 1  ;;  %v5131_v12 = vshrl.u32 %v966_v11, 7  ;;  %s6431_s7 = sld [smem:[#allocation26_spill]]  ;;  %v4635_v11 = vld [vmem:[%s6381_s11 + $0x4] ss:$12 sps:$4 sm:$0xff]  }
  0x1c   : > { %s4075_s9 = sshll.u32 %s6467_s3, 2  ;;  %s4248_s6 = sshll.u32 %s6467_s3, 5 }
  0x1d   : > { %v5134_v14 = vsub.s32 0, %v5131_v12  ;;  %v5148_v21 = vsub.s32 1, %v5131_v12  ;;  %s6432_s4 = sld [smem:[#allocation22_spill]]  ;;  %s4958_s29 = smov 32  }
  0x1e   : > { %v4088_v0 = vld.sshfl [vmem:[%s6424_s8] sm:$0x33 pattern:$0x76325410] }
  0x1f   : > { %v4628_v1 = vld [vmem:[%s6425_s0] sm:$0xff]   ;;  %v984_v2 = vcombine.high %v4088_v0, %v4088_v0  ;;  %v991_v3 = vsel %vm989_vm0, %v4088_v0, 0  ;;  %s814_s10 = scalar_lea.vmem %s6426_s5, %s4075_s9  ;;  %s6428_s0 = sld [smem:[#allocation18_spill]] }
  0x20   : > { %4439 = vmatprep.subr.bf16.mxu0 %v4628_v1  ;;  %v962_v5 = vld [vmem:[%s814_s10] sm:$0xf]  ;;  %s817_s8 = scalar_lea.vmem %s6427_s28, %s6467_s3  ;;  %s4960_s9 = smov 96  }
  0x21   : > { %4089 = vmatprep.subr.msk.bf16.mxu1 %vm989_vm0, %v984_v2  ;;  %4440 = vmatpush3.bf16.msra.mxu0 %v4628_v1  ;;  %v1068_v6 = vld [vmem:[%s817_s8] sm:$0x1] }
  0x22   : > { %997 = vmatpush1.bf16.msra.mxu1 %v991_v3  ;;  %1072 = vperm.xlu0 %4627, %v1068_v6   ;;  %v1069_v16 = vld [vmem:[%s6429_s2] sm:$0x1]  ;;  %s6436_s2 = sld [smem:[#allocation28_spill]] }
  0x23   : > { %v1080_v20 = vld [vmem:[%s6431_s7] sm:$0x1]  ;;  %1407 = vmatprep.subr.bf16.mxu0 %v4635_v11  ;;  %v4661_v11 = vld [vmem:[%s6381_s11 + $0xac] ss:$12 sps:$4 sm:$0xff]   ;;  %s4249_s7 = sshll.u32 %s6467_s3, 6 }
  0x24   : > { %v4078_v27 = vld [vmem:[%s6432_s4] ss:$0 sm:$0xff] }
  0x25   : > { %4090 = vmatmul.mubr.msk.bf16.vlgmr.msra.gmra.mrb[0].mxu1 %vm985_vm1, %v962_v5  ;;  %s810_s27 = scalar_lea.vmem %s6428_s0, %s4248_s6  ;;  %s4959_s0 = smov 64  }
  0x26   : > { %v4629_v7 = vld [vmem:[%s810_s27] sm:$0xff]   ;;  %v4630_v8 = vld [vmem:[%s810_s27 + $0x8] sm:$0xff]   ;;  %v4631_v9 = vld [vmem:[%s810_s27 + $0x10] sm:$0xff]  }
  0x27   : > { %4441 = vmatprep.mubr.msk.bf16.mxu0 %vm867_vm2, %v4629_v7  ;;  %v4632_v10 = vld [vmem:[%s810_s27 + $0x18] sm:$0xff]   ;;  %s6430_s27 = sld [smem:[#allocation24_spill]] }
  0x28   : > { %4442 = vmatmul.mubr.msk.bf16.vlgmr.msra.gmra.mrb[0].mxu0 %vm867_vm2, %v4630_v8 }
  0x29   : > { %4445 = vmatprep.mubr.msk.bf16.mxu0 %vm867_vm2, %v4631_v9 }
  0x2d   : > { %v964_v17 = vld [vmem:[%s6430_s27] sm:$0x3] }
  0x2e   : > { %v969_v19 = vrot.slane %v964_v17, %v5134_v14  ;;  %v973_v29 = vrot.slane %v964_v17, %v5148_v21  ;;  %v4641_v17 = vld [vmem:[%s6381_s11 + $0x34] ss:$12 sps:$4 sm:$0xff]  }
  0x30   : > { %4446 = vmatmul.mubr.msk.bf16.gmra.mrb[4].mxu0 %vm867_vm2, %v4632_v10  ;;  %v4633_v10 = vld [vmem:[%s6381_s11] ss:$12 sps:$4 sm:$0xff]  }
  0x31   : > { %1439 = vmatprep.mubr.bf16.mxu0 %v4957_v4  ;;  %1408 = vmatpush1.bf16.msra.mxu0 %v4633_v10  ;;  %v4655_v10 = vld [vmem:[%s6381_s11 + $0x90] ss:$12 sps:$4 sm:$0xff]  }
  0xa1   : > { %v1073_v13 = vpop.permute.xlu0 %1072 }
  0xa2   : > { %v1078_v15 = vrot.slane %v1073_v13, %v5134_v14  ;;  %v4638_v13 = vld [vmem:[%s6381_s11 + $0x1c] ss:$12 sps:$4 sm:$0xff]  }
  0xa3   : > { %1409 = vmatprep.subr.bf16.mxu0 %v4638_v13  ;;  %v4662_v13 = vld [vmem:[%s6381_s11 + $0x80] ss:$12 sps:$4 sm:$0xff]  }
  0xa4   : > { %v1079_v18 = vmul.f32 %v1078_v15, %v1069_v16  ;;  %v4642_v15 = vld [vmem:[%s6381_s11 + $0x8] ss:$12 sps:$4 sm:$0xff]   ;;  %v4636_v16 = vld [vmem:[%s6381_s11 + $0x18] ss:$12 sps:$4 sm:$0xff]  }
  0xa5   : > { %4449 = vmatprep.subr.bf16.mxu1 %v4642_v15  ;;  %1410 = vmatpush1.bf16.msra.mxu0 %v4636_v16  ;;  %v4663_v16 = vld [vmem:[%s6381_s11 + $0x98] ss:$12 sps:$4 sm:$0xff]  }
  0xa6   : > { %v1081_v23 = vadd.f32 %v1080_v20, %v1079_v18  ;;  %4450 = vmatpush3.bf16.msra.mxu1 %v4642_v15  ;;  %v4639_v18 = vld [vmem:[%s6381_s11 + $0x30] ss:$12 sps:$4 sm:$0xff]   ;;  %1411 = vmatprep.subr.bf16.mxu0 %v4641_v17  ;;  %v4659_v15 = vld [vmem:[%s6381_s11 + $0xa8] ss:$12 sps:$4 sm:$0xff]  }
  0xa7   : > { %v4664_v17 = vld [vmem:[%s6381_s11 + $0xb0] ss:$12 sps:$4 sm:$0xff]  }
  0xa8   : > { %v1086_v34 = vrot.slane %v1081_v23, %v5134_v14 }
  0xa9   : > { %1412 = vmatpush1.bf16.msra.mxu0 %v4639_v18 }
  0xf8   : > { %v1030_v22 = vpop.f32.mrb[0].mxu1 }
  0xf9   : > { %v1031_v24 = vadd.f32 %v1030_v22, %v969_v19  ;;  %v1032_v25 = vpop.f32.mrb[1].mxu1 }
  0xfa   : > { %v1034_v26 = vpop.f32.mrb[2].mxu1  ;;  %v1033_v37 = vadd.f32 %v1032_v25, %v973_v29 }
  0xfb   : > { %v5153_v28 = vmax.f32 %v1031_v24, 0.0  ;;  %v1035_v30 = vpop.f32.mrb[3].mxu1  ;;  %v4443_v31 = vpop.f32.mrb[0].mxu0 }
  0xfc   : > { %v923_v32 = vadd.f32 %v4443_v31, %v4078_v27  ;;  %v914_v33 = vpop.f32.mrb[1].mxu0  ;;  %v5166_v45 = vmax.f32 %v1033_v37, 0.0 }
  0xfd   : > { %6433 = vst [vmem:[#allocation4_spill] sm:$0xff] %v5153_v28  ;;  %1045 = vrot.lane.b32.xlu1 %v5153_v28, %s4958_s29  ;;  %1040 = vrot.lane.b32.xlu0 %v5153_v28, %s4959_s0  ;;  %v915_v35 = vadd.f32 %v4078_v27, %v914_v33  ;;  %v4444_v36 = vpop.f32.mrb[2].mxu0 }
  0xfe   : > { %v947_v38 = vmax.f32 %v923_v32, 0.0  ;;  %v926_v39 = vadd.f32 %v4444_v36, %v4078_v27  ;;  %v917_v40 = vpop.f32.mrb[3].mxu0  ;;  %6434 = vst [vmem:[#allocation5_spill] sm:$0xff] %v5166_v45 }
  0xff   : > { %v945_v41 = vmax.f32 %v915_v35, 0.0  ;;  %v918_v42 = vadd.f32 %v4078_v27, %v917_v40 }
 0x100   : > { %956 = vst.msk [vmem:[#allocation2 + $0x10] sm:$0xff] %vm953_vm3, %v947_v38  ;;  %v948_v43 = vmax.f32 %v926_v39, 0.0 }
 0x101   : > { %1087 = vrot.lane.b32.xlu1 %v1086_v34, %s4960_s9  ;;  %1050 = vrot.lane.b32.xlu0 %v5153_v28, %s4960_s9  ;;  %1049 = vst.msk [vmem:[#allocation2 + $0x10] sm:$0xff] %vm1043_vm4, %v5153_v28  ;;  %v946_v44 = vmax.f32 %v918_v42, 0.0 }
 0x102   : > { %954 = vst.msk [vmem:[#allocation2] sm:$0xff] %vm953_vm3, %v945_v41  ;;  %957 = vst.msk [vmem:[#allocation2 + $0x18] sm:$0xff] %vm953_vm3, %v948_v43 }
 0x103   : > { %955 = vst.msk [vmem:[#allocation2 + $0x8] sm:$0xff] %vm953_vm3, %v946_v44  ;;  %v4447_v46 = vpop.f32.mrb[4].mxu0 }
 0x104   : > { %v939_v47 = vadd.f32 %v4447_v46, %v4078_v27  ;;  %v930_v48 = vpop.f32.mrb[5].mxu0 }
 0x105   : > { %1055 = vrot.lane.b32.xlu1 %v5166_v45, %s4959_s0  ;;  %1059 = vrot.lane.b32.xlu0 %v5166_v45, %s4958_s29  ;;  %v931_v49 = vadd.f32 %v4078_v27, %v930_v48  ;;  %v4448_v50 = vpop.f32.mrb[6].mxu0  ;;  %s6435_s29 = sld [smem:[#allocation27_spill]] }
 0x106   : > { %v951_v51 = vmax.f32 %v939_v47, 0.0  ;;  %v942_v52 = vadd.f32 %v4448_v50, %v4078_v27  ;;  %v933_v53 = vpop.f32.mrb[7].mxu0 }
 0x107   : > { %v949_v54 = vmax.f32 %v931_v49, 0.0  ;;  %v934_v55 = vadd.f32 %v4078_v27, %v933_v53 }
 0x108   : > { %960 = vst.msk [vmem:[#allocation2 + $0x30] sm:$0xff] %vm953_vm3, %v951_v51  ;;  %v952_v56 = vmax.f32 %v942_v52, 0.0 }
 0x109   : > { %1064 = vrot.lane.b32.xlu1 %v5166_v45, %s4960_s9  ;;  %1063 = vst.msk [vmem:[#allocation2 + $0x30] sm:$0xff] %vm1043_vm4, %v5166_v45  ;;  %v950_v57 = vmax.f32 %v934_v55, 0.0  ;;  %v4646_v55 = vld [vmem:[%s6381_s11 + $0x20] ss:$12 sps:$4 sm:$0xff]   ;;  %s822_s9 = scalar_lea.vmem %s6396_s26, %s4249_s7 }
 0x10a   : > { %958 = vst.msk [vmem:[#allocation2 + $0x20] sm:$0xff] %vm953_vm3, %v949_v54  ;;  %961 = vst.msk [vmem:[#allocation2 + $0x38] sm:$0xff] %vm953_vm3, %v952_v56  ;;  %v4645_v54 = vld [vmem:[%s6381_s11 + $0x4c] ss:$12 sps:$4 sm:$0xff]   ;;  %v4643_v56 = vld [vmem:[%s6381_s11 + $0x48] ss:$12 sps:$4 sm:$0xff]   ;;  %4451 = vmatprep.subr.bf16.mxu1 %v4646_v55 }
 0x10b   : > { %959 = vst.msk [vmem:[#allocation2 + $0x28] sm:$0xff] %vm953_vm3, %v950_v57  ;;  %1413 = vmatprep.subr.bf16.mxu0 %v4645_v54  ;;  %4452 = vmatpush3.bf16.msra.mxu1 %v4646_v55  ;;  %v4649_v57 = vld [vmem:[%s6381_s11 + $0x64] ss:$12 sps:$4 sm:$0xff]  }
 0x10c   : > { %1414 = vmatpush1.bf16.msra.mxu0 %v4643_v56 }
 0x10d   : > { %1415 = vmatprep.subr.bf16.mxu0 %v4649_v57  ;;  %v4092_v57 = vld [vmem:[%s6436_s2] ss:$0 sm:$0xff] }
 0x16f   : > { %v1046_v58 = vpop.permute.xlu1 %1045  ;;  %v1041_v59 = vpop.permute.xlu0 %1040 }
 0x170   : > { %1048 = vst.msk [vmem:[#allocation2 + $0x8] sm:$0xff] %vm1043_vm4, %v1046_v58  ;;  %1044 = vst.msk [vmem:[#allocation2] sm:$0xff] %vm1043_vm4, %v1041_v59  ;;  %v4650_v58 = vld [vmem:[%s6381_s11 + $0x38] ss:$12 sps:$4 sm:$0xff]   ;;  %v4647_v59 = vld [vmem:[%s6381_s11 + $0x60] ss:$12 sps:$4 sm:$0xff]  }
 0x171   : > { %4453 = vmatprep.subr.bf16.mxu1 %v4650_v58  ;;  %1416 = vmatpush1.bf16.msra.mxu0 %v4647_v59 }
 0x172   : > { %4454 = vmatpush3.bf16.msra.mxu1 %v4650_v58 }
 0x173   : > { %v1088_v60 = vpop.permute.xlu1 %1087  ;;  %v1051_v61 = vpop.permute.xlu0 %1050 }
 0x174   : > { %1091 = vst.msk [vmem:[#allocation2] sm:$0xff] %vm1090_vm5, %v1088_v60  ;;  %1092 = vst.msk [vmem:[#allocation2 + $0x8] sm:$0xff] %vm1090_vm5, %v1088_v60 }
 0x175   : > { %1093 = vst.msk [vmem:[#allocation2 + $0x10] sm:$0xff] %vm1090_vm5, %v1088_v60  ;;  %1097 = vst.msk [vmem:[#allocation2 + $0x30] sm:$0xff] %vm1090_vm5, %v1088_v60 }
 0x176   : > { %1053 = vst.msk [vmem:[#allocation2 + $0x18] sm:$0xff] %vm1043_vm4, %v1051_v61  ;;  %v4654_v61 = vld [vmem:[%s6381_s11 + $0x50] ss:$12 sps:$4 sm:$0xff]  }
 0x177   : > { %1094 = vst.msk [vmem:[#allocation2 + $0x18] sm:$0xff] %vm1090_vm5, %v1088_v60  ;;  %v1056_v62 = vpop.permute.xlu1 %1055  ;;  %v1060_v63 = vpop.permute.xlu0 %1059  ;;  %4455 = vmatprep.subr.bf16.mxu1 %v4654_v61 }
 0x178   : > { %1058 = vst.msk [vmem:[#allocation2 + $0x20] sm:$0xff] %vm1043_vm4, %v1056_v62  ;;  %1062 = vst.msk [vmem:[#allocation2 + $0x28] sm:$0xff] %vm1043_vm4, %v1060_v63  ;;  %v4651_v62 = vld [vmem:[%s6381_s11 + $0x78] ss:$12 sps:$4 sm:$0xff]   ;;  %4456 = vmatpush3.bf16.msra.mxu1 %v4654_v61  ;;  %v4657_v63 = vld [vmem:[%s6381_s11 + $0x94] ss:$12 sps:$4 sm:$0xff]  }
 0x179   : > { %1095 = vst.msk [vmem:[#allocation2 + $0x20] sm:$0xff] %vm1090_vm5, %v1088_v60  ;;  %1096 = vst.msk [vmem:[#allocation2 + $0x28] sm:$0xff] %vm1090_vm5, %v1088_v60 }
 0x17b   : > { %v1065_v0 = vpop.permute.xlu1 %1064  ;;  %v5193_v1 = vld [vmem:[#allocation2 + $0x8] sm:$0xff]  ;;  %v5195_v2 = vld [vmem:[#allocation2] sm:$0xff] }
 0x17c   : > { %1067 = vst.msk [vmem:[#allocation2 + $0x38] sm:$0xff] %vm1043_vm4, %v1065_v0  ;;  %1111 = vadd.xlane.f32.xlu1 %v5193_v1  ;;  %1109 = vadd.xlane.f32.xlu0 %v5195_v2  ;;  %v5201_v3 = vld [vmem:[#allocation2 + $0x10] sm:$0xff] }
 0x17d   : > { %1098 = vst.msk [vmem:[#allocation2 + $0x38] sm:$0xff] %vm1090_vm5, %v1088_v60  ;;  %v5210_v7 = vld [vmem:[#allocation2 + $0x30] sm:$0xff]  ;;  %v4653_v60 = vld [vmem:[%s6381_s11 + $0x7c] ss:$12 sps:$4 sm:$0xff]  }
 0x17e   : > { %v5207_v6 = vld [vmem:[#allocation2 + $0x18] sm:$0xff]  ;;  %1417 = vmatprep.subr.bf16.mxu0 %v4653_v60  ;;  %v4658_v0 = vld [vmem:[%s6381_s11 + $0x68] ss:$12 sps:$4 sm:$0xff]  }
 0x17f   : > { %1418 = vmatpush1.bf16.msra.mxu0 %v4651_v62  ;;  %4457 = vmatprep.subr.bf16.mxu1 %v4658_v0 }
 0x180   : > { %1113 = vadd.xlane.f32.xlu0 %v5201_v3  ;;  %v5204_v5 = vld [vmem:[#allocation2 + $0x20] sm:$0xff]  ;;  %v5213_v8 = vld [vmem:[#allocation2 + $0x28] sm:$0xff]  ;;  %1419 = vmatprep.subr.bf16.mxu0 %v4657_v63 }
 0x181   : > { %1117 = vadd.xlane.f32.xlu1 %v5204_v5  ;;  %4458 = vmatpush3.bf16.msra.mxu1 %v4658_v0 }
 0x182   : > { %4459 = vmatprep.subr.bf16.mxu1 %v4662_v13 }
 0x183   : > { %1420 = vmatpush1.bf16.msra.mxu0 %v4655_v10 }
 0x184   : > { %1115 = vadd.xlane.f32.xlu0 %v5207_v6  ;;  %v5216_v9 = vld [vmem:[#allocation2 + $0x38] sm:$0xff]  ;;  %1421 = vmatprep.subr.bf16.mxu0 %v4661_v11 }
 0x185   : > { %1121 = vadd.xlane.f32.xlu1 %v5210_v7  ;;  %4460 = vmatpush3.bf16.msra.mxu1 %v4662_v13 }
 0x186   : > { %4461 = vmatprep.subr.bf16.mxu1 %v4663_v16 }
 0x187   : > { %1422 = vmatpush1.bf16.msra.mxu0 %v4659_v15 }
 0x188   : > { %1119 = vadd.xlane.f32.xlu0 %v5213_v8 }
 0x189   : > { %4462 = vmatpush3.bf16.msra.mxu1 %v4663_v16 }
 0x18a   : > { %4463 = vmatprep.subr.bf16.mxu1 %v4664_v17 }
 0x18c   : > { %1123 = vadd.xlane.f32.xlu0 %v5216_v9 }
 0x18d   : > { %4464 = vmatpush3.bf16.msra.mxu1 %v4664_v17 }
 0x209   : > { %v1112_v19 = vpop.xlane.xlu1 %1111  ;;  %v1110_v20 = vpop.xlane.xlu0 %1109 }
 0x20a   : > { %v1127_v22 = vmul.f32 0.0078125, %v1112_v19  ;;  %v1126_v23 = vmul.f32 0.0078125, %v1110_v20 }
 0x20c   : > { %v5241_v24 = vsub.f32 %v5193_v1, %v1127_v22  ;;  %v5244_v25 = vsub.f32 %v5195_v2, %v1126_v23 }
 0x20d   : > { %v1114_v26 = vpop.xlane.xlu0 %1113 }
 0x20e   : > { %v1128_v27 = vmul.f32 0.0078125, %v1114_v26  ;;  %v1118_v29 = vpop.xlane.xlu1 %1117  ;;  %v1143_v30 = vmul.f32 %v5241_v24, %v5241_v24  ;;  %v1142_v31 = vmul.f32 %v5244_v25, %v5244_v25 }
 0x20f   : > { %v1130_v32 = vmul.f32 0.0078125, %v1118_v29 }
 0x210   : > { %v5251_v33 = vsub.f32 %v5201_v3, %v1128_v27  ;;  %1152 = vadd.xlane.f32.xlu0 %v1143_v30  ;;  %1150 = vadd.xlane.f32.xlu1 %v1142_v31 }
 0x211   : > { %v1116_v34 = vpop.xlane.xlu0 %1115  ;;  %v5254_v35 = vsub.f32 %v5204_v5, %v1130_v32 }
 0x212   : > { %v1129_v36 = vmul.f32 0.0078125, %v1116_v34  ;;  %v1122_v37 = vpop.xlane.xlu1 %1121  ;;  %v1144_v38 = vmul.f32 %v5251_v33, %v5251_v33 }
 0x213   : > { %v1132_v39 = vmul.f32 0.0078125, %v1122_v37  ;;  %v1146_v44 = vmul.f32 %v5254_v35, %v5254_v35 }
 0x214   : > { %v5259_v40 = vsub.f32 %v5207_v6, %v1129_v36  ;;  %1154 = vadd.xlane.f32.xlu1 %v1144_v38 }
 0x215   : > { %v1120_v41 = vpop.xlane.xlu0 %1119  ;;  %v5262_v42 = vsub.f32 %v5210_v7, %v1132_v39 }
 0x216   : > { %v1131_v43 = vmul.f32 0.0078125, %v1120_v41  ;;  %v1145_v46 = vmul.f32 %v5259_v40, %v5259_v40 }
 0x217   : > { %v1148_v50 = vmul.f32 %v5262_v42, %v5262_v42 }
 0x218   : > { %v5269_v47 = vsub.f32 %v5213_v8, %v1131_v43  ;;  %1158 = vadd.xlane.f32.xlu1 %v1146_v44  ;;  %1156 = vadd.xlane.f32.xlu0 %v1145_v46 }
 0x219   : > { %v1124_v48 = vpop.xlane.xlu0 %1123 }
 0x21a   : > { %v1133_v49 = vmul.f32 0.0078125, %v1124_v48  ;;  %v1147_v51 = vmul.f32 %v5269_v47, %v5269_v47  ;;  %v4091_v48 = vld [vmem:[%s6435_s29] ss:$0 sm:$0xff] }
 0x21c   : > { %v5276_v52 = vsub.f32 %v5216_v9, %v1133_v49  ;;  %1162 = vadd.xlane.f32.xlu1 %v1148_v50  ;;  %1160 = vadd.xlane.f32.xlu0 %v1147_v51 }
 0x21e   : > { %v1149_v53 = vmul.f32 %v5276_v52, %v5276_v52 }
 0x220   : > { %1164 = vadd.xlane.f32.xlu0 %v1149_v53 }
 0x29d   : > { %v1151_v18 = vpop.xlane.xlu1 %1150  ;;  %v1153_v19 = vpop.xlane.xlu0 %1152 }
 0x29e   : > { %v1166_v20 = vmul.f32 0.0078125, %v1151_v18  ;;  %v1167_v22 = vmul.f32 0.0078125, %v1153_v19 }
 0x2a0   : > { %v1174_v23 = vadd.f32 1e-05, %v1166_v20  ;;  %v1175_v26 = vadd.f32 1e-05, %v1167_v22 }
 0x2a1   : > { %v1155_v27 = vpop.xlane.xlu1 %1154 }
 0x2a2   : > { %4789 = vrsqrt.f32 %v1174_v23  ;;  %v1168_v29 = vmul.f32 0.0078125, %v1155_v27 }
 0x2a3   : > { %4791 = vrsqrt.f32 %v1175_v26 }
 0x2a4   : > { %v1176_v30 = vadd.f32 1e-05, %v1168_v29 }
 0x2a5   : > { %v1159_v31 = vpop.xlane.xlu1 %1158  ;;  %v1157_v32 = vpop.xlane.xlu0 %1156 }
 0x2a6   : > { %4793 = vrsqrt.f32 %v1176_v30  ;;  %v1170_v34 = vmul.f32 0.0078125, %v1159_v31  ;;  %v1169_v36 = vmul.f32 0.0078125, %v1157_v32 }
 0x2a8   : > { %v1178_v37 = vadd.f32 1e-05, %v1170_v34  ;;  %v1177_v38 = vadd.f32 1e-05, %v1169_v36 }
 0x2a9   : > { %v1163_v39 = vpop.xlane.xlu1 %1162  ;;  %v1161_v41 = vpop.xlane.xlu0 %1160 }
 0x2aa   : > { %4795 = vrsqrt.f32 %v1178_v37  ;;  %v1172_v43 = vmul.f32 0.0078125, %v1163_v39  ;;  %v1171_v44 = vmul.f32 0.0078125, %v1161_v41 }
 0x2ab   : > { %4797 = vrsqrt.f32 %v1177_v38 }
 0x2ac   : > { %v4790_v46 = vpop.eup %4789  ;;  %v1180_v49 = vadd.f32 1e-05, %v1172_v43  ;;  %v1179_v50 = vadd.f32 1e-05, %v1171_v44 }
 0x2ad   : > { %v4792_v51 = vpop.eup %4791  ;;  %v1190_v53 = vmul.f32 %v4790_v46, %v5244_v25  ;;  %v1165_v54 = vpop.xlane.xlu0 %1164  ;;  %v1274_v46 = vsub.s32 2, %v5131_v12 }
 0x2ae   : > { %v1191_v55 = vmul.f32 %v4792_v51, %v5241_v24  ;;  %4799 = vrsqrt.f32 %v1180_v49  ;;  %v1173_v56 = vmul.f32 0.0078125, %v1165_v54 }
 0x2af   : > { %v1204_v58 = vmul.f32 %v4091_v48, %v1190_v53  ;;  %4801 = vrsqrt.f32 %v1179_v50 }
 0x2b0   : > { %v4794_v59 = vpop.eup %4793  ;;  %v1205_v60 = vmul.f32 %v4091_v48, %v1191_v55  ;;  %v1181_v61 = vadd.f32 1e-05, %v1173_v56 }
 0x2b1   : > { %v1218_v62 = vadd.f32 %v4092_v57, %v1204_v58  ;;  %v1192_v0 = vmul.f32 %v4794_v59, %v5251_v33 }
 0x2b2   : > { %4803 = vrsqrt.f32 %v1181_v61  ;;  %v1219_v63 = vadd.f32 %v4092_v57, %v1205_v60 }
 0x2b3   : > { %v1206_v13 = vmul.f32 %v4091_v48, %v1192_v0 }
 0x2b4   : > { %v4796_v25 = vpop.eup %4795  ;;  %v1226_v10 = vpack.c.bf16 %v1219_v63, %v1218_v62 }
 0x2b5   : > { %v4798_v11 = vpop.eup %4797  ;;  %v1194_v15 = vmul.f32 %v4796_v25, %v5254_v35  ;;  %v1220_v20 = vadd.f32 %v4092_v57, %v1206_v13 }
 0x2b6   : > { %1440 = vmatmul.mubr.bf16.vlgmr.msra.gmra.mrb[8].mxu0 %v1226_v10  ;;  %4465 = vmatprep.mubr.bf16.mxu1 %v1226_v10  ;;  %v1193_v24 = vmul.f32 %v4798_v11, %v5259_v40 }
 0x2b7   : > { %1449 = vmatprep.mubr.bf16.mxu0 %v4957_v4  ;;  %v1208_v23 = vmul.f32 %v4091_v48, %v1194_v15 }
 0x2b8   : > { %v4800_v16 = vpop.eup %4799  ;;  %v1207_v17 = vmul.f32 %v4091_v48, %v1193_v24 }
 0x2b9   : > { %v4802_v18 = vpop.eup %4801  ;;  %v1196_v19 = vmul.f32 %v4800_v16, %v5262_v42  ;;  %v1222_v35 = vadd.f32 %v4092_v57, %v1208_v23 }
 0x2ba   : > { %v1221_v22 = vadd.f32 %v4092_v57, %v1207_v17  ;;  %v1195_v33 = vmul.f32 %v4802_v18, %v5269_v47  ;;  %v1262_v47 = vld [vmem:[%s6382_s12] sm:$0x7] }
 0x2bb   : > { %v1210_v30 = vmul.f32 %v4091_v48, %v1196_v19  ;;  %v5355_v38 = vrot.slane %v1262_v47, %v5134_v14  ;;  %v1275_v55 = vrot.slane %v1262_v47, %v1274_v46 }
 0x2bc   : > { %v4804_v26 = vpop.eup %4803  ;;  %v1227_v27 = vpack.c.bf16 %v1221_v22, %v1220_v20  ;;  %v1209_v29 = vmul.f32 %v4091_v48, %v1195_v33 }
 0x2bd   : > { %v1197_v40 = vmul.f32 %v4804_v26, %v5276_v52  ;;  %v1224_v42 = vadd.f32 %v4092_v57, %v1210_v30  ;;  %v5352_v52 = vrot.slane %v1262_v47, %v5148_v21 }
 0x2be   : > { %1450 = vmatmul.mubr.bf16.gmra.mrb[12].mxu0 %v1227_v27  ;;  %4466 = vmatmul.mubr.bf16.vlgmr.msra.gmra.mrb[4].mxu1 %v1227_v27  ;;  %v1223_v31 = vadd.f32 %v4092_v57, %v1209_v29 }
 0x2bf   : > { %1459 = vmatprep.mubr.bf16.mxu0 %v4957_v4  ;;  %v1211_v32 = vmul.f32 %v4091_v48, %v1197_v40 }
 0x2c0   : > { %v1228_v34 = vpack.c.bf16 %v1223_v31, %v1222_v35 }
 0x2c1   : > { %v1225_v36 = vadd.f32 %v4092_v57, %v1211_v32 }
 0x2c2   : > { %4469 = vmatprep.mubr.bf16.mxu1 %v1228_v34 }
 0x2c3   : > { %v1229_v37 = vpack.c.bf16 %v1225_v36, %v1224_v42 }
 0x2c6   : > { %1460 = vmatmul.mubr.bf16.gmra.mrb[16].mxu0 %v1228_v34  ;;  %4470 = vmatmul.mubr.bf16.gmra.mrb[8].mxu1 %v1229_v37 }
 0x2c7   : > { %1469 = vmatprep.mubr.bf16.mxu0 %v4957_v4 }
 0x2ce   : > { %1470 = vmatmul.mubr.bf16.gmra.mrb[20].mxu0 %v1229_v37 }
 0x389   : > { %v1441_v39 = vpop.f32.mrb[8].mxu0 }
 0x38a   : > { %v1443_v41 = vpop.f32.mrb[9].mxu0  ;;  %v1442_v48 = vadd.f32 %v1441_v39, %v5355_v38 }
 0x38b   : > { %v1444_v43 = vadd.f32 %v1443_v41, %v5352_v52  ;;  %v1445_v44 = vpop.f32.mrb[10].mxu0 }
 0x38c   : > { %v1446_v49 = vadd.f32 %v1445_v44, %v5355_v38  ;;  %v1447_v50 = vpop.f32.mrb[11].mxu0 }
 0x38d   : > { %v1448_v51 = vadd.f32 %v1447_v50, %v5352_v52 }
 0x38e   : > { %v1545_v53 = vpack.c.bf16 %v1446_v49, %v1442_v48 }
 0x38f   : > { %v1549_v54 = vpack.c.bf16 %v1448_v51, %v1444_v43 }
 0x390   : > { %4481 = vmatprep.mubr.bf16.mxu0 %v1545_v53 }
 0x391   : > { %v1451_v56 = vpop.f32.mrb[12].mxu0  ;;  %v4467_v57 = vpop.f32.mrb[4].mxu1  ;;  %4473 = vmatprep.subr.bf16.mxu0 %v1549_v54 }
 0x392   : > { %v1453_v58 = vpop.f32.mrb[13].mxu0  ;;  %v1514_v59 = vpop.f32.mrb[5].mxu1  ;;  %4474 = vmatpush3.bf16.xpose.msra.mxu0 %v1549_v54  ;;  %v1452_v63 = vadd.f32 %v1451_v56, %v5355_v38  ;;  %v1523_v0 = vadd.f32 %v4467_v57, %v1275_v55 }
 0x393   : > { %v1454_v60 = vadd.f32 %v1453_v58, %v5352_v52  ;;  %v1455_v61 = vpop.f32.mrb[14].mxu0  ;;  %v4468_v62 = vpop.f32.mrb[6].mxu1  ;;  %v1515_v13 = vadd.f32 %v1514_v59, %v1275_v55 }
 0x394   : > { %v1456_v25 = vadd.f32 %v1455_v61, %v5355_v38  ;;  %v1526_v10 = vadd.f32 %v4468_v62, %v1275_v55  ;;  %v1457_v11 = vpop.f32.mrb[15].mxu0  ;;  %v1517_v24 = vpop.f32.mrb[7].mxu1 }
 0x395   : > { %v1458_v15 = vadd.f32 %v1457_v11, %v5352_v52  ;;  %v1518_v16 = vadd.f32 %v1517_v24, %v1275_v55 }
 0x396   : > { %v1546_v17 = vpack.c.bf16 %v1456_v25, %v1452_v63  ;;  %v1719_v18 = vpack.c.bf16 %v1526_v10, %v1523_v0 }
 0x397   : > { %v1550_v19 = vpack.c.bf16 %v1458_v15, %v1454_v60  ;;  %v1718_v20 = vpack.c.bf16 %v1518_v16, %v1515_v13 }
 0x399   : > { %v1461_v22 = vpop.f32.mrb[16].mxu0  ;;  %v4471_v33 = vpop.f32.mrb[8].mxu1  ;;  %4475 = vmatprep.subr.bf16.mxu0 %v1550_v19 }
 0x39a   : > { %v1463_v23 = vpop.f32.mrb[17].mxu0  ;;  %v1530_v26 = vpop.f32.mrb[9].mxu1  ;;  %4476 = vmatpush3.bf16.xpose.msra.mxu0 %v1550_v19  ;;  %v1462_v30 = vadd.f32 %v1461_v22, %v5355_v38  ;;  %v1539_v35 = vadd.f32 %v4471_v33, %v1275_v55 }
 0x39b   : > { %v1464_v27 = vadd.f32 %v1463_v23, %v5352_v52  ;;  %v1465_v29 = vpop.f32.mrb[18].mxu0  ;;  %v4472_v40 = vpop.f32.mrb[10].mxu1  ;;  %v1531_v36 = vadd.f32 %v1530_v26, %v1275_v55 }
 0x39c   : > { %v1466_v31 = vadd.f32 %v1465_v29, %v5355_v38  ;;  %v1542_v32 = vadd.f32 %v4472_v40, %v1275_v55  ;;  %v1467_v34 = vpop.f32.mrb[19].mxu0  ;;  %v1533_v42 = vpop.f32.mrb[11].mxu1 }
 0x39d   : > { %v1468_v37 = vadd.f32 %v1467_v34, %v5352_v52  ;;  %v1534_v47 = vadd.f32 %v1533_v42, %v1275_v55 }
 0x39e   : > { %v1547_v39 = vpack.c.bf16 %v1466_v31, %v1462_v30  ;;  %v1721_v41 = vpack.c.bf16 %v1542_v32, %v1539_v35 }
 0x39f   : > { %v1551_v43 = vpack.c.bf16 %v1468_v37, %v1464_v27  ;;  %v1720_v44 = vpack.c.bf16 %v1534_v47, %v1531_v36 }
 0x3a1   : > { %v1471_v48 = vpop.f32.mrb[20].mxu0  ;;  %4477 = vmatprep.subr.bf16.mxu0 %v1551_v43 }
 0x3a2   : > { %v1473_v49 = vpop.f32.mrb[21].mxu0  ;;  %4478 = vmatpush3.bf16.xpose.msra.mxu0 %v1551_v43  ;;  %v1472_v53 = vadd.f32 %v1471_v48, %v5355_v38 }
 0x3a3   : > { %v1474_v50 = vadd.f32 %v1473_v49, %v5352_v52  ;;  %v1475_v51 = vpop.f32.mrb[22].mxu0 }
 0x3a4   : > { %v1476_v54 = vadd.f32 %v1475_v51, %v5355_v38  ;;  %v1477_v56 = vpop.f32.mrb[23].mxu0 }
 0x3a5   : > { %v1478_v57 = vadd.f32 %v1477_v56, %v5352_v52 }
 0x3a6   : > { %v1548_v58 = vpack.c.bf16 %v1476_v54, %v1472_v53 }
 0x3a7   : > { %v1552_v55 = vpack.c.bf16 %v1478_v57, %v1474_v50 }
 0x3a9   : > { %4479 = vmatprep.subr.bf16.mxu0 %v1552_v55 }
 0x3aa   : > { %4480 = vmatpush3.bf16.xpose.msra.mxu0 %v1552_v55 }
 0x3ab   : > { %4489 = vmatprep.subr.bf16.mxu0 %v1718_v20 }
 0x3b1   : > { %4482 = vmatmul.mubr.bf16.vlgmr.msra.gmra.mrb[24].mxu0 %v1546_v17 }
 0x3b2   : > { %4485 = vmatprep.mubr.bf16.mxu0 %v1547_v39  ;;  %4490 = vmatpush3.bf16.msra.mxu0 %v1718_v20 }
 0x3b3   : > { %4491 = vmatprep.subr.bf16.mxu0 %v1719_v18 }
 0x3b6   : > { %4492 = vmatpush3.bf16.msra.mxu0 %v1719_v18 }
 0x3b7   : > { %4493 = vmatprep.subr.bf16.mxu0 %v1720_v44 }
 0x3b9   : > { %4486 = vmatmul.mubr.bf16.gmra.mrb[28].mxu0 %v1548_v58 }
 0x3ba   : > { %4494 = vmatpush3.bf16.msra.mxu0 %v1720_v44 }
 0x3bb   : > { %4495 = vmatprep.subr.bf16.mxu0 %v1721_v41 }
 0x3be   : > { %4496 = vmatpush3.bf16.msra.mxu0 %v1721_v41 }
 0x484   : > { %v4483_v59 = vpop.f32.mrb[24].mxu0 }
 0x485   : > { %v1587_v38 = vpop.f32.mrb[25].mxu0  ;;  %v1620_v62 = vmul.f32 0.088388346, %v4483_v59 }
 0x486   : > { %v1618_v60 = vmul.f32 0.088388346, %v1587_v38  ;;  %v4484_v61 = vpop.f32.mrb[26].mxu0 }
 0x487   : > { %v1590_v52 = vpop.f32.mrb[27].mxu0  ;;  %v1621_v25 = vmul.f32 0.088388346, %v4484_v61  ;;  %v1632_v24 = vsel %vm953_vm3, %v1620_v62, -inf }
 0x488   : > { %v1619_v63 = vmul.f32 0.088388346, %v1590_v52  ;;  %v1626_v0 = vsel %vm953_vm3, %v1618_v60, -inf }
 0x489   : > { %1627 = vmax.xlane.f32.xlu1 %v1626_v0  ;;  %v1635_v17 = vsel %vm953_vm3, %v1621_v25, -inf }
 0x48a   : > { %v1629_v10 = vsel %vm953_vm3, %v1619_v63, -inf }
 0x48b   : > { %1630 = vmax.xlane.f32.xlu0 %v1629_v10 }
 0x48c   : > { %v4487_v11 = vpop.f32.mrb[28].mxu0 }
 0x48d   : > { %1633 = vmax.xlane.f32.xlu1 %v1632_v24  ;;  %v1603_v13 = vpop.f32.mrb[29].mxu0  ;;  %v1624_v19 = vmul.f32 0.088388346, %v4487_v11 }
 0x48e   : > { %v1622_v15 = vmul.f32 0.088388346, %v1603_v13  ;;  %v4488_v16 = vpop.f32.mrb[30].mxu0 }
 0x48f   : > { %1636 = vmax.xlane.f32.xlu0 %v1635_v17  ;;  %v1606_v18 = vpop.f32.mrb[31].mxu0  ;;  %v1625_v33 = vmul.f32 0.088388346, %v4488_v16  ;;  %v1644_v26 = vsel %vm953_vm3, %v1624_v19, -inf  ;;  %v4665_v17 = vld [vmem:[%s6383_s13] sm:$0xff]  }
 0x490   : > { %v1623_v20 = vmul.f32 0.088388346, %v1606_v18  ;;  %v1638_v22 = vsel %vm953_vm3, %v1622_v15, -inf  ;;  %v4666_v18 = vld [vmem:[%s6383_s13 + $0x8] sm:$0xff]   ;;  %4505 = vmatprep.subr.bf16.mxu1 %v4665_v17 }
 0x491   : > { %1639 = vmax.xlane.f32.xlu1 %v1638_v22  ;;  %v1647_v27 = vsel %vm953_vm3, %v1625_v33, -inf  ;;  %4506 = vmatpush3.bf16.msra.mxu1 %v4665_v17  ;;  %v4669_v22 = vld [vmem:[%s6383_s13 + $0x20] sm:$0xff]  }
 0x492   : > { %v1641_v23 = vsel %vm953_vm3, %v1623_v20, -inf  ;;  %4507 = vmatprep.subr.bf16.mxu1 %v4666_v18  ;;  %v4129_v17 = vld [vmem:[%s6384_s14] ss:$0 sm:$0xff] }
 0x493   : > { %1642 = vmax.xlane.f32.xlu0 %v1641_v23  ;;  %v4671_v23 = vld [vmem:[%s6383_s13 + $0x30] sm:$0xff]  }
 0x495   : > { %1645 = vmax.xlane.f32.xlu1 %v1644_v26  ;;  %4508 = vmatpush3.bf16.msra.mxu1 %v4666_v18 }
 0x497   : > { %1648 = vmax.xlane.f32.xlu0 %v1647_v27 }
 0x516   : > { %v1628_v29 = vpop.xlane.xlu1 %1627 }
 0x517   : > { %v1650_v40 = vsub.f32 %v1618_v60, %v1628_v29 }
 0x518   : > { %v1631_v30 = vpop.xlane.xlu0 %1630 }
 0x519   : > { %v1658_v35 = vmul.f32 1.442695, %v1650_v40  ;;  %v1651_v31 = vsub.f32 %v1619_v63, %v1631_v30 }
 0x51a   : > { %v1634_v32 = vpop.xlane.xlu1 %1633 }
 0x51b   : > { %4805 = vpow2.f32 %v1658_v35  ;;  %v1660_v34 = vmul.f32 1.442695, %v1651_v31  ;;  %v1652_v42 = vsub.f32 %v1620_v62, %v1634_v32 }
 0x51c   : > { %v1637_v36 = vpop.xlane.xlu0 %1636 }
 0x51d   : > { %4807 = vpow2.f32 %v1660_v34  ;;  %v1662_v37 = vmul.f32 1.442695, %v1652_v42  ;;  %v1653_v47 = vsub.f32 %v1621_v25, %v1637_v36 }
 0x51e   : > { %v1640_v39 = vpop.xlane.xlu1 %1639 }
 0x51f   : > { %4809 = vpow2.f32 %v1662_v37  ;;  %v1664_v41 = vmul.f32 1.442695, %v1653_v47  ;;  %v1654_v43 = vsub.f32 %v1622_v15, %v1640_v39 }
 0x520   : > { %v1643_v44 = vpop.xlane.xlu0 %1642 }
 0x521   : > { %4811 = vpow2.f32 %v1664_v41  ;;  %v1666_v48 = vmul.f32 1.442695, %v1654_v43  ;;  %v1655_v49 = vsub.f32 %v1623_v20, %v1643_v44  ;;  %v4668_v20 = vld [vmem:[%s6383_s13 + $0x18] sm:$0xff]  }
 0x522   : > { %v1646_v50 = vpop.xlane.xlu1 %1645 }
 0x523   : > { %4813 = vpow2.f32 %v1666_v48  ;;  %v1668_v51 = vmul.f32 1.442695, %v1655_v49  ;;  %v1656_v53 = vsub.f32 %v1624_v19, %v1646_v50  ;;  %v4667_v19 = vld [vmem:[%s6383_s13 + $0x10] sm:$0xff]  }
 0x524   : > { %v1649_v54 = vpop.xlane.xlu0 %1648  ;;  %4509 = vmatprep.subr.bf16.mxu1 %v4667_v19 }
 0x525   : > { %v5384_v56 = vpop.eup %4805  ;;  %4815 = vpow2.f32 %v1668_v51  ;;  %v1670_v57 = vmul.f32 1.442695, %v1656_v53  ;;  %v1657_v58 = vsub.f32 %v1625_v33, %v1649_v54  ;;  %4510 = vmatpush3.bf16.msra.mxu1 %v4667_v19  ;;  %v4670_v33 = vld [vmem:[%s6383_s13 + $0x28] sm:$0xff]  }
 0x526   : > { %v1674_v55 = vsel %vm953_vm3, %v5384_v56, 0.0  ;;  %4511 = vmatprep.subr.bf16.mxu1 %v4668_v20 }
 0x527   : > { %v5388_v59 = vpop.eup %4807  ;;  %4817 = vpow2.f32 %v1670_v57  ;;  %v1672_v38 = vmul.f32 1.442695, %v1657_v58  ;;  %1675 = vadd.xlane.f32.xlu1 %v1674_v55 }
 0x528   : > { %v1677_v60 = vsel %vm953_vm3, %v5388_v59, 0.0 }
 0x529   : > { %v5392_v61 = vpop.eup %4809  ;;  %4819 = vpow2.f32 %v1672_v38  ;;  %1678 = vadd.xlane.f32.xlu0 %v1677_v60  ;;  %4512 = vmatpush3.bf16.msra.mxu1 %v4668_v20  ;;  %v4672_v38 = vld [vmem:[%s6383_s13 + $0x38] sm:$0xff]  }
 0x52a   : > { %v1680_v52 = vsel %vm953_vm3, %v5392_v61, 0.0  ;;  %4513 = vmatprep.subr.bf16.mxu1 %v4669_v22 }
 0x52b   : > { %v4812_v62 = vpop.eup %4811  ;;  %1681 = vadd.xlane.f32.xlu1 %v1680_v52 }
 0x52c   : > { %v1683_v63 = vsel %vm953_vm3, %v4812_v62, 0.0 }
 0x52d   : > { %v5397_v0 = vpop.eup %4813  ;;  %1684 = vadd.xlane.f32.xlu0 %v1683_v63  ;;  %4514 = vmatpush3.bf16.msra.mxu1 %v4669_v22 }
 0x52e   : > { %v1686_v25 = vsel %vm953_vm3, %v5397_v0, 0.0  ;;  %4515 = vmatprep.subr.bf16.mxu1 %v4670_v33 }
 0x52f   : > { %v4816_v10 = vpop.eup %4815  ;;  %1687 = vadd.xlane.f32.xlu1 %v1686_v25 }
 0x530   : > { %v1689_v11 = vsel %vm953_vm3, %v4816_v10, 0.0 }
 0x531   : > { %v5402_v24 = vpop.eup %4817  ;;  %1690 = vadd.xlane.f32.xlu0 %v1689_v11  ;;  %4516 = vmatpush3.bf16.msra.mxu1 %v4670_v33 }
 0x532   : > { %v1692_v13 = vsel %vm953_vm3, %v5402_v24, 0.0  ;;  %4517 = vmatprep.subr.bf16.mxu1 %v4671_v23 }
 0x533   : > { %v4820_v15 = vpop.eup %4819  ;;  %1693 = vadd.xlane.f32.xlu1 %v1692_v13 }
 0x534   : > { %v1695_v16 = vsel %vm953_vm3, %v4820_v15, 0.0 }
 0x535   : > { %1696 = vadd.xlane.f32.xlu0 %v1695_v16  ;;  %4518 = vmatpush3.bf16.msra.mxu1 %v4671_v23 }
 0x536   : > { %4519 = vmatprep.subr.bf16.mxu1 %v4672_v38 }
 0x539   : > { %4520 = vmatpush3.bf16.msra.mxu1 %v4672_v38 }
 0x5b4   : > { %v1676_v26 = vpop.xlane.xlu1 %1675 }
 0x5b5   : > { %4821 = vrcp.f32 %v1676_v26 }
 0x5b6   : > { %v1679_v27 = vpop.xlane.xlu0 %1678 }
 0x5b7   : > { %4823 = vrcp.f32 %v1679_v27 }
 0x5b8   : > { %v1682_v29 = vpop.xlane.xlu1 %1681 }
 0x5b9   : > { %4825 = vrcp.f32 %v1682_v29 }
 0x5ba   : > { %v1685_v40 = vpop.xlane.xlu0 %1684 }
 0x5bb   : > { %4827 = vrcp.f32 %v1685_v40 }
 0x5bc   : > { %v1688_v30 = vpop.xlane.xlu1 %1687 }
 0x5bd   : > { %4829 = vrcp.f32 %v1688_v30 }
 0x5be   : > { %v1691_v35 = vpop.xlane.xlu0 %1690 }
 0x5bf   : > { %v4822_v31 = vpop.eup %4821  ;;  %4831 = vrcp.f32 %v1691_v35 }
 0x5c0   : > { %v1694_v32 = vpop.xlane.xlu1 %1693  ;;  %v1706_v36 = vmul.f32 %v4822_v31, %v5384_v56 }
 0x5c1   : > { %v4824_v34 = vpop.eup %4823  ;;  %4833 = vrcp.f32 %v1694_v32 }
 0x5c2   : > { %v1697_v42 = vpop.xlane.xlu0 %1696  ;;  %v1707_v37 = vmul.f32 %v4824_v34, %v5388_v59 }
 0x5c3   : > { %v4826_v47 = vpop.eup %4825  ;;  %4835 = vrcp.f32 %v1697_v42 }
 0x5c4   : > { %v1714_v39 = vpack.c.bf16 %v1707_v37, %v1706_v36  ;;  %v1708_v43 = vmul.f32 %v4826_v47, %v5392_v61  ;;  %v4678_v47 = vld [vmem:[%s6387_s17 + $0xc] ss:$16 sps:$4 sm:$0xff]  }
 0x5c5   : > { %v4828_v41 = vpop.eup %4827  ;;  %2364 = vmatprep.subr.bf16.mxu1 %v4678_v47  ;;  %v4705_v47 = vld [vmem:[%s6387_s17 + $0xa4] ss:$16 sps:$4 sm:$0xff]  }
 0x5c6   : > { %v1709_v44 = vmul.f32 %v4828_v41, %v4812_v62  ;;  %4497 = vmatprep.mubr.msk.bf16.mxu0 %vm953_vm3, %v1714_v39  ;;  %v4681_v39 = vld [vmem:[%s6387_s17 + $0x24] ss:$16 sps:$4 sm:$0xff]   ;;  %v4684_v41 = vld [vmem:[%s6387_s17 + $0x2c] ss:$16 sps:$4 sm:$0xff]  }
 0x5c7   : > { %v4830_v48 = vpop.eup %4829 }
 0x5c8   : > { %v1715_v49 = vpack.c.bf16 %v1709_v44, %v1708_v43  ;;  %v1710_v51 = vmul.f32 %v4830_v48, %v5397_v0  ;;  %v4679_v43 = vld [vmem:[%s6387_s17 + $0x20] ss:$16 sps:$4 sm:$0xff]   ;;  %v4682_v44 = vld [vmem:[%s6387_s17 + $0x28] ss:$16 sps:$4 sm:$0xff]  }
 0x5c9   : > { %v4832_v50 = vpop.eup %4831 }
 0x5ca   : > { %4498 = vmatmul.mubr.msk.bf16.vlgmr.msra.gmra.mrb[32].mxu0 %vm953_vm3, %v1715_v49  ;;  %v1711_v53 = vmul.f32 %v4832_v50, %v4816_v10 }
 0x5cb   : > { %v4834_v54 = vpop.eup %4833 }
 0x5cc   : > { %v1716_v56 = vpack.c.bf16 %v1711_v53, %v1710_v51  ;;  %v1712_v58 = vmul.f32 %v4834_v54, %v5402_v24 }
 0x5cd   : > { %v4836_v57 = vpop.eup %4835 }
 0x5ce   : > { %4501 = vmatprep.mubr.msk.bf16.mxu0 %vm953_vm3, %v1716_v56  ;;  %v1713_v55 = vmul.f32 %v4836_v57, %v4820_v15 }
 0x5d0   : > { %v1717_v59 = vpack.c.bf16 %v1713_v55, %v1712_v58 }
 0x5d2   : > { %4502 = vmatmul.mubr.msk.bf16.gmra.mrb[36].mxu0 %vm953_vm3, %v1717_v59 }
 0x5d3   : > { %2323 = vmatprep.mubr.bf16.mxu0 %v4957_v4 }
 0x69d   : > { %v4499_v60 = vpop.f32.mrb[32].mxu0 }
 0x69e   : > { %v1768_v61 = vpop.f32.mrb[33].mxu0 }
 0x69f   : > { %v4500_v52 = vpop.f32.mrb[34].mxu0 }
 0x6a0   : > { %v1800_v62 = vpack.c.bf16 %v4500_v52, %v4499_v60  ;;  %v1771_v63 = vpop.f32.mrb[35].mxu0 }
 0x6a1   : > { %v1799_v0 = vpack.c.bf16 %v1771_v63, %v1768_v61 }
 0x6a3   : > { %4521 = vmatprep.mubr.bf16.mxu1 %v1799_v0 }
 0x6a4   : > { %4522 = vmatmul.mubr.bf16.vlgmr.msra.gmra.mrb[12].mxu1 %v1800_v62 }
 0x6a5   : > { %v4503_v25 = vpop.f32.mrb[36].mxu0 }
 0x6a6   : > { %v1784_v10 = vpop.f32.mrb[37].mxu0 }
 0x6a7   : > { %v4504_v11 = vpop.f32.mrb[38].mxu0 }
 0x6a8   : > { %v1802_v24 = vpack.c.bf16 %v4504_v11, %v4503_v25  ;;  %v1787_v13 = vpop.f32.mrb[39].mxu0 }
 0x6a9   : > { %v1801_v15 = vpack.c.bf16 %v1787_v13, %v1784_v10 }
 0x6ab   : > { %4525 = vmatprep.mubr.bf16.mxu1 %v1801_v15 }
 0x6ac   : > { %4526 = vmatmul.mubr.bf16.gmra.mrb[16].mxu1 %v1802_v24 }
 0x6ad   : > { %2396 = vmatprep.mubr.bf16.mxu1 %v4957_v4 }
 0x777   : > { %v4523_v16 = vpop.f32.mrb[12].mxu1 }
 0x778   : > { %v1901_v18 = vpop.f32.mrb[13].mxu1  ;;  %v1934_v33 = vadd.f32 %v4523_v16, %v5201_v3 }
 0x779   : > { %v1932_v19 = vadd.f32 %v1901_v18, %v5195_v2  ;;  %v4524_v20 = vpop.f32.mrb[14].mxu1 }
 0x77a   : > { %v1904_v22 = vpop.f32.mrb[15].mxu1  ;;  %v1935_v27 = vadd.f32 %v4524_v20, %v5207_v6  ;;  %v5454_v40 = vadd.f32 %v4129_v17, %v1934_v33 }
 0x77b   : > { %v5447_v23 = vadd.f32 %v4129_v17, %v1932_v19  ;;  %v1933_v26 = vadd.f32 %v1904_v22, %v5193_v1 }
 0x77c   : > { %6439 = vst [vmem:[#allocation8_spill] sm:$0xff] %v5454_v40  ;;  %v5457_v35 = vadd.f32 %v4129_v17, %v1935_v27  ;;  %v4687_v27 = vld [vmem:[%s6387_s17 + $0x44] ss:$16 sps:$4 sm:$0xff]  }
 0x77d   : > { %6437 = vst [vmem:[#allocation6_spill] sm:$0xff] %v5447_v23  ;;  %v5451_v29 = vadd.f32 %v4129_v17, %v1933_v26  ;;  %1957 = vadd.xlane.f32.xlu1 %v5447_v23 }
 0x77e   : > { %6440 = vst [vmem:[#allocation9_spill] sm:$0xff] %v5457_v35 }
 0x77f   : > { %6438 = vst [vmem:[#allocation7_spill] sm:$0xff] %v5451_v29  ;;  %1959 = vadd.xlane.f32.xlu0 %v5451_v29  ;;  %v4527_v30 = vpop.f32.mrb[16].mxu1 }
 0x780   : > { %v1917_v2 = vpop.f32.mrb[17].mxu1  ;;  %v1938_v6 = vadd.f32 %v4527_v30, %v5210_v7  ;;  %v4673_v7 = vld [vmem:[%s6387_s17] ss:$16 sps:$4 sm:$0xff]   ;;  %v4690_v30 = vld [vmem:[%s6387_s17 + $0x4c] ss:$16 sps:$4 sm:$0xff]  }
 0x781   : > { %v1936_v3 = vadd.f32 %v1917_v2, %v5204_v5  ;;  %1961 = vadd.xlane.f32.xlu1 %v5454_v40  ;;  %v4528_v31 = vpop.f32.mrb[18].mxu1  ;;  %v4685_v2 = vld [vmem:[%s6387_s17 + $0x40] ss:$16 sps:$4 sm:$0xff]  }
 0x782   : > { %v1920_v1 = vpop.f32.mrb[19].mxu1  ;;  %v1939_v42 = vadd.f32 %v4528_v31, %v5216_v9  ;;  %v5470_v37 = vadd.f32 %v4129_v17, %v1938_v6  ;;  %v4676_v9 = vld [vmem:[%s6387_s17 + $0x8] ss:$16 sps:$4 sm:$0xff]   ;;  %v4693_v31 = vld [vmem:[%s6387_s17 + $0x64] ss:$16 sps:$4 sm:$0xff]  }
 0x783   : > { %v5462_v32 = vadd.f32 %v4129_v17, %v1936_v3  ;;  %v1937_v34 = vadd.f32 %v1920_v1, %v5213_v8  ;;  %1963 = vadd.xlane.f32.xlu0 %v5457_v35  ;;  %v4675_v8 = vld [vmem:[%s6387_s17 + $0x4] ss:$16 sps:$4 sm:$0xff]   ;;  %2365 = vmatpush1.bf16.msra.mxu1 %v4676_v9  ;;  %v4688_v3 = vld [vmem:[%s6387_s17 + $0x48] ss:$16 sps:$4 sm:$0xff]   ;;  %v4696_v1 = vld [vmem:[%s6387_s17 + $0x6c] ss:$16 sps:$4 sm:$0xff]  }
 0x784   : > { %6443 = vst [vmem:[#allocation12_spill] sm:$0xff] %v5470_v37  ;;  %v5473_v5 = vadd.f32 %v4129_v17, %v1939_v42  ;;  %2291 = vmatprep.subr.bf16.mxu0 %v4675_v8  ;;  %2366 = vmatprep.subr.bf16.mxu1 %v4684_v41  ;;  %v4691_v6 = vld [vmem:[%s6387_s17 + $0x60] ss:$16 sps:$4 sm:$0xff]   ;;  %v4699_v42 = vld [vmem:[%s6387_s17 + $0x84] ss:$16 sps:$4 sm:$0xff]  }
 0x785   : > { %6441 = vst [vmem:[#allocation10_spill] sm:$0xff] %v5462_v32  ;;  %v5467_v36 = vadd.f32 %v4129_v17, %v1937_v34  ;;  %1965 = vadd.xlane.f32.xlu1 %v5462_v32  ;;  %2292 = vmatpush1.bf16.msra.mxu0 %v4673_v7  ;;  %v4694_v34 = vld [vmem:[%s6387_s17 + $0x68] ss:$16 sps:$4 sm:$0xff]   ;;  %v4702_v7 = vld [vmem:[%s6387_s17 + $0x8c] ss:$16 sps:$4 sm:$0xff]  }
 0x786   : > { %6444 = vst [vmem:[#allocation13_spill] sm:$0xff] %v5473_v5  ;;  %2293 = vmatprep.subr.bf16.mxu0 %v4681_v39  ;;  %v4697_v8 = vld [vmem:[%s6387_s17 + $0x80] ss:$16 sps:$4 sm:$0xff]   ;;  %v4700_v9 = vld [vmem:[%s6387_s17 + $0x88] ss:$16 sps:$4 sm:$0xff]  }
 0x787   : > { %6442 = vst [vmem:[#allocation11_spill] sm:$0xff] %v5467_v36  ;;  %1967 = vadd.xlane.f32.xlu0 %v5467_v36  ;;  %2367 = vmatpush1.bf16.msra.mxu1 %v4682_v44  ;;  %v4708_v39 = vld [vmem:[%s6387_s17 + $0xac] ss:$16 sps:$4 sm:$0xff]   ;;  %v4703_v41 = vld [vmem:[%s6387_s17 + $0xa0] ss:$16 sps:$4 sm:$0xff]  }
 0x788   : > { %2368 = vmatprep.subr.bf16.mxu1 %v4690_v30  ;;  %v4711_v44 = vld [vmem:[%s6387_s17 + $0xc4] ss:$16 sps:$4 sm:$0xff]  }
 0x789   : > { %1969 = vadd.xlane.f32.xlu1 %v5470_v37  ;;  %2294 = vmatpush1.bf16.msra.mxu0 %v4679_v43  ;;  %v4706_v43 = vld [vmem:[%s6387_s17 + $0xa8] ss:$16 sps:$4 sm:$0xff]  }
 0x78a   : > { %2295 = vmatprep.subr.bf16.mxu0 %v4687_v27 }
 0x78b   : > { %1971 = vadd.xlane.f32.xlu0 %v5473_v5  ;;  %2369 = vmatpush1.bf16.msra.mxu1 %v4688_v3 }
 0x78c   : > { %2370 = vmatprep.subr.bf16.mxu1 %v4696_v1 }
 0x78d   : > { %2296 = vmatpush1.bf16.msra.mxu0 %v4685_v2 }
 0x78e   : > { %2297 = vmatprep.subr.bf16.mxu0 %v4693_v31  ;;  %v4130_v31 = vld [vmem:[%s6385_s15] ss:$0 sm:$0xff] }
 0x78f   : > { %2371 = vmatpush1.bf16.msra.mxu1 %v4694_v34 }
 0x790   : > { %2372 = vmatprep.subr.bf16.mxu1 %v4702_v7 }
 0x791   : > { %2298 = vmatpush1.bf16.msra.mxu0 %v4691_v6 }
 0x792   : > { %2299 = vmatprep.subr.bf16.mxu0 %v4699_v42 }
 0x793   : > { %2373 = vmatpush1.bf16.msra.mxu1 %v4700_v9 }
 0x794   : > { %2374 = vmatprep.subr.bf16.mxu1 %v4708_v39  ;;  %v4131_v39 = vld [vmem:[%s6386_s16] ss:$0 sm:$0xff] }
 0x795   : > { %2300 = vmatpush1.bf16.msra.mxu0 %v4697_v8 }
 0x796   : > { %2301 = vmatprep.subr.bf16.mxu0 %v4705_v47 }
 0x797   : > { %2375 = vmatpush1.bf16.msra.mxu1 %v4706_v43 }
 0x799   : > { %2302 = vmatpush1.bf16.msra.mxu0 %v4703_v41 }
 0x79a   : > { %2303 = vmatprep.subr.bf16.mxu0 %v4711_v44 }
 0x80a   : > { %v1958_v48 = vpop.xlane.xlu1 %1957 }
 0x80b   : > { %v1973_v49 = vmul.f32 0.0078125, %v1958_v48  ;;  %v4714_v48 = vld [vmem:[%s6387_s17 + $0xcc] ss:$16 sps:$4 sm:$0xff]  }
 0x80c   : > { %v1960_v50 = vpop.xlane.xlu0 %1959  ;;  %2376 = vmatprep.subr.bf16.mxu1 %v4714_v48 }
 0x80d   : > { %v5502_v51 = vsub.f32 %v5447_v23, %v1973_v49  ;;  %v1974_v53 = vmul.f32 0.0078125, %v1960_v50  ;;  %v4709_v49 = vld [vmem:[%s6387_s17 + $0xc0] ss:$16 sps:$4 sm:$0xff]   ;;  %v4712_v50 = vld [vmem:[%s6387_s17 + $0xc8] ss:$16 sps:$4 sm:$0xff]  }
 0x80e   : > { %v1962_v54 = vpop.xlane.xlu1 %1961  ;;  %2304 = vmatpush1.bf16.msra.mxu0 %v4709_v49  ;;  %2377 = vmatpush1.bf16.msra.mxu1 %v4712_v50 }
 0x80f   : > { %v5505_v56 = vsub.f32 %v5451_v29, %v1974_v53  ;;  %v1975_v57 = vmul.f32 0.0078125, %v1962_v54  ;;  %v1989_v58 = vmul.f32 %v5502_v51, %v5502_v51  ;;  %v4715_v53 = vld [vmem:[%s6387_s17 + $0xe0] ss:$16 sps:$4 sm:$0xff]   ;;  %v4717_v54 = vld [vmem:[%s6387_s17 + $0xe4] ss:$16 sps:$4 sm:$0xff]  }
 0x810   : > { %v1964_v55 = vpop.xlane.xlu0 %1963  ;;  %2305 = vmatprep.subr.bf16.mxu0 %v4717_v54 }
 0x811   : > { %v5510_v59 = vsub.f32 %v5454_v40, %v1975_v57  ;;  %v1976_v38 = vmul.f32 0.0078125, %v1964_v55  ;;  %1997 = vadd.xlane.f32.xlu1 %v1989_v58  ;;  %v1990_v60 = vmul.f32 %v5505_v56, %v5505_v56  ;;  %v4718_v57 = vld [vmem:[%s6387_s17 + $0xe8] ss:$16 sps:$4 sm:$0xff]   ;;  %v4720_v58 = vld [vmem:[%s6387_s17 + $0xec] ss:$16 sps:$4 sm:$0xff]  }
 0x812   : > { %v1966_v61 = vpop.xlane.xlu1 %1965  ;;  %2378 = vmatprep.subr.bf16.mxu1 %v4720_v58  ;;  %2306 = vmatpush1.bf16.msra.mxu0 %v4715_v53 }
 0x813   : > { %v5515_v52 = vsub.f32 %v5457_v35, %v1976_v38  ;;  %v1977_v62 = vmul.f32 0.0078125, %v1966_v61  ;;  %1999 = vadd.xlane.f32.xlu0 %v1990_v60  ;;  %v1991_v63 = vmul.f32 %v5510_v59, %v5510_v59  ;;  %2379 = vmatpush1.bf16.msra.mxu1 %v4718_v57 }
 0x814   : > { %v1968_v0 = vpop.xlane.xlu0 %1967 }
 0x815   : > { %v5520_v25 = vsub.f32 %v5462_v32, %v1977_v62  ;;  %v1978_v10 = vmul.f32 0.0078125, %v1968_v0  ;;  %2001 = vadd.xlane.f32.xlu1 %v1991_v63  ;;  %v1992_v11 = vmul.f32 %v5515_v52, %v5515_v52 }
 0x816   : > { %v1970_v24 = vpop.xlane.xlu1 %1969 }
 0x817   : > { %v5525_v13 = vsub.f32 %v5467_v36, %v1978_v10  ;;  %v1979_v15 = vmul.f32 0.0078125, %v1970_v24  ;;  %2003 = vadd.xlane.f32.xlu0 %v1992_v11  ;;  %v1993_v16 = vmul.f32 %v5520_v25, %v5520_v25 }
 0x818   : > { %v1972_v17 = vpop.xlane.xlu0 %1971 }
 0x819   : > { %v5530_v18 = vsub.f32 %v5470_v37, %v1979_v15  ;;  %v1980_v19 = vmul.f32 0.0078125, %v1972_v17  ;;  %2005 = vadd.xlane.f32.xlu1 %v1993_v16  ;;  %v1994_v20 = vmul.f32 %v5525_v13, %v5525_v13 }
 0x81b   : > { %v5535_v22 = vsub.f32 %v5473_v5, %v1980_v19  ;;  %2007 = vadd.xlane.f32.xlu0 %v1994_v20  ;;  %v1995_v33 = vmul.f32 %v5530_v18, %v5530_v18 }
 0x81d   : > { %2009 = vadd.xlane.f32.xlu1 %v1995_v33  ;;  %v1996_v26 = vmul.f32 %v5535_v22, %v5535_v22 }
 0x81f   : > { %2011 = vadd.xlane.f32.xlu0 %v1996_v26 }
 0x89e   : > { %v1998_v55 = vpop.xlane.xlu1 %1997 }
 0x89f   : > { %v2013_v38 = vmul.f32 0.0078125, %v1998_v55 }
 0x8a0   : > { %v2000_v60 = vpop.xlane.xlu0 %1999 }
 0x8a1   : > { %v2021_v61 = vadd.f32 1e-05, %v2013_v38  ;;  %v2014_v62 = vmul.f32 0.0078125, %v2000_v60 }
 0x8a2   : > { %v2002_v63 = vpop.xlane.xlu1 %2001 }
 0x8a3   : > { %4837 = vrsqrt.f32 %v2021_v61  ;;  %v2022_v0 = vadd.f32 1e-05, %v2014_v62  ;;  %v2015_v10 = vmul.f32 0.0078125, %v2002_v63 }
 0x8a4   : > { %v2004_v11 = vpop.xlane.xlu0 %2003 }
 0x8a5   : > { %4839 = vrsqrt.f32 %v2022_v0  ;;  %v2023_v24 = vadd.f32 1e-05, %v2015_v10  ;;  %v2016_v15 = vmul.f32 0.0078125, %v2004_v11 }
 0x8a6   : > { %v2006_v16 = vpop.xlane.xlu1 %2005 }
 0x8a7   : > { %4841 = vrsqrt.f32 %v2023_v24  ;;  %v2024_v17 = vadd.f32 1e-05, %v2016_v15  ;;  %v2017_v19 = vmul.f32 0.0078125, %v2006_v16 }
 0x8a8   : > { %v2008_v20 = vpop.xlane.xlu0 %2007 }
 0x8a9   : > { %4843 = vrsqrt.f32 %v2024_v17  ;;  %v2018_v33 = vmul.f32 0.0078125, %v2008_v20  ;;  %v2025_v26 = vadd.f32 1e-05, %v2017_v19 }
 0x8aa   : > { %v2010_v30 = vpop.xlane.xlu1 %2009 }
 0x8ab   : > { %v2026_v27 = vadd.f32 1e-05, %v2018_v33  ;;  %v2019_v42 = vmul.f32 0.0078125, %v2010_v30  ;;  %v4723_v33 = vld [vmem:[%s6389_s19] sm:$0xff]   ;;  %v4727_v30 = vld [vmem:[%s6389_s19 + $0x8] sm:$0xff]  }
 0x8ac   : > { %v2012_v2 = vpop.xlane.xlu0 %2011 }
 0x8ad   : > { %v4838_v3 = vpop.eup %4837  ;;  %4845 = vrsqrt.f32 %v2026_v27  ;;  %v2020_v1 = vmul.f32 0.0078125, %v2012_v2  ;;  %v2027_v44 = vadd.f32 1e-05, %v2019_v42  ;;  %v4726_v27 = vld [vmem:[%s6389_s19 + $0xc8] sm:$0xff]   ;;  %v4734_v42 = vld [vmem:[%s6389_s19 + $0xd8] sm:$0xff]  }
 0x8ae   : > { %v2037_v6 = vmul.f32 %v4838_v3, %v5502_v51  ;;  %4847 = vrsqrt.f32 %v2025_v26  ;;  %v4725_v26 = vld [vmem:[%s6389_s19 + $0x48] sm:$0xff]   ;;  %v4729_v3 = vld [vmem:[%s6389_s19 + $0x50] sm:$0xff]  }
 0x8af   : > { %v4840_v34 = vpop.eup %4839  ;;  %v2028_v47 = vadd.f32 1e-05, %v2020_v1  ;;  %v4728_v2 = vld [vmem:[%s6389_s19 + $0x88] sm:$0xff]   ;;  %v4731_v1 = vld [vmem:[%s6389_s19 + $0x10] sm:$0xff]  }
 0x8b0   : > { %v2051_v7 = vmul.f32 %v4130_v31, %v2037_v6  ;;  %v2038_v8 = vmul.f32 %v4840_v34, %v5505_v56  ;;  %v4732_v6 = vld [vmem:[%s6389_s19 + $0x90] sm:$0xff]   ;;  %v4733_v34 = vld [vmem:[%s6389_s19 + $0x58] sm:$0xff]  }
 0x8b1   : > { %v4842_v9 = vpop.eup %4841  ;;  %4849 = vrsqrt.f32 %v2028_v47  ;;  %v4738_v47 = vld [vmem:[%s6389_s19 + $0xe0] sm:$0xff]  }
 0x8b2   : > { %v2052_v41 = vmul.f32 %v4130_v31, %v2038_v8  ;;  %v2065_v48 = vadd.f32 %v4131_v39, %v2051_v7  ;;  %v2039_v50 = vmul.f32 %v4842_v9, %v5510_v59  ;;  %4851 = vrsqrt.f32 %v2027_v44  ;;  %v4735_v7 = vld [vmem:[%s6389_s19 + $0x18] sm:$0xff]   ;;  %v4737_v9 = vld [vmem:[%s6389_s19 + $0x60] sm:$0xff]   ;;  %v4742_v44 = vld [vmem:[%s6389_s19 + $0xe8] sm:$0xff]  }
 0x8b3   : > { %v4844_v43 = vpop.eup %4843  ;;  %v4736_v8 = vld [vmem:[%s6389_s19 + $0x98] sm:$0xff]  }
 0x8b4   : > { %v2066_v49 = vadd.f32 %v4131_v39, %v2052_v41  ;;  %v2040_v51 = vmul.f32 %v4844_v43, %v5515_v52  ;;  %v2053_v56 = vmul.f32 %v4130_v31, %v2039_v50  ;;  %v4740_v41 = vld [vmem:[%s6389_s19 + $0xa0] sm:$0xff]   ;;  %v4741_v43 = vld [vmem:[%s6389_s19 + $0x68] sm:$0xff]   ;;  %v4745_v50 = vld [vmem:[%s6389_s19 + $0x70] sm:$0xff]  }
 0x8b6   : > { %v2073_v53 = vpack.c.bf16 %v2066_v49, %v2065_v48  ;;  %v2054_v54 = vmul.f32 %v4130_v31, %v2040_v51  ;;  %v2067_v60 = vadd.f32 %v4131_v39, %v2053_v56  ;;  %v4743_v48 = vld [vmem:[%s6389_s19 + $0x28] sm:$0xff]   ;;  %v4746_v51 = vld [vmem:[%s6389_s19 + $0xf0] sm:$0xff]   ;;  %v4750_v56 = vld [vmem:[%s6389_s19 + $0xf8] sm:$0xff]  }
 0x8b7   : > { %v4846_v57 = vpop.eup %4845  ;;  %v4744_v49 = vld [vmem:[%s6389_s19 + $0xa8] sm:$0xff]  }
 0x8b8   : > { %2324 = vmatmul.mubr.bf16.vlgmr.msra.gmra.mrb[40].mxu0 %v2073_v53  ;;  %2397 = vmatmul.mubr.bf16.vlgmr.msra.gmra.mrb[20].mxu1 %v2073_v53  ;;  %v4848_v58 = vpop.eup %4847  ;;  %v2068_v55 = vadd.f32 %v4131_v39, %v2054_v54  ;;  %v2042_v38 = vmul.f32 %v4846_v57, %v5525_v13  ;;  %v4747_v53 = vld [vmem:[%s6389_s19 + $0x30] sm:$0xff]   ;;  %v4749_v57 = vld [vmem:[%s6389_s19 + $0x78] sm:$0xff]  }
 0x8b9   : > { %2333 = vmatprep.mubr.bf16.mxu0 %v4957_v4  ;;  %2406 = vmatprep.mubr.bf16.mxu1 %v4957_v4  ;;  %v2041_v59 = vmul.f32 %v4848_v58, %v5520_v25  ;;  %v4748_v54 = vld [vmem:[%s6389_s19 + $0xb0] sm:$0xff]   ;;  %v4751_v58 = vld [vmem:[%s6389_s19 + $0x38] sm:$0xff]  }
 0x8ba   : > { %v2074_v52 = vpack.c.bf16 %v2068_v55, %v2067_v60  ;;  %v2056_v61 = vmul.f32 %v4130_v31, %v2042_v38  ;;  %v4752_v55 = vld [vmem:[%s6389_s19 + $0xb8] sm:$0xff]   ;;  %v4753_v38 = vld [vmem:[%s6392_s22 + $0x40] sm:$0xff]  }
 0x8bb   : > { %v4850_v62 = vpop.eup %4849  ;;  %v2055_v63 = vmul.f32 %v4130_v31, %v2041_v59  ;;  %v5735_v60 = vld [vmem:[%s6391_s21] sm:$0xff]  }
 0x8bc   : > { %v4852_v0 = vpop.eup %4851  ;;  %v2070_v10 = vadd.f32 %v4131_v39, %v2056_v61  ;;  %v2044_v11 = vmul.f32 %v4850_v62, %v5535_v22  ;;  %v4721_v22 = vld [vmem:[%s6389_s19 + $0x40] sm:$0xff]  }
 0x8bd   : > { %v2069_v24 = vadd.f32 %v4131_v39, %v2055_v63  ;;  %v2043_v13 = vmul.f32 %v4852_v0, %v5530_v18  ;;  %v4722_v18 = vld [vmem:[%s6389_s19 + $0xc0] sm:$0xff]   ;;  %4295 = vmatprep.subr.bf16.mxu0 %v4721_v22 }
 0x8be   : > { %v2058_v16 = vmul.f32 %v4130_v31, %v2044_v11  ;;  %4335 = vmatprep.subr.bf16.mxu1 %v4722_v18  ;;  %4296 = vmatpush3.bf16.msra.mxu0 %v4723_v33  ;;  %v2109_v59 = vld [vmem:[%s6388_s18] sm:$0xf] }
 0x8bf   : > { %v2075_v15 = vpack.c.bf16 %v2070_v10, %v2069_v24  ;;  %v2057_v25 = vmul.f32 %v4130_v31, %v2043_v13  ;;  %4297 = vmatprep.subr.bf16.mxu0 %v4725_v26  ;;  %v4730_v31 = vld [vmem:[%s6389_s19 + $0xd0] sm:$0xff]   ;;  %v5743_v61 = vrot.slane %v2109_v59, %v5134_v14  ;;  %v5747_v62 = vrot.slane %v2109_v59, %v1274_v46 }
 0x8c0   : > { %2334 = vmatmul.mubr.bf16.gmra.mrb[44].mxu0 %v2074_v52  ;;  %2407 = vmatmul.mubr.bf16.gmra.mrb[24].mxu1 %v2074_v52  ;;  %v2072_v17 = vadd.f32 %v4131_v39, %v2058_v16  ;;  %v2125_v52 = vsub.s32 3, %v5131_v12  ;;  %v5752_v0 = vrot.slane %v2109_v59, %v5148_v21 }
 0x8c1   : > { %2343 = vmatprep.mubr.bf16.mxu0 %v4957_v4  ;;  %2416 = vmatprep.mubr.bf16.mxu1 %v4957_v4  ;;  %v2071_v19 = vadd.f32 %v4131_v39, %v2057_v25  ;;  %v4739_v39 = vld [vmem:[%s6389_s19 + $0x20] sm:$0xff]  }
 0x8c2   : > { %4298 = vmatpush3.bf16.msra.mxu0 %v4727_v30  ;;  %v5749_v63 = vrot.slane %v2109_v59, %v2125_v52 }
 0x8c3   : > { %v2076_v20 = vpack.c.bf16 %v2072_v17, %v2071_v19  ;;  %4299 = vmatprep.subr.bf16.mxu0 %v4729_v3 }
 0x8c6   : > { %4300 = vmatpush3.bf16.msra.mxu0 %v4731_v1 }
 0x8c7   : > { %4301 = vmatprep.subr.bf16.mxu0 %v4733_v34 }
 0x8c8   : > { %2344 = vmatmul.mubr.bf16.gmra.mrb[48].mxu0 %v2075_v15  ;;  %2417 = vmatmul.mubr.bf16.gmra.mrb[28].mxu1 %v2075_v15 }
 0x8c9   : > { %2353 = vmatprep.mubr.bf16.mxu0 %v4957_v4  ;;  %2426 = vmatprep.mubr.bf16.mxu1 %v4957_v4  ;;  %v4724_v4 = vld [vmem:[%s6389_s19 + $0x80] sm:$0xff]  }
 0x8ca   : > { %4336 = vmatpush3.bf16.msra.mxu1 %v4724_v4  ;;  %4302 = vmatpush3.bf16.msra.mxu0 %v4735_v7 }
 0x8cb   : > { %4337 = vmatprep.subr.bf16.mxu1 %v4726_v27  ;;  %4303 = vmatprep.subr.bf16.mxu0 %v4737_v9 }
 0x8ce   : > { %4338 = vmatpush3.bf16.msra.mxu1 %v4728_v2  ;;  %4304 = vmatpush3.bf16.msra.mxu0 %v4739_v39 }
 0x8cf   : > { %4339 = vmatprep.subr.bf16.mxu1 %v4730_v31  ;;  %4305 = vmatprep.subr.bf16.mxu0 %v4741_v43 }
 0x8d0   : > { %2354 = vmatmul.mubr.bf16.gmra.mrb[52].mxu0 %v2076_v20  ;;  %2427 = vmatmul.mubr.bf16.gmra.mrb[32].mxu1 %v2076_v20 }
 0x8d2   : > { %4340 = vmatpush3.bf16.msra.mxu1 %v4732_v6  ;;  %4306 = vmatpush3.bf16.msra.mxu0 %v4743_v48 }
 0x8d3   : > { %4341 = vmatprep.subr.bf16.mxu1 %v4734_v42  ;;  %4307 = vmatprep.subr.bf16.mxu0 %v4745_v50 }
 0x8d6   : > { %4342 = vmatpush3.bf16.msra.mxu1 %v4736_v8  ;;  %4308 = vmatpush3.bf16.msra.mxu0 %v4747_v53 }
 0x8d7   : > { %4343 = vmatprep.subr.bf16.mxu1 %v4738_v47  ;;  %4309 = vmatprep.subr.bf16.mxu0 %v4749_v57 }
 0x8da   : > { %4344 = vmatpush3.bf16.msra.mxu1 %v4740_v41  ;;  %4310 = vmatpush3.bf16.msra.mxu0 %v4751_v58 }
 0x8db   : > { %4345 = vmatprep.subr.bf16.mxu1 %v4742_v44  ;;  %4529 = vmatprep.subr.bf16.mxu0 %v5735_v60 }
 0x8de   : > { %4346 = vmatpush3.bf16.msra.mxu1 %v4744_v49 }
 0x8df   : > { %4347 = vmatprep.subr.bf16.mxu1 %v4746_v51 }
 0x8e2   : > { %4348 = vmatpush3.bf16.msra.mxu1 %v4748_v54 }
 0x8e3   : > { %4349 = vmatprep.subr.bf16.mxu1 %v4750_v56 }
 0x8e6   : > { %4350 = vmatpush3.bf16.msra.mxu1 %v4752_v55 }
 0x8e7   : > { %4387 = vmatprep.subr.bf16.mxu1 %v4753_v38 }
 0x98b   : > { %v2325_v10 = vpop.f32.mrb[40].mxu0  ;;  %v2398_v11 = vpop.f32.mrb[20].mxu1 }
 0x98c   : > { %v5755_v24 = vadd.f32 %v2325_v10, %v5743_v61  ;;  %v5758_v13 = vadd.f32 %v2398_v11, %v5747_v62  ;;  %v2327_v15 = vpop.f32.mrb[41].mxu0  ;;  %v2400_v14 = vpop.f32.mrb[21].mxu1 }
 0x98d   : > { %v5761_v16 = vadd.f32 %v2327_v15, %v5752_v0  ;;  %v5764_v12 = vadd.f32 %v2400_v14, %v5749_v63  ;;  %v2329_v46 = vpop.f32.mrb[42].mxu0  ;;  %v2402_v25 = vpop.f32.mrb[22].mxu1 }
 0x98e   : > { %v2437_v21 = vmul.f32 %v5755_v24, %v5755_v24  ;;  %v2439_v17 = vmul.f32 %v5758_v13, %v5758_v13  ;;  %v5771_v19 = vadd.f32 %v2329_v46, %v5743_v61  ;;  %v5774_v20 = vadd.f32 %v2402_v25, %v5747_v62  ;;  %v2331_v22 = vpop.f32.mrb[43].mxu0  ;;  %v2404_v18 = vpop.f32.mrb[23].mxu1 }
 0x98f   : > { %v2438_v33 = vmul.f32 %v5761_v16, %v5761_v16  ;;  %v2440_v4 = vmul.f32 %v5764_v12, %v5764_v12  ;;  %v5781_v26 = vadd.f32 %v2331_v22, %v5752_v0  ;;  %v5784_v27 = vadd.f32 %v2404_v18, %v5749_v63 }
 0x990   : > { %v2469_v30 = vmul.f32 %v2437_v21, %v5755_v24  ;;  %v2471_v2 = vmul.f32 %v2439_v17, %v5758_v13  ;;  %v2441_v3 = vmul.f32 %v5771_v19, %v5771_v19  ;;  %v2443_v31 = vmul.f32 %v5774_v20, %v5774_v20 }
 0x991   : > { %v2470_v1 = vmul.f32 %v2438_v33, %v5761_v16  ;;  %v2472_v6 = vmul.f32 %v2440_v4, %v5764_v12  ;;  %v2442_v34 = vmul.f32 %v5781_v26, %v5781_v26  ;;  %v2444_v42 = vmul.f32 %v5784_v27, %v5784_v27 }
 0x992   : > { %v2501_v7 = vmul.f32 0.044715, %v2469_v30  ;;  %v2503_v8 = vmul.f32 0.044715, %v2471_v2  ;;  %v2473_v9 = vmul.f32 %v2441_v3, %v5771_v19  ;;  %v2475_v47 = vmul.f32 %v2443_v31, %v5774_v20 }
 0x993   : > { %v2502_v39 = vmul.f32 0.044715, %v2470_v1  ;;  %v2504_v41 = vmul.f32 0.044715, %v2472_v6  ;;  %v2474_v43 = vmul.f32 %v2442_v34, %v5781_v26  ;;  %v2476_v44 = vmul.f32 %v2444_v42, %v5784_v27  ;;  %v2335_v48 = vpop.f32.mrb[44].mxu0  ;;  %v2408_v49 = vpop.f32.mrb[24].mxu1 }
 0x994   : > { %v2533_v50 = vadd.f32 %v2501_v7, %v5755_v24  ;;  %v2535_v51 = vadd.f32 %v2503_v8, %v5758_v13  ;;  %v2505_v53 = vmul.f32 0.044715, %v2473_v9  ;;  %v2507_v54 = vmul.f32 0.044715, %v2475_v47  ;;  %v2337_v57 = vpop.f32.mrb[45].mxu0  ;;  %v2410_v56 = vpop.f32.mrb[25].mxu1 }
 0x995   : > { %v2534_v58 = vadd.f32 %v2502_v39, %v5761_v16  ;;  %v2536_v55 = vadd.f32 %v2504_v41, %v5764_v12  ;;  %v2506_v38 = vmul.f32 0.044715, %v2474_v43  ;;  %v2508_v59 = vmul.f32 0.044715, %v2476_v44  ;;  %v2339_v52 = vpop.f32.mrb[46].mxu0  ;;  %v2412_v10 = vpop.f32.mrb[26].mxu1 }
 0x996   : > { %v2565_v11 = vmul.f32 0.7978846, %v2533_v50  ;;  %v2567_v15 = vmul.f32 0.7978846, %v2535_v51  ;;  %v2537_v14 = vadd.f32 %v2505_v53, %v5771_v19  ;;  %v2539_v46 = vadd.f32 %v2507_v54, %v5774_v20  ;;  %v2341_v25 = vpop.f32.mrb[47].mxu0  ;;  %v2414_v21 = vpop.f32.mrb[27].mxu1 }
 0x997   : > { %v2566_v17 = vmul.f32 0.7978846, %v2534_v58  ;;  %v2568_v22 = vmul.f32 0.7978846, %v2536_v55  ;;  %v2538_v18 = vadd.f32 %v2506_v38, %v5781_v26  ;;  %v2540_v33 = vadd.f32 %v2508_v59, %v5784_v27 }
 0x998   : > { %4853 = vtanh.f32 %v2565_v11  ;;  %v2569_v4 = vmul.f32 0.7978846, %v2537_v14  ;;  %v2571_v30 = vmul.f32 0.7978846, %v2539_v46  ;;  %v5811_v2 = vadd.f32 %v2335_v48, %v5743_v61 }
 0x999   : > { %4855 = vtanh.f32 %v2567_v15  ;;  %v2570_v3 = vmul.f32 0.7978846, %v2538_v18  ;;  %v2572_v31 = vmul.f32 0.7978846, %v2540_v33  ;;  %v5814_v1 = vadd.f32 %v2408_v49, %v5747_v62 }
 0x99a   : > { %4857 = vtanh.f32 %v2566_v17  ;;  %v2445_v6 = vmul.f32 %v5811_v2, %v5811_v2  ;;  %v5819_v34 = vadd.f32 %v2337_v57, %v5752_v0  ;;  %v5822_v42 = vadd.f32 %v2410_v56, %v5749_v63 }
 0x99b   : > { %4859 = vtanh.f32 %v2568_v22  ;;  %v2447_v7 = vmul.f32 %v5814_v1, %v5814_v1  ;;  %v5827_v8 = vadd.f32 %v2339_v52, %v5743_v61  ;;  %v5830_v9 = vadd.f32 %v2412_v10, %v5747_v62  ;;  %v5832_v47 = vpop.f32.mrb[48].mxu0  ;;  %v5834_v39 = vpop.f32.mrb[28].mxu1 }
 0x99c   : > { %4861 = vtanh.f32 %v2569_v4  ;;  %v2477_v41 = vmul.f32 %v2445_v6, %v5811_v2  ;;  %v2446_v43 = vmul.f32 %v5819_v34, %v5819_v34  ;;  %v2448_v44 = vmul.f32 %v5822_v42, %v5822_v42  ;;  %v5841_v48 = vpop.f32.mrb[49].mxu0  ;;  %v5843_v49 = vpop.f32.mrb[29].mxu1 }
 0x99d   : > { %4863 = vtanh.f32 %v2571_v30  ;;  %v2479_v50 = vmul.f32 %v2447_v7, %v5814_v1  ;;  %v2449_v51 = vmul.f32 %v5827_v8, %v5827_v8  ;;  %v2451_v53 = vmul.f32 %v5830_v9, %v5830_v9  ;;  %v5850_v54 = vpop.f32.mrb[50].mxu0  ;;  %v5852_v57 = vpop.f32.mrb[30].mxu1 }
 0x99e   : > { %4865 = vtanh.f32 %v2570_v3  ;;  %v2509_v56 = vmul.f32 0.044715, %v2477_v41  ;;  %v2478_v58 = vmul.f32 %v2446_v43, %v5819_v34  ;;  %v2480_v55 = vmul.f32 %v2448_v44, %v5822_v42  ;;  %v5856_v38 = vpop.f32.mrb[51].mxu0  ;;  %v5858_v59 = vpop.f32.mrb[31].mxu1 }
 0x99f   : > { %4867 = vtanh.f32 %v2572_v31  ;;  %v2511_v52 = vmul.f32 0.044715, %v2479_v50  ;;  %v2481_v10 = vmul.f32 %v2449_v51, %v5827_v8  ;;  %v2483_v11 = vmul.f32 %v2451_v53, %v5830_v9 }
 0x9a0   : > { %v2541_v15 = vadd.f32 %v2509_v56, %v5811_v2  ;;  %v2510_v14 = vmul.f32 0.044715, %v2478_v58  ;;  %v2512_v46 = vmul.f32 0.044715, %v2480_v55  ;;  %v5864_v17 = vadd.f32 %v2341_v25, %v5752_v0 }
 0x9a1   : > { %v2543_v22 = vadd.f32 %v2511_v52, %v5814_v1  ;;  %v2513_v18 = vmul.f32 0.044715, %v2481_v10  ;;  %v2515_v33 = vmul.f32 0.044715, %v2483_v11  ;;  %v5868_v4 = vadd.f32 %v2414_v21, %v5749_v63 }
 0x9a2   : > { %v4854_v30 = vpop.eup %4853  ;;  %v2573_v3 = vmul.f32 0.7978846, %v2541_v15  ;;  %v2542_v31 = vadd.f32 %v2510_v14, %v5819_v34  ;;  %v2544_v6 = vadd.f32 %v2512_v46, %v5822_v42  ;;  %v2450_v7 = vmul.f32 %v5864_v17, %v5864_v17 }
 0x9a3   : > { %v4856_v41 = vpop.eup %4855  ;;  %v2629_v43 = vadd.f32 1.0, %v4854_v30  ;;  %v2575_v25 = vmul.f32 0.7978846, %v2543_v22  ;;  %v2545_v44 = vadd.f32 %v2513_v18, %v5827_v8  ;;  %v2547_v50 = vadd.f32 %v2515_v33, %v5830_v9  ;;  %v5876_v51 = vpop.f32.mrb[52].mxu0 }
 0x9a4   : > { %v5878_v21 = vpop.f32.mrb[32].mxu1  ;;  %v5880_v53 = vpop.eup %4857  ;;  %v2631_v56 = vadd.f32 1.0, %v4856_v41  ;;  %4869 = vtanh.f32 %v2573_v3  ;;  %v2574_v58 = vmul.f32 0.7978846, %v2542_v31  ;;  %v2576_v55 = vmul.f32 0.7978846, %v2544_v6 }
 0x9a5   : > { %v5882_v52 = vpop.f32.mrb[53].mxu0  ;;  %v5884_v10 = vpop.eup %4859  ;;  %v2661_v11 = vmul.f32 0.5, %v2629_v43  ;;  %4871 = vtanh.f32 %v2575_v25  ;;  %v2577_v15 = vmul.f32 0.7978846, %v2545_v44  ;;  %v2579_v14 = vmul.f32 0.7978846, %v2547_v50 }
 0x9a6   : > { %v5886_v46 = vpop.f32.mrb[33].mxu1  ;;  %v4862_v22 = vpop.eup %4861  ;;  %v2663_v18 = vmul.f32 0.5, %v2631_v56  ;;  %4873 = vtanh.f32 %v2574_v58  ;;  %v2482_v33 = vmul.f32 %v2450_v7, %v5864_v17  ;;  %v2452_v30 = vmul.f32 %v5868_v4, %v5868_v4 }
 0x9a7   : > { %v5891_v3 = vpop.f32.mrb[54].mxu0  ;;  %v5893_v31 = vpop.f32.mrb[34].mxu1  ;;  %v5896_v41 = vmul.f32 %v2661_v11, %v5755_v24  ;;  %v2633_v43 = vadd.f32 1.0, %v4862_v22  ;;  %4875 = vtanh.f32 %v2576_v55  ;;  %v5900_v25 = vadd.f32 %v5832_v47, %v5743_v61 }
 0x9a8   : > { %v4864_v6 = vpop.eup %4863  ;;  %v5902_v44 = vpop.f32.mrb[55].mxu0  ;;  %v5909_v56 = vmul.f32 %v2663_v18, %v5758_v13  ;;  %4877 = vtanh.f32 %v2577_v15  ;;  %v2514_v5 = vmul.f32 0.044715, %v2482_v33  ;;  %v2484_v55 = vmul.f32 %v2452_v30, %v5868_v4 }
 0x9a9   : > { %v5904_v7 = vpop.f32.mrb[35].mxu1  ;;  %v5906_v50 = vpop.eup %4865  ;;  %v2635_v58 = vadd.f32 1.0, %v4864_v6  ;;  %v2665_v11 = vmul.f32 0.5, %v2633_v43  ;;  %4879 = vtanh.f32 %v2579_v14  ;;  %v2453_v47 = vmul.f32 %v5900_v25, %v5900_v25 }
 0x9aa   : > { %v5911_v24 = vpop.eup %4867  ;;  %v2546_v37 = vadd.f32 %v2514_v5, %v5864_v17  ;;  %v5919_v36 = vadd.f32 %v5834_v39, %v5747_v62  ;;  %v5923_v13 = vadd.f32 %v5841_v48, %v5752_v0  ;;  %v2516_v14 = vmul.f32 0.044715, %v2484_v55 }
 0x9ab   : > { %v2667_v22 = vmul.f32 0.5, %v2635_v58  ;;  %v5926_v15 = vmul.f32 %v2665_v11, %v5771_v19  ;;  %v2485_v18 = vmul.f32 %v2453_v47, %v5900_v25  ;;  %v5931_v33 = vadd.f32 %v5843_v49, %v5749_v63 }
 0x9ac   : > { %v2578_v30 = vmul.f32 0.7978846, %v2546_v37  ;;  %v2455_v39 = vmul.f32 %v5919_v36, %v5919_v36  ;;  %v2454_v48 = vmul.f32 %v5923_v13, %v5923_v13  ;;  %v2548_v6 = vadd.f32 %v2516_v14, %v5868_v4 }
 0x9ad   : > { %v5934_v5 = vmul.f32 %v2667_v22, %v5774_v20  ;;  %v2517_v43 = vmul.f32 0.044715, %v2485_v18  ;;  %v2456_v49 = vmul.f32 %v5931_v33, %v5931_v33  ;;  %v5957_v18 = vadd.f32 %v5850_v54, %v5743_v61 }
 0x9ae   : > { %v5945_v58 = vpop.eup %4869  ;;  %4881 = vtanh.f32 %v2578_v30  ;;  %v2487_v20 = vmul.f32 %v2455_v39, %v5919_v36  ;;  %v2486_v11 = vmul.f32 %v2454_v48, %v5923_v13  ;;  %v2580_v47 = vmul.f32 0.7978846, %v2548_v6 }
 0x9af   : > { %v5951_v55 = vpop.eup %4871  ;;  %v2549_v22 = vadd.f32 %v2517_v43, %v5900_v25  ;;  %v2488_v14 = vmul.f32 %v2456_v49, %v5931_v33  ;;  %v5963_v30 = vadd.f32 %v5852_v57, %v5747_v62  ;;  %v5967_v39 = vadd.f32 %v5856_v38, %v5752_v0 }
 0x9b0   : > { %v5959_v19 = vpop.eup %4873  ;;  %v2519_v32 = vmul.f32 0.044715, %v2487_v20  ;;  %v2518_v37 = vmul.f32 0.044715, %v2486_v11  ;;  %4883 = vtanh.f32 %v2580_v47  ;;  %v2457_v54 = vmul.f32 %v5957_v18, %v5957_v18 }
 0x9b1   : > { %v5969_v48 = vpop.eup %4875  ;;  %v2581_v6 = vmul.f32 0.7978846, %v2549_v22  ;;  %v2520_v43 = vmul.f32 0.044715, %v2488_v14  ;;  %v2459_v57 = vmul.f32 %v5963_v30, %v5963_v30  ;;  %v2458_v38 = vmul.f32 %v5967_v39, %v5967_v39 }
 0x9b2   : > { %v5973_v49 = vpop.eup %4877  ;;  %v2551_v20 = vadd.f32 %v2519_v32, %v5919_v36  ;;  %v2550_v11 = vadd.f32 %v2518_v37, %v5923_v13  ;;  %v2489_v22 = vmul.f32 %v2457_v54, %v5957_v18  ;;  %v5987_v14 = vadd.f32 %v5858_v59, %v5749_v63 }
 0x9b3   : > { %v5981_v35 = vpop.eup %4879  ;;  %4885 = vtanh.f32 %v2581_v6  ;;  %v2552_v47 = vadd.f32 %v2520_v43, %v5931_v33  ;;  %v2491_v37 = vmul.f32 %v2459_v57, %v5963_v30  ;;  %v2490_v29 = vmul.f32 %v2458_v38, %v5967_v39 }
 0x9b4   : > { %v2583_v32 = vmul.f32 0.7978846, %v2551_v20  ;;  %v2582_v40 = vmul.f32 0.7978846, %v2550_v11  ;;  %v2521_v28 = vmul.f32 0.044715, %v2489_v22  ;;  %v2460_v45 = vmul.f32 %v5987_v14, %v5987_v14 }
 0x9b5   : > { %v2584_v23 = vmul.f32 0.7978846, %v2552_v47  ;;  %v5995_v6 = vadd.f32 %v5876_v51, %v5743_v61  ;;  %v2523_v43 = vmul.f32 0.044715, %v2491_v37  ;;  %v2522_v54 = vmul.f32 0.044715, %v2490_v29 }
 0x9b6   : > { %4887 = vtanh.f32 %v2583_v32  ;;  %v5999_v59 = vadd.f32 %v5878_v21, %v5747_v62  ;;  %v2553_v20 = vadd.f32 %v2521_v28, %v5957_v18  ;;  %v2492_v11 = vmul.f32 %v2460_v45, %v5987_v14 }
 0x9b7   : > { %6445 = vst [vmem:[#allocation14_spill] sm:$0xff] %v5995_v6  ;;  %4889 = vtanh.f32 %v2582_v40  ;;  %v2461_v57 = vmul.f32 %v5995_v6, %v5995_v6  ;;  %v2555_v51 = vadd.f32 %v2523_v43, %v5963_v30  ;;  %v2554_v47 = vadd.f32 %v2522_v54, %v5967_v39 }
 0x9b8   : > { %6446 = vst [vmem:[#allocation15_spill] sm:$0xff] %v5999_v59  ;;  %v6005_v38 = vpop.eup %4881  ;;  %4891 = vtanh.f32 %v2584_v23  ;;  %v2463_v29 = vmul.f32 %v5999_v59, %v5999_v59  ;;  %v2585_v21 = vmul.f32 0.7978846, %v2553_v20  ;;  %v2524_v22 = vmul.f32 0.044715, %v2492_v11 }
 0x9b9   : > { %v2493_v40 = vmul.f32 %v2461_v57, %v5995_v6  ;;  %v6014_v28 = vadd.f32 %v5882_v52, %v5752_v0  ;;  %v2587_v45 = vmul.f32 0.7978846, %v2555_v51  ;;  %v2586_v32 = vmul.f32 0.7978846, %v2554_v47 }
 0x9ba   : > { %v2495_v37 = vmul.f32 %v2463_v29, %v5999_v59  ;;  %v6019_v23 = vadd.f32 %v5886_v46, %v5749_v63  ;;  %v6021_v43 = vpop.eup %4883  ;;  %4893 = vtanh.f32 %v2585_v21  ;;  %v2556_v54 = vadd.f32 %v2524_v22, %v5987_v14 }
 0x9bb   : > { %v2525_v20 = vmul.f32 0.044715, %v2493_v40  ;;  %v2462_v11 = vmul.f32 %v6014_v28, %v6014_v28  ;;  %4895 = vtanh.f32 %v2587_v45  ;;  %v6030_v51 = vadd.f32 %v5891_v3, %v5743_v61 }
 0x9bc   : > { %6447 = vst [vmem:[#allocation16_spill] sm:$0xff] %v6019_v23  ;;  %v2527_v52 = vmul.f32 0.044715, %v2495_v37  ;;  %v2464_v57 = vmul.f32 %v6019_v23, %v6019_v23  ;;  %4897 = vtanh.f32 %v2586_v32  ;;  %v2588_v47 = vmul.f32 0.7978846, %v2556_v54 }
 0x9bd   : > { %v6032_v46 = vpop.eup %4885  ;;  %v2557_v29 = vadd.f32 %v2525_v20, %v5995_v6  ;;  %v2494_v21 = vmul.f32 %v2462_v11, %v6014_v28  ;;  %v2465_v45 = vmul.f32 %v6030_v51, %v6030_v51  ;;  %v6042_v37 = vadd.f32 %v5893_v31, %v5747_v62 }
 0x9be   : > { %v2559_v22 = vadd.f32 %v2527_v52, %v5999_v59  ;;  %v2496_v40 = vmul.f32 %v2464_v57, %v6019_v23  ;;  %4899 = vtanh.f32 %v2588_v47  ;;  %v6046_v32 = vadd.f32 %v5902_v44, %v5752_v0 }
 0x9bf   : > { %6448 = vst [vmem:[#allocation17_spill] sm:$0xff] %v6042_v37  ;;  %v2589_v61 = vmul.f32 0.7978846, %v2557_v29  ;;  %v2526_v3 = vmul.f32 0.044715, %v2494_v21  ;;  %v2497_v52 = vmul.f32 %v2465_v45, %v6030_v51  ;;  %v2467_v57 = vmul.f32 %v6042_v37, %v6042_v37 }
 0x9c0   : > { %v6048_v54 = vpop.eup %4887  ;;  %v2591_v20 = vmul.f32 0.7978846, %v2559_v22  ;;  %v2528_v11 = vmul.f32 0.044715, %v2496_v40  ;;  %v2466_v31 = vmul.f32 %v6046_v32, %v6046_v32  ;;  %v6060_v0 = vadd.f32 %v5904_v7, %v5749_v63 }
 0x9c1   : > { %v6053_v59 = vpop.eup %4889  ;;  %4901 = vtanh.f32 %v2589_v61  ;;  %v2558_v62 = vadd.f32 %v2526_v3, %v6014_v28  ;;  %v2529_v29 = vmul.f32 0.044715, %v2497_v52  ;;  %v2499_v21 = vmul.f32 %v2467_v57, %v6042_v37 }
 0x9c2   : > { %v6062_v44 = vpop.eup %4891  ;;  %4903 = vtanh.f32 %v2591_v20  ;;  %v2560_v47 = vadd.f32 %v2528_v11, %v6019_v23  ;;  %v2498_v40 = vmul.f32 %v2466_v31, %v6046_v32  ;;  %v2468_v45 = vmul.f32 %v6060_v0, %v6060_v0 }
 0x9c3   : > { %v2590_v22 = vmul.f32 0.7978846, %v2558_v62  ;;  %v2630_v61 = vadd.f32 1.0, %v5880_v53  ;;  %v2561_v63 = vadd.f32 %v2529_v29, %v6030_v51  ;;  %v2531_v7 = vmul.f32 0.044715, %v2499_v21 }
 0x9c4   : > { %v2592_v3 = vmul.f32 0.7978846, %v2560_v47  ;;  %v2634_v6 = vadd.f32 1.0, %v5906_v50  ;;  %v6072_v20 = vpop.eup %4893  ;;  %v2530_v11 = vmul.f32 0.044715, %v2498_v40  ;;  %v2500_v52 = vmul.f32 %v2468_v45, %v6060_v0 }
 0x9c5   : > { %4905 = vtanh.f32 %v2590_v22  ;;  %v2662_v57 = vmul.f32 0.5, %v2630_v61  ;;  %v6075_v62 = vpop.eup %4895  ;;  %v2593_v31 = vmul.f32 0.7978846, %v2561_v63  ;;  %v2563_v23 = vadd.f32 %v2531_v7, %v6042_v37 }
 0x9c6   : > { %4907 = vtanh.f32 %v2592_v3  ;;  %v2666_v53 = vmul.f32 0.5, %v2634_v6  ;;  %v6078_v47 = vpop.eup %4897  ;;  %v2562_v29 = vadd.f32 %v2530_v11, %v6046_v32  ;;  %v2532_v21 = vmul.f32 0.044715, %v2500_v52 }
 0x9c7   : > { %v2694_v50 = vmul.f32 %v2662_v57, %v5761_v16  ;;  %v2632_v22 = vadd.f32 1.0, %v5884_v10  ;;  %4909 = vtanh.f32 %v2593_v31  ;;  %v2595_v40 = vmul.f32 0.7978846, %v2563_v23  ;;  %v4770_v57 = vld [vmem:[%s6391_s21 + $0x8] sm:$0xff]  }
 0x9c8   : > { %v2698_v45 = vmul.f32 %v2666_v53, %v5781_v26  ;;  %v2636_v61 = vadd.f32 1.0, %v5911_v24  ;;  %v6085_v3 = vpop.eup %4899  ;;  %v2594_v63 = vmul.f32 0.7978846, %v2562_v29  ;;  %v2564_v6 = vadd.f32 %v2532_v21, %v6060_v0 }
 0x9c9   : > { %v2664_v7 = vmul.f32 0.5, %v2632_v22  ;;  %v2638_v37 = vadd.f32 1.0, %v5959_v19  ;;  %4911 = vtanh.f32 %v2595_v40  ;;  %v2642_v16 = vadd.f32 1.0, %v6005_v38 }
 0x9ca   : > { %v2726_v11 = vpack.c.bf16 %v2698_v45, %v2694_v50  ;;  %v2668_v52 = vmul.f32 0.5, %v2636_v61  ;;  %4913 = vtanh.f32 %v2594_v63  ;;  %v2596_v23 = vmul.f32 0.7978846, %v2564_v6 }
 0x9cb   : > { %v6090_v10 = vpop.eup %4901  ;;  %v2696_v26 = vmul.f32 %v2664_v7, %v5764_v12  ;;  %v2670_v24 = vmul.f32 0.5, %v2638_v37  ;;  %v2674_v53 = vmul.f32 0.5, %v2642_v16  ;;  %v2640_v29 = vadd.f32 1.0, %v5969_v48  ;;  %v4771_v7 = vld [vmem:[%s6391_s21 + $0x10] sm:$0xff]  }
 0x9cc   : > { %v6096_v31 = vpop.eup %4903  ;;  %3029 = vmatprep.mubr.bf16.mxu0 %v2726_v11  ;;  %v2700_v19 = vmul.f32 %v2668_v52, %v5784_v27  ;;  %v2644_v38 = vadd.f32 1.0, %v6021_v43  ;;  %4915 = vtanh.f32 %v2596_v23  ;;  %v6449_v21 = vpack.c.bf16 %v5926_v15, %v5896_v41  ;;  %v4754_v27 = vld [vmem:[%s6392_s22] sm:$0xff]  }
 0x9cd   : > { %v2702_v12 = vmul.f32 %v2670_v24, %v5819_v34  ;;  %v2637_v37 = vadd.f32 1.0, %v5945_v58  ;;  %v2641_v50 = vadd.f32 1.0, %v5973_v49  ;;  %v2706_v48 = vmul.f32 %v2674_v53, %v5864_v17  ;;  %v4755_v34 = vld [vmem:[%s6392_s22 + $0x48] sm:$0xff]   ;;  %v4757_v24 = vld [vmem:[%s6392_s22 + $0x50] sm:$0xff]  }
 0x9ce   : > { %3030 = vmatmul.mubr.bf16.vlgmr.msra.gmra.mrb[56].mxu0 %v6449_v21  ;;  %v2728_v22 = vpack.c.bf16 %v2700_v19, %v2696_v26  ;;  %v2672_v40 = vmul.f32 0.5, %v2640_v29  ;;  %v2676_v43 = vmul.f32 0.5, %v2644_v38  ;;  %v2639_v58 = vadd.f32 1.0, %v5951_v55 }
 0x9cf   : > { %4530 = vmatpush3.bf16.msra.mxu0 %v5735_v60  ;;  %v4906_v45 = vpop.eup %4905  ;;  %v2669_v41 = vmul.f32 0.5, %v2637_v37  ;;  %v2673_v15 = vmul.f32 0.5, %v2641_v50  ;;  %v2643_v49 = vadd.f32 1.0, %v5981_v35  ;;  %v2730_v17 = vpack.c.bf16 %v2706_v48, %v2702_v12 }
 0x9d0   : > { %4531 = vmatprep.subr.bf16.mxu0 %v4770_v57  ;;  %v6117_v61 = vpop.eup %4907  ;;  %3094 = vmatprep.mubr.bf16.mxu1 %v2728_v22  ;;  %v2704_v63 = vmul.f32 %v2672_v40, %v5822_v42  ;;  %v2708_v60 = vmul.f32 %v2676_v43, %v5868_v4  ;;  %v2646_v6 = vadd.f32 1.0, %v6053_v59  ;;  %v6450_v55 = vpack.c.bf16 %v5934_v5, %v5909_v56  ;;  %v4756_v42 = vld [vmem:[%s6392_s22 + $0x8] sm:$0xff]  }
 0x9d1   : > { %v2701_v35 = vmul.f32 %v2669_v41, %v5811_v2  ;;  %v2705_v11 = vmul.f32 %v2673_v15, %v5827_v8  ;;  %v2671_v52 = vmul.f32 0.5, %v2639_v58  ;;  %v2675_v16 = vmul.f32 0.5, %v2643_v49  ;;  %v6130_v23 = vpop.eup %4909  ;;  %3037 = vmatprep.mubr.bf16.mxu0 %v2730_v17 }
 0x9d2   : > { %3095 = vmatmul.mubr.bf16.vlgmr.msra.gmra.mrb[36].mxu1 %v6450_v55  ;;  %v2732_v4 = vpack.c.bf16 %v2708_v60, %v2704_v63  ;;  %v2650_v59 = vadd.f32 1.0, %v6078_v47  ;;  %v2678_v26 = vmul.f32 0.5, %v2646_v6  ;;  %v2648_v56 = vadd.f32 1.0, %v6062_v44 }
 0x9d3   : > { %4388 = vmatpush3.bf16.msra.mxu1 %v4754_v27  ;;  %v2729_v2 = vpack.c.bf16 %v2705_v11, %v2701_v35  ;;  %v2703_v8 = vmul.f32 %v2671_v52, %v5814_v1  ;;  %v2707_v5 = vmul.f32 %v2675_v16, %v5830_v9  ;;  %v2652_v19 = vadd.f32 1.0, %v6085_v3  ;;  %4532 = vmatpush3.bf16.msra.mxu0 %v4770_v57  ;;  %v4912_v53 = vpop.eup %4911  ;;  %v4758_v3 = vld [vmem:[%s6392_s22 + $0x10] sm:$0xff]  }
 0x9d4   : > { %4389 = vmatprep.subr.bf16.mxu1 %v4755_v34  ;;  %3102 = vmatprep.mubr.bf16.mxu1 %v2732_v4  ;;  %v2682_v29 = vmul.f32 0.5, %v2650_v59  ;;  %v2710_v47 = vmul.f32 %v2678_v26, %v5923_v13  ;;  %v2680_v38 = vmul.f32 0.5, %v2648_v56  ;;  %v2645_v44 = vadd.f32 1.0, %v6032_v46  ;;  %v4914_v21 = vpop.eup %4913  ;;  %v6452_v59 = vld [vmem:[#allocation14_spill] sm:$0xff] }
 0x9d5   : > { %4533 = vmatprep.subr.bf16.mxu0 %v4771_v7  ;;  %v2731_v1 = vpack.c.bf16 %v2707_v5, %v2703_v8  ;;  %v2684_v9 = vmul.f32 0.5, %v2652_v19  ;;  %v2649_v12 = vadd.f32 1.0, %v6072_v20  ;;  %v2647_v37 = vadd.f32 1.0, %v6048_v54  ;;  %v4759_v20 = vld [vmem:[%s6392_s22 + $0x58] sm:$0xff]  }
 0x9d6   : > { %3038 = vmatmul.mubr.bf16.gmra.mrb[60].mxu0 %v2729_v2  ;;  %v2714_v57 = vmul.f32 %v2682_v29, %v5967_v39  ;;  %v2712_v13 = vmul.f32 %v2680_v38, %v5931_v33  ;;  %v2677_v50 = vmul.f32 0.5, %v2645_v44  ;;  %v2651_v46 = vadd.f32 1.0, %v6075_v62  ;;  %v4916_v22 = vpop.eup %4915  ;;  %v4766_v38 = vld [vmem:[%s6392_s22 + $0x30] sm:$0xff]   ;;  %v4767_v44 = vld [vmem:[%s6392_s22 + $0x78] sm:$0xff]  }
 0x9d7   : > { %4390 = vmatpush3.bf16.msra.mxu1 %v4756_v42  ;;  %v2716_v54 = vmul.f32 %v2684_v9, %v5987_v14  ;;  %v2681_v27 = vmul.f32 0.5, %v2649_v12  ;;  %v2679_v48 = vmul.f32 0.5, %v2647_v37  ;;  %v2654_v40 = vadd.f32 1.0, %v4906_v45  ;;  %4534 = vmatpush3.bf16.msra.mxu0 %v4771_v7  ;;  %v4760_v14 = vld [vmem:[%s6392_s22 + $0x18] sm:$0xff]   ;;  %v6456_v12 = vld [vmem:[#allocation4_spill] sm:$0xff] }
 0x9d8   : > { %4391 = vmatprep.subr.bf16.mxu1 %v4757_v24  ;;  %v2734_v43 = vpack.c.bf16 %v2714_v57, %v2710_v47  ;;  %v2709_v39 = vmul.f32 %v2677_v50, %v5900_v25  ;;  %v2683_v34 = vmul.f32 0.5, %v2651_v46  ;;  %v2658_v33 = vadd.f32 1.0, %v4914_v21  ;;  %v6453_v24 = vld [vmem:[#allocation15_spill] sm:$0xff]  ;;  %v6455_v21 = vld [vmem:[#allocation5_spill] sm:$0xff]  ;;  %v4773_v57 = vld [vmem:[%s6391_s21 + $0x20] sm:$0xff]  }
 0x9d9   : > { %v2736_v41 = vpack.c.bf16 %v2716_v54, %v2712_v13  ;;  %v2713_v62 = vmul.f32 %v2681_v27, %v5957_v18  ;;  %v2711_v15 = vmul.f32 %v2679_v48, %v5919_v36  ;;  %v2686_v58 = vmul.f32 0.5, %v2654_v40  ;;  %v4761_v36 = vld [vmem:[%s6392_s22 + $0x60] sm:$0xff]   ;;  %v4768_v9 = vld [vmem:[%s6392_s22 + $0x38] sm:$0xff]   ;;  %v4774_v13 = vld [vmem:[%s6391_s21 + $0x28] sm:$0xff]  }
 0x9da   : > { %3103 = vmatmul.mubr.bf16.gmra.mrb[40].mxu1 %v2731_v1  ;;  %3045 = vmatprep.mubr.bf16.mxu0 %v2734_v43  ;;  %v2715_v45 = vmul.f32 %v2683_v34, %v5963_v30  ;;  %v2690_v49 = vmul.f32 0.5, %v2658_v33  ;;  %v2656_v25 = vadd.f32 1.0, %v6117_v61  ;;  %v2660_v17 = vadd.f32 1.0, %v4916_v22  ;;  %v4775_v50 = vld [vmem:[%s6391_s21 + $0x30] sm:$0xff]   ;;  %v4776_v46 = vld [vmem:[%s6391_s21 + $0x38] sm:$0xff]  }
 0x9db   : > { %4392 = vmatpush3.bf16.msra.mxu1 %v4758_v3  ;;  %3110 = vmatprep.mubr.bf16.mxu1 %v2736_v41  ;;  %v2733_v63 = vpack.c.bf16 %v2713_v62, %v2709_v39  ;;  %v2718_v18 = vmul.f32 %v2686_v58, %v6014_v28  ;;  %v2653_v60 = vadd.f32 1.0, %v6090_v10  ;;  %v2657_v6 = vadd.f32 1.0, %v6130_v23  ;;  %v4762_v28 = vld [vmem:[%s6392_s22 + $0x20] sm:$0xff]   ;;  %v4772_v3 = vld [vmem:[%s6391_s21 + $0x18] sm:$0xff]  }
 0x9dc   : > { %4393 = vmatprep.subr.bf16.mxu1 %v4759_v20  ;;  %v2735_v7 = vpack.c.bf16 %v2715_v45, %v2711_v15  ;;  %v2722_v30 = vmul.f32 %v2690_v49, %v6046_v32  ;;  %v2688_v55 = vmul.f32 0.5, %v2656_v25  ;;  %v2692_v35 = vmul.f32 0.5, %v2660_v17  ;;  %v6451_v10 = vld [vmem:[#allocation16_spill] sm:$0xff]  ;;  %v4763_v32 = vld [vmem:[%s6392_s22 + $0x68] sm:$0xff]   ;;  %4535 = vmatprep.subr.bf16.mxu0 %v4772_v3  ;;  %v6457_v45 = vld [vmem:[#allocation6_spill] sm:$0xff] }
 0x9dd   : > { %v2685_v61 = vmul.f32 0.5, %v2653_v60  ;;  %v2689_v11 = vmul.f32 0.5, %v2657_v6  ;;  %v2655_v52 = vadd.f32 1.0, %v6096_v31  ;;  %v2659_v16 = vadd.f32 1.0, %v4912_v53  ;;  %v6454_v53 = vld [vmem:[#allocation17_spill] sm:$0xff]  ;;  %4536 = vmatpush3.bf16.msra.mxu0 %v4772_v3  ;;  %v6458_v60 = vld [vmem:[#allocation7_spill] sm:$0xff] }
 0x9de   : > { %3046 = vmatmul.mubr.bf16.gmra.mrb[64].mxu0 %v2733_v63  ;;  %v2738_v42 = vpack.c.bf16 %v2722_v30, %v2718_v18  ;;  %v2720_v4 = vmul.f32 %v2688_v55, %v6451_v10  ;;  %v2724_v23 = vmul.f32 %v2692_v35, %v6060_v0  ;;  %v4764_v0 = vld [vmem:[%s6392_s22 + $0x28] sm:$0xff]   ;;  %v3284_v1 = vpack.c.bf16 %v6455_v21, %v6455_v21 }
 0x9df   : > { %4394 = vmatpush3.bf16.msra.mxu1 %v4760_v14  ;;  %v2717_v26 = vmul.f32 %v2685_v61, %v6452_v59  ;;  %v2721_v31 = vmul.f32 %v2689_v11, %v6030_v51  ;;  %v2687_v56 = vmul.f32 0.5, %v2655_v52  ;;  %v2691_v2 = vmul.f32 0.5, %v2659_v16  ;;  %v4765_v51 = vld [vmem:[%s6392_s22 + $0x70] sm:$0xff]   ;;  %4537 = vmatprep.subr.bf16.mxu0 %v4773_v57 }
 0x9e0   : > { %4395 = vmatprep.subr.bf16.mxu1 %v4761_v36  ;;  %3053 = vmatprep.mubr.bf16.mxu0 %v2738_v42  ;;  %v2740_v8 = vpack.c.bf16 %v2724_v23, %v2720_v4  ;;  %v3283_v37 = vpack.c.bf16 %v6456_v12, %v6456_v12  ;;  %v6223_v36 = vld [vmem:[%s6390_s20] ss:$0 sm:$0xff] }
 0x9e1   : > { %v2737_v5 = vpack.c.bf16 %v2721_v31, %v2717_v26  ;;  %v2719_v19 = vmul.f32 %v2687_v56, %v6453_v24  ;;  %v2723_v29 = vmul.f32 %v2691_v2, %v6454_v53  ;;  %4538 = vmatpush3.bf16.msra.mxu0 %v4773_v57 }
 0x9e2   : > { %3111 = vmatmul.mubr.bf16.gmra.mrb[44].mxu1 %v2735_v7  ;;  %4539 = vmatprep.subr.bf16.mxu0 %v4774_v13 }
 0x9e3   : > { %4396 = vmatpush3.bf16.msra.mxu1 %v4762_v28  ;;  %3118 = vmatprep.mubr.bf16.mxu1 %v2740_v8  ;;  %v2739_v47 = vpack.c.bf16 %v2723_v29, %v2719_v19  ;;  %v6460_v8 = vld [vmem:[#allocation9_spill] sm:$0xff] }
 0x9e4   : > { %4397 = vmatprep.subr.bf16.mxu1 %v4763_v32  ;;  %v6459_v32 = vld [vmem:[#allocation8_spill] sm:$0xff] }
 0x9e5   : > { %4540 = vmatpush3.bf16.msra.mxu0 %v4774_v13 }
 0x9e6   : > { %3054 = vmatmul.mubr.bf16.gmra.mrb[68].mxu0 %v2737_v5  ;;  %4541 = vmatprep.subr.bf16.mxu0 %v4775_v50 }
 0x9e7   : > { %4398 = vmatpush3.bf16.msra.mxu1 %v4764_v0 }
 0x9e8   : > { %4399 = vmatprep.subr.bf16.mxu1 %v4765_v51 }
 0x9e9   : > { %4542 = vmatpush3.bf16.msra.mxu0 %v4775_v50 }
 0x9ea   : > { %3119 = vmatmul.mubr.bf16.gmra.mrb[48].mxu1 %v2739_v47  ;;  %4543 = vmatprep.subr.bf16.mxu0 %v4776_v46 }
 0x9eb   : > { %4400 = vmatpush3.bf16.msra.mxu1 %v4766_v38  ;;  %3445 = vmatprep.mubr.bf16.mxu1 %v3284_v1 }
 0x9ec   : > { %4401 = vmatprep.subr.bf16.mxu1 %v4767_v44 }
 0x9ed   : > { %4544 = vmatpush3.bf16.msra.mxu0 %v4776_v46 }
 0x9ef   : > { %4402 = vmatpush3.bf16.msra.mxu1 %v4768_v9 }
 0x9f2   : > { %3446 = vmatmul.mubr.bf16.vlgmr.msra.gmra.mrb[52].mxu1 %v3283_v37  ;;  %v6461_v37 = vld [vmem:[#allocation10_spill] sm:$0xff] }
 0xaa1   : > { %v4311_v22 = vpop.f32.mrb[56].mxu0 }
 0xaa2   : > { %v4312_v20 = vpop.f32.mrb[57].mxu0 }
 0xaa3   : > { %v4313_v54 = vadd.f32 %v4312_v20, %v4311_v22  ;;  %v4314_v27 = vpop.f32.mrb[58].mxu0  ;;  %v6462_v22 = vld [vmem:[#allocation11_spill] sm:$0xff] }
 0xaa4   : > { %v4315_v48 = vpop.f32.mrb[59].mxu0 }
 0xaa5   : > { %v4351_v40 = vpop.f32.mrb[36].mxu1  ;;  %v4316_v43 = vadd.f32 %v4315_v48, %v4314_v27 }
 0xaa6   : > { %v4352_v39 = vpop.f32.mrb[37].mxu1 }
 0xaa7   : > { %v4353_v34 = vadd.f32 %v4352_v39, %v4351_v40  ;;  %v4354_v33 = vpop.f32.mrb[38].mxu1 }
 0xaa8   : > { %v4355_v41 = vpop.f32.mrb[39].mxu1 }
 0xaa9   : > { %v3097_v62 = vadd.f32 %v4353_v34, %v4313_v54  ;;  %v4356_v15 = vadd.f32 %v4355_v41, %v4354_v33  ;;  %v4317_v58 = vpop.f32.mrb[60].mxu0 }
 0xaaa   : > { %v4318_v14 = vpop.f32.mrb[61].mxu0 }
 0xaab   : > { %v3127_v49 = vadd.f32 %v3097_v62, %v6457_v45  ;;  %v3100_v25 = vadd.f32 %v4356_v15, %v4316_v43  ;;  %v4319_v17 = vadd.f32 %v4318_v14, %v4317_v58  ;;  %v4320_v63 = vpop.f32.mrb[62].mxu0  ;;  %v6463_v58 = vld [vmem:[#allocation12_spill] sm:$0xff] }
 0xaac   : > { %v4321_v18 = vpop.f32.mrb[63].mxu0 }
 0xaad   : > { %v3128_v6 = vadd.f32 %v3100_v25, %v6458_v60  ;;  %v4357_v7 = vpop.f32.mrb[40].mxu1  ;;  %v4322_v30 = vadd.f32 %v4321_v18, %v4320_v63  ;;  %v6227_v11 = vadd.f32 %v6223_v36, %v3127_v49  ;;  %v6464_v49 = vld [vmem:[#allocation13_spill] sm:$0xff] }
 0xaae   : > { %v4358_v55 = vpop.f32.mrb[41].mxu1 }
 0xaaf   : > { %v4359_v35 = vadd.f32 %v4358_v55, %v4357_v7  ;;  %v4360_v61 = vpop.f32.mrb[42].mxu1  ;;  %v6230_v52 = vadd.f32 %v6223_v36, %v3128_v6 }
 0xab0   : > { %v4361_v16 = vpop.f32.mrb[43].mxu1 }
 0xab1   : > { %v3105_v28 = vadd.f32 %v4359_v35, %v4319_v17  ;;  %v4362_v42 = vadd.f32 %v4361_v16, %v4360_v61  ;;  %v3150_v10 = vpack.c.bf16 %v6230_v52, %v6227_v11  ;;  %v4323_v4 = vpop.f32.mrb[64].mxu0 }
 0xab2   : > { %v4324_v23 = vpop.f32.mrb[65].mxu0 }
 0xab3   : > { %v3129_v59 = vadd.f32 %v3105_v28, %v6459_v32  ;;  %v3108_v26 = vadd.f32 %v4362_v42, %v4322_v30  ;;  %4545 = vmatprep.mubr.bf16.mxu0 %v3150_v10  ;;  %v4325_v31 = vadd.f32 %v4324_v23, %v4323_v4  ;;  %v4326_v56 = vpop.f32.mrb[66].mxu0 }
 0xab4   : > { %v4327_v2 = vpop.f32.mrb[67].mxu0 }
 0xab5   : > { %v3130_v5 = vadd.f32 %v3108_v26, %v6460_v8  ;;  %v4363_v24 = vpop.f32.mrb[44].mxu1  ;;  %v4328_v19 = vadd.f32 %v4327_v2, %v4326_v56  ;;  %v6237_v29 = vadd.f32 %v6223_v36, %v3129_v59 }
 0xab6   : > { %v4364_v53 = vpop.f32.mrb[45].mxu1 }
 0xab7   : > { %v6240_v0 = vadd.f32 %v6223_v36, %v3130_v5  ;;  %v4365_v47 = vadd.f32 %v4364_v53, %v4363_v24  ;;  %v4366_v51 = vpop.f32.mrb[46].mxu1 }
 0xab8   : > { %v4367_v38 = vpop.f32.mrb[47].mxu1 }
 0xab9   : > { %v3151_v44 = vpack.c.bf16 %v6240_v0, %v6237_v29  ;;  %v3113_v21 = vadd.f32 %v4365_v47, %v4325_v31  ;;  %v4368_v1 = vadd.f32 %v4367_v38, %v4366_v51  ;;  %v4329_v9 = vpop.f32.mrb[68].mxu0 }
 0xaba   : > { %v4330_v12 = vpop.f32.mrb[69].mxu0 }
 0xabb   : > { %v3131_v3 = vadd.f32 %v3113_v21, %v6461_v37  ;;  %v3116_v57 = vadd.f32 %v4368_v1, %v4328_v19  ;;  %4546 = vmatmul.mubr.bf16.vlgmr.msra.gmra.mrb[72].mxu0 %v3151_v44  ;;  %v4331_v13 = vadd.f32 %v4330_v12, %v4329_v9  ;;  %v4332_v50 = vpop.f32.mrb[70].mxu0 }
 0xabc   : > { %v4333_v46 = vpop.f32.mrb[71].mxu0 }
 0xabd   : > { %v3132_v20 = vadd.f32 %v3116_v57, %v6462_v22  ;;  %v4369_v54 = vpop.f32.mrb[48].mxu1  ;;  %v4334_v27 = vadd.f32 %v4333_v46, %v4332_v50  ;;  %v6247_v39 = vadd.f32 %v6223_v36, %v3131_v3 }
 0xabe   : > { %v4370_v48 = vpop.f32.mrb[49].mxu1 }
 0xabf   : > { %v4371_v40 = vadd.f32 %v4370_v48, %v4369_v54  ;;  %v4372_v43 = vpop.f32.mrb[50].mxu1  ;;  %v6250_v34 = vadd.f32 %v6223_v36, %v3132_v20 }
 0xac0   : > { %v4373_v33 = vpop.f32.mrb[51].mxu1 }
 0xac1   : > { %v3121_v41 = vadd.f32 %v4371_v40, %v4331_v13  ;;  %v4374_v62 = vadd.f32 %v4373_v33, %v4372_v43  ;;  %v3152_v15 = vpack.c.bf16 %v6250_v34, %v6247_v39 }
 0xac3   : > { %v3133_v14 = vadd.f32 %v3121_v41, %v6463_v58  ;;  %v3124_v45 = vadd.f32 %v4374_v62, %v4334_v27  ;;  %4549 = vmatprep.mubr.bf16.mxu0 %v3152_v15 }
 0xac5   : > { %v3134_v25 = vadd.f32 %v3124_v45, %v6464_v49  ;;  %v4403_v17 = vpop.f32.mrb[52].mxu1  ;;  %v6257_v6 = vadd.f32 %v6223_v36, %v3133_v14 }
 0xac6   : > { %v4404_v63 = vpop.f32.mrb[53].mxu1 }
 0xac7   : > { %v4405_v18 = vadd.f32 %v4404_v63, %v4403_v17  ;;  %v4406_v60 = vpop.f32.mrb[54].mxu1  ;;  %v6260_v7 = vadd.f32 %v6223_v36, %v3134_v25 }
 0xac8   : > { %v4407_v30 = vpop.f32.mrb[55].mxu1 }
 0xac9   : > { %v6262_v55 = vpack.c.bf16 %v4405_v18, %v4405_v18  ;;  %v3153_v35 = vpack.c.bf16 %v6260_v7, %v6257_v6 }
 0xacb   : > { %4550 = vmatmul.mubr.bf16.gmra.mrb[76].mxu0 %v3153_v35  ;;  %4613 = vmatprep.subr.msk.bf16.mxu0 %vm953_vm3, %v6262_v55  ;;  %v3471_v61 = vsel %vm953_vm3, %v6262_v55, 0 }
 0xacc   : > { %4554 = vmatpush3.bf16.xpose.msra.mxu0 %v3471_v61 }
 0xb8e   : > { %v4547_v16 = vpop.f32.mrb[72].mxu0 }
 0xb8f   : > { %v3252_v28 = vpop.f32.mrb[73].mxu0 }
 0xb90   : > { %v4548_v42 = vpop.f32.mrb[74].mxu0 }
 0xb91   : > { %v3454_v10 = vpack.c.bf16 %v4548_v42, %v4547_v16  ;;  %v3255_v36 = vpop.f32.mrb[75].mxu0 }
 0xb92   : > { %v3453_v4 = vpack.c.bf16 %v3255_v36, %v3252_v28 }
 0xb94   : > { %4555 = vmatprep.mubr.msk.bf16.mxu0 %vm953_vm3, %v3453_v4 }
 0xb95   : > { %4556 = vmatmul.mubr.msk.bf16.vlgmr.msra.gmra.mrb[80].mxu0 %vm953_vm3, %v3454_v10 }
 0xb9e   : > { %v4551_v23 = vpop.f32.mrb[76].mxu0 }
 0xb9f   : > { %v3268_v32 = vpop.f32.mrb[77].mxu0 }
 0xba0   : > { %v4552_v59 = vpop.f32.mrb[78].mxu0 }
 0xba1   : > { %v3456_v26 = vpack.c.bf16 %v4552_v59, %v4551_v23  ;;  %v3271_v31 = vpop.f32.mrb[79].mxu0 }
 0xba2   : > { %v3455_v56 = vpack.c.bf16 %v3271_v31, %v3268_v32 }
 0xba4   : > { %4559 = vmatprep.mubr.msk.bf16.mxu0 %vm953_vm3, %v3455_v56 }
 0xba5   : > { %4560 = vmatmul.mubr.msk.bf16.gmra.mrb[84].mxu0 %vm953_vm3, %v3456_v26 }
 0xc68   : > { %v4557_v2 = vpop.f32.mrb[80].mxu0 }
 0xc69   : > { %v3507_v8 = vpop.f32.mrb[81].mxu0  ;;  %v3540_v53 = vmul.f32 0.125, %v4557_v2 }
 0xc6a   : > { %v3538_v5 = vmul.f32 0.125, %v3507_v8  ;;  %v4558_v24 = vpop.f32.mrb[82].mxu0 }
 0xc6b   : > { %v3510_v19 = vpop.f32.mrb[83].mxu0  ;;  %v3541_v38 = vmul.f32 0.125, %v4558_v24  ;;  %v3553_v21 = vsel %vm3546_vm6, %v3540_v53, -inf }
 0xc6c   : > { %v3539_v47 = vmul.f32 0.125, %v3510_v19  ;;  %v3547_v51 = vsel %vm3546_vm6, %v3538_v5, -inf }
 0xc6d   : > { %3548 = vmax.xlane.f32.xlu1 %v3547_v51  ;;  %v3556_v1 = vsel %vm3546_vm6, %v3541_v38, -inf }
 0xc6e   : > { %v3550_v44 = vsel %vm3546_vm6, %v3539_v47, -inf }
 0xc6f   : > { %3551 = vmax.xlane.f32.xlu0 %v3550_v44  ;;  %v4777_v44 = vld [vmem:[%s6393_s23] sm:$0xff]  }
 0xc70   : > { %4573 = vmatprep.subr.bf16.mxu0 %v4777_v44 }
 0xc71   : > { %3554 = vmax.xlane.f32.xlu1 %v3553_v21  ;;  %v4778_v21 = vld [vmem:[%s6393_s23 + $0x8] sm:$0xff]   ;;  %4574 = vmatpush3.bf16.msra.mxu0 %v4777_v44 }
 0xc72   : > { %4575 = vmatprep.subr.bf16.mxu0 %v4778_v21 }
 0xc73   : > { %3557 = vmax.xlane.f32.xlu0 %v3556_v1  ;;  %v4779_v1 = vld [vmem:[%s6393_s23 + $0x10] sm:$0xff]  }
 0xc75   : > { %4576 = vmatpush3.bf16.msra.mxu0 %v4778_v21 }
 0xc76   : > { %4577 = vmatprep.subr.bf16.mxu0 %v4779_v1 }
 0xc78   : > { %v4561_v9 = vpop.f32.mrb[84].mxu0 }
 0xc79   : > { %v3523_v12 = vpop.f32.mrb[85].mxu0  ;;  %v3544_v13 = vmul.f32 0.125, %v4561_v9  ;;  %4578 = vmatpush3.bf16.msra.mxu0 %v4779_v1 }
 0xc7a   : > { %v3542_v37 = vmul.f32 0.125, %v3523_v12  ;;  %v4562_v3 = vpop.f32.mrb[86].mxu0 }
 0xc7b   : > { %v3526_v57 = vpop.f32.mrb[87].mxu0  ;;  %v3545_v22 = vmul.f32 0.125, %v4562_v3  ;;  %v3565_v54 = vsel %vm3546_vm6, %v3544_v13, -inf }
 0xc7c   : > { %v3543_v50 = vmul.f32 0.125, %v3526_v57  ;;  %v3559_v46 = vsel %vm3546_vm6, %v3542_v37, -inf }
 0xc7d   : > { %3560 = vmax.xlane.f32.xlu1 %v3559_v46  ;;  %v3568_v27 = vsel %vm3546_vm6, %v3545_v22, -inf }
 0xc7e   : > { %v3562_v20 = vsel %vm3546_vm6, %v3543_v50, -inf }
 0xc7f   : > { %3563 = vmax.xlane.f32.xlu0 %v3562_v20 }
 0xc81   : > { %3566 = vmax.xlane.f32.xlu1 %v3565_v54 }
 0xc83   : > { %3569 = vmax.xlane.f32.xlu0 %v3568_v27 }
 0xcfa   : > { %v3549_v48 = vpop.xlane.xlu1 %3548 }
 0xcfb   : > { %v3571_v40 = vsub.f32 %v3538_v5, %v3549_v48 }
 0xcfc   : > { %v3552_v43 = vpop.xlane.xlu0 %3551 }
 0xcfd   : > { %v3572_v33 = vsub.f32 %v3539_v47, %v3552_v43  ;;  %v3579_v58 = vmul.f32 1.442695, %v3571_v40 }
 0xcfe   : > { %v3555_v41 = vpop.xlane.xlu1 %3554 }
 0xcff   : > { %v3581_v62 = vmul.f32 1.442695, %v3572_v33  ;;  %v3573_v15 = vsub.f32 %v3540_v53, %v3555_v41 }
 0xd00   : > { %v3558_v14 = vpop.xlane.xlu0 %3557 }
 0xd01   : > { %4917 = vpow2.f32 %v3581_v62  ;;  %v3583_v45 = vmul.f32 1.442695, %v3573_v15  ;;  %v3574_v49 = vsub.f32 %v3541_v38, %v3558_v14 }
 0xd03   : > { %4919 = vpow2.f32 %v3583_v45  ;;  %v3585_v25 = vmul.f32 1.442695, %v3574_v49 }
 0xd04   : > { %4921 = vpow2.f32 %v3579_v58 }
 0xd05   : > { %4923 = vpow2.f32 %v3585_v25 }
 0xd0a   : > { %v3561_v17 = vpop.xlane.xlu1 %3560 }
 0xd0b   : > { %v4918_v63 = vpop.eup %4917  ;;  %v3575_v18 = vsub.f32 %v3542_v37, %v3561_v17 }
 0xd0c   : > { %v3564_v60 = vpop.xlane.xlu0 %3563  ;;  %v3598_v30 = vsel %vm3546_vm6, %v4918_v63, 0.0 }
 0xd0d   : > { %v6283_v35 = vpop.eup %4919  ;;  %v3576_v61 = vsub.f32 %v3543_v50, %v3564_v60  ;;  %3599 = vadd.xlane.f32.xlu0 %v3598_v30  ;;  %v3587_v23 = vmul.f32 1.442695, %v3575_v18 }
 0xd0e   : > { %v4922_v16 = vpop.eup %4921  ;;  %v3567_v28 = vpop.xlane.xlu1 %3566  ;;  %v3601_v42 = vsel %vm3546_vm6, %v6283_v35, 0.0 }
 0xd0f   : > { %v6287_v10 = vpop.eup %4923  ;;  %v3589_v36 = vmul.f32 1.442695, %v3576_v61  ;;  %v3577_v4 = vsub.f32 %v3544_v13, %v3567_v28  ;;  %3602 = vadd.xlane.f32.xlu1 %v3601_v42  ;;  %v3595_v56 = vsel %vm3546_vm6, %v4922_v16, 0.0  ;;  %v4781_v61 = vld [vmem:[%s6394_s24] sm:$0xff]   ;;  %v4783_v28 = vld [vmem:[%s6394_s24 + $0x10] sm:$0xff]   ;;  %v4784_v42 = vld [vmem:[%s6394_s24 + $0x18] sm:$0xff]  }
 0xd10   : > { %v3570_v32 = vpop.xlane.xlu0 %3569  ;;  %v3604_v59 = vsel %vm3546_vm6, %v6287_v10, 0.0 }
 0xd11   : > { %4925 = vpow2.f32 %v3589_v36  ;;  %v3591_v26 = vmul.f32 1.442695, %v3577_v4  ;;  %v3578_v31 = vsub.f32 %v3545_v22, %v3570_v32  ;;  %3605 = vadd.xlane.f32.xlu0 %v3604_v59  ;;  %v4786_v36 = vld [vmem:[%s6394_s24 + $0x28] sm:$0xff]  }
 0xd13   : > { %4927 = vpow2.f32 %v3591_v26  ;;  %v3593_v2 = vmul.f32 1.442695, %v3578_v31  ;;  %3596 = vadd.xlane.f32.xlu1 %v3595_v56 }
 0xd14   : > { %4929 = vpow2.f32 %v3587_v23 }
 0xd15   : > { %4931 = vpow2.f32 %v3593_v2 }
 0xd1b   : > { %v4926_v8 = vpop.eup %4925 }
 0xd1c   : > { %v3610_v5 = vsel %vm3546_vm6, %v4926_v8, 0.0 }
 0xd1d   : > { %v4928_v24 = vpop.eup %4927  ;;  %3611 = vadd.xlane.f32.xlu0 %v3610_v5 }
 0xd1e   : > { %v4930_v19 = vpop.eup %4929  ;;  %v3613_v53 = vsel %vm3546_vm6, %v4928_v24, 0.0 }
 0xd1f   : > { %v4932_v47 = vpop.eup %4931  ;;  %3614 = vadd.xlane.f32.xlu1 %v3613_v53  ;;  %v3607_v38 = vsel %vm3546_vm6, %v4930_v19, 0.0  ;;  %v4787_v53 = vld [vmem:[%s6394_s24 + $0x30] sm:$0xff]  }
 0xd20   : > { %v3616_v51 = vsel %vm3546_vm6, %v4932_v47, 0.0 }
 0xd21   : > { %3617 = vadd.xlane.f32.xlu0 %v3616_v51 }
 0xd23   : > { %3608 = vadd.xlane.f32.xlu1 %v3607_v38 }
 0xd34   : > { %3640 = vrot.lane.b32.xlu1 %v6262_v55, %s4959_s0 }
 0xd9a   : > { %v3600_v9 = vpop.xlane.xlu0 %3599 }
 0xd9b   : > { %4933 = vrcp.f32 %v3600_v9 }
 0xd9c   : > { %v3603_v55 = vpop.xlane.xlu1 %3602 }
 0xd9e   : > { %v3606_v37 = vpop.xlane.xlu0 %3605 }
 0xda0   : > { %v3597_v12 = vpop.xlane.xlu1 %3596 }
 0xda1   : > { %4935 = vrcp.f32 %v3597_v12 }
 0xda2   : > { %4937 = vrcp.f32 %v3606_v37 }
 0xda3   : > { %4939 = vrcp.f32 %v3603_v55 }
 0xda5   : > { %v4934_v3 = vpop.eup %4933 }
 0xda6   : > { %v3628_v22 = vmul.f32 %v4934_v3, %v4918_v63 }
 0xdaa   : > { %v3612_v57 = vpop.xlane.xlu0 %3611 }
 0xdab   : > { %v4936_v13 = vpop.eup %4935  ;;  %4941 = vrcp.f32 %v3612_v57 }
 0xdac   : > { %v3615_v50 = vpop.xlane.xlu1 %3614  ;;  %v3627_v46 = vmul.f32 %v4936_v13, %v4922_v16  ;;  %v4938_v27 = vpop.eup %4937  ;;  %v4782_v16 = vld [vmem:[%s6394_s24 + $0x8] sm:$0xff]  }
 0xdad   : > { %v4940_v40 = vpop.eup %4939  ;;  %v3630_v43 = vmul.f32 %v4938_v27, %v6287_v10  ;;  %v4785_v10 = vld [vmem:[%s6394_s24 + $0x20] sm:$0xff]  }
 0xdae   : > { %v3618_v20 = vpop.xlane.xlu0 %3617  ;;  %v3635_v54 = vpack.c.bf16 %v3628_v22, %v3627_v46  ;;  %v3629_v41 = vmul.f32 %v4940_v40, %v6283_v35  ;;  %v4780_v35 = vld [vmem:[%s6393_s23 + $0x18] sm:$0xff]  }
 0xdaf   : > { %4943 = vrcp.f32 %v3618_v20  ;;  %4579 = vmatprep.subr.bf16.mxu0 %v4780_v35 }
 0xdb0   : > { %4945 = vrcp.f32 %v3615_v50  ;;  %v3609_v48 = vpop.xlane.xlu1 %3608  ;;  %4565 = vmatprep.mubr.msk.bf16.mxu1 %vm3546_vm6, %v3635_v54  ;;  %v3636_v15 = vpack.c.bf16 %v3630_v43, %v3629_v41  ;;  %4580 = vmatpush3.bf16.msra.mxu0 %v4780_v35 }
 0xdb1   : > { %4947 = vrcp.f32 %v3609_v48 }
 0xdb4   : > { %v3641_v33 = vpop.permute.xlu1 %3640 }
 0xdb5   : > { %v3656_v62 = vsel %vm3654_vm7, %v3641_v33, 0  ;;  %4614 = vmatprep.subr.msk.bf16.mxu1 %vm3654_vm7, %v3641_v33  ;;  %v4942_v58 = vpop.eup %4941 }
 0xdb6   : > { %4564 = vmatpush3.bf16.msra.mxu1 %v3656_v62  ;;  %v3632_v63 = vmul.f32 %v4942_v58, %v4926_v8 }
 0xdb7   : > { %4589 = vmatprep.subr.bf16.mxu1 %v4781_v61 }
 0xdb9   : > { %v4944_v14 = vpop.eup %4943  ;;  %4566 = vmatmul.mubr.msk.bf16.vlgmr.msra.gmra.mrb[56].mxu1 %vm3546_vm6, %v3636_v15 }
 0xdba   : > { %v4946_v45 = vpop.eup %4945  ;;  %v3634_v25 = vmul.f32 %v4944_v14, %v4932_v47  ;;  %4590 = vmatpush3.bf16.msra.mxu1 %v4781_v61  ;;  %v4788_v47 = vld [vmem:[%s6394_s24 + $0x38] sm:$0xff]  }
 0xdbb   : > { %v4948_v49 = vpop.eup %4947  ;;  %v3633_v18 = vmul.f32 %v4946_v45, %v4928_v24  ;;  %4591 = vmatprep.subr.bf16.mxu1 %v4782_v16 }
 0xdbc   : > { %v3631_v17 = vmul.f32 %v4948_v49, %v4930_v19 }
 0xdbd   : > { %v3638_v30 = vpack.c.bf16 %v3634_v25, %v3633_v18 }
 0xdbe   : > { %v3637_v60 = vpack.c.bf16 %v3632_v63, %v3631_v17  ;;  %4592 = vmatpush3.bf16.msra.mxu1 %v4782_v16 }
 0xdbf   : > { %4593 = vmatprep.subr.bf16.mxu1 %v4783_v28 }
 0xdc0   : > { %4569 = vmatprep.mubr.msk.bf16.mxu1 %vm3546_vm6, %v3637_v60 }
 0xdc1   : > { %4570 = vmatmul.mubr.msk.bf16.gmra.mrb[60].mxu1 %vm3546_vm6, %v3638_v30 }
 0xdc2   : > { %4594 = vmatpush3.bf16.msra.mxu1 %v4783_v28 }
 0xdc3   : > { %4595 = vmatprep.subr.bf16.mxu1 %v4784_v42 }
 0xdc6   : > { %4596 = vmatpush3.bf16.msra.mxu1 %v4784_v42 }
 0xdc7   : > { %4597 = vmatprep.subr.bf16.mxu1 %v4785_v10 }
 0xdca   : > { %4598 = vmatpush3.bf16.msra.mxu1 %v4785_v10 }
 0xdcb   : > { %4599 = vmatprep.subr.bf16.mxu1 %v4786_v36 }
 0xdce   : > { %4600 = vmatpush3.bf16.msra.mxu1 %v4786_v36 }
 0xdcf   : > { %4601 = vmatprep.subr.bf16.mxu1 %v4787_v53 }
 0xdd2   : > { %4602 = vmatpush3.bf16.msra.mxu1 %v4787_v53 }
 0xdd3   : > { %4603 = vmatprep.subr.bf16.mxu1 %v4788_v47 }
 0xdd6   : > { %4604 = vmatpush3.bf16.msra.mxu1 %v4788_v47 }
 0xe8c   : > { %v4567_v4 = vpop.f32.mrb[56].mxu1 }
 0xe8d   : > { %v3692_v23 = vpop.f32.mrb[57].mxu1 }
 0xe8e   : > { %v4568_v32 = vpop.f32.mrb[58].mxu1 }
 0xe8f   : > { %v3724_v59 = vpack.c.bf16 %v4568_v32, %v4567_v4  ;;  %v3695_v26 = vpop.f32.mrb[59].mxu1 }
 0xe90   : > { %v3723_v31 = vpack.c.bf16 %v3695_v26, %v3692_v23 }
 0xe92   : > { %4581 = vmatprep.mubr.msk.bf16.mxu0 %vm953_vm3, %v3723_v31 }
 0xe93   : > { %4582 = vmatmul.mubr.msk.bf16.vlgmr.msra.gmra.mrb[88].mxu0 %vm953_vm3, %v3724_v59 }
 0xe94   : > { %v4571_v56 = vpop.f32.mrb[60].mxu1 }
 0xe95   : > { %v3708_v2 = vpop.f32.mrb[61].mxu1 }
 0xe96   : > { %v4572_v8 = vpop.f32.mrb[62].mxu1 }
 0xe97   : > { %v3726_v5 = vpack.c.bf16 %v4572_v8, %v4571_v56  ;;  %v3711_v24 = vpop.f32.mrb[63].mxu1 }
 0xe98   : > { %v3725_v19 = vpack.c.bf16 %v3711_v24, %v3708_v2 }
 0xe9a   : > { %4585 = vmatprep.mubr.msk.bf16.mxu0 %vm953_vm3, %v3725_v19 }
 0xe9b   : > { %4586 = vmatmul.mubr.msk.bf16.gmra.mrb[92].mxu0 %vm953_vm3, %v3726_v5 }
 0xf66   : > { %v4583_v51 = vpop.f32.mrb[88].mxu0 }
 0xf67   : > { %v3805_v38 = vpop.f32.mrb[89].mxu0  ;;  %v3838_v21 = vadd.f32 %v4583_v51, %v6237_v29 }
 0xf68   : > { %v4584_v44 = vpop.f32.mrb[90].mxu0  ;;  %v3836_v55 = vadd.f32 %v3805_v38, %v6227_v11 }
 0xf69   : > { %v3839_v1 = vadd.f32 %v4584_v44, %v6240_v0  ;;  %v3808_v9 = vpop.f32.mrb[91].mxu0 }
 0xf6a   : > { %v3837_v12 = vadd.f32 %v3808_v9, %v6230_v52  ;;  %v4237_v52 = vld [vmem:[%s6395_s25] ss:$0 sm:$0xff] }
 0xf6b   : > { %v3845_v37 = vpack.c.bf16 %v3839_v1, %v3838_v21 }
 0xf6c   : > { %v3844_v3 = vpack.c.bf16 %v3837_v12, %v3836_v55 }
 0xf6e   : > { %v4587_v57 = vpop.f32.mrb[92].mxu0  ;;  %4605 = vmatprep.mubr.bf16.mxu1 %v3844_v3 }
 0xf6f   : > { %v3821_v13 = vpop.f32.mrb[93].mxu0  ;;  %4606 = vmatmul.mubr.bf16.vlgmr.msra.gmra.mrb[64].mxu1 %v3845_v37  ;;  %v3842_v46 = vadd.f32 %v4587_v57, %v6257_v6 }
 0xf70   : > { %v4588_v50 = vpop.f32.mrb[94].mxu0  ;;  %v3840_v0 = vadd.f32 %v3821_v13, %v6247_v39 }
 0xf71   : > { %v3843_v22 = vadd.f32 %v4588_v50, %v6260_v7  ;;  %v3824_v29 = vpop.f32.mrb[95].mxu0 }
 0xf72   : > { %v3841_v20 = vadd.f32 %v3824_v29, %v6250_v34 }
 0xf73   : > { %v3847_v11 = vpack.c.bf16 %v3843_v22, %v3842_v46 }
 0xf74   : > { %v3846_v54 = vpack.c.bf16 %v3841_v20, %v3840_v0 }
 0xf76   : > { %4609 = vmatprep.mubr.bf16.mxu1 %v3846_v54 }
 0xf77   : > { %4610 = vmatmul.mubr.bf16.gmra.mrb[68].mxu1 %v3847_v11 }
0x1042   : > { %v4607_v6 = vpop.f32.mrb[64].mxu1 }
0x1043   : > { %v3962_v7 = vadd.f32 %v4607_v6, %v4237_v52  ;;  %v3953_v27 = vpop.f32.mrb[65].mxu1 }
0x1044   : > { %v3954_v48 = vadd.f32 %v4237_v52, %v3953_v27  ;;  %v4608_v39 = vpop.f32.mrb[66].mxu1 }
0x1045   : > { %3986 = vst.msk [vmem:[%s822_s9 + $0x10] sm:$0xff] %vm867_vm2, %v3962_v7  ;;  %v3965_v34 = vadd.f32 %v4608_v39, %v4237_v52  ;;  %v3956_v40 = vpop.f32.mrb[67].mxu1 }
0x1046   : > { %3984 = vst.msk [vmem:[%s822_s9] sm:$0xff] %vm867_vm2, %v3954_v48  ;;  %v3957_v43 = vadd.f32 %v4237_v52, %v3956_v40 }
0x1047   : > { %3987 = vst.msk [vmem:[%s822_s9 + $0x18] sm:$0xff] %vm867_vm2, %v3965_v34 }
0x1048   : > { %3985 = vst.msk [vmem:[%s822_s9 + $0x8] sm:$0xff] %vm867_vm2, %v3957_v43 }
0x104a   : > { %v4611_v33 = vpop.f32.mrb[68].mxu1 }
0x104b   : > { %v3978_v41 = vadd.f32 %v4611_v33, %v4237_v52  ;;  %v3969_v62 = vpop.f32.mrb[69].mxu1 }
0x104c   : > { %v3970_v15 = vadd.f32 %v4237_v52, %v3969_v62  ;;  %v4612_v58 = vpop.f32.mrb[70].mxu1 }
0x104d   : > { %3990 = vst.msk [vmem:[%s822_s9 + $0x30] sm:$0xff] %vm867_vm2, %v3978_v41  ;;  %v3981_v14 = vadd.f32 %v4612_v58, %v4237_v52  ;;  %v3972_v45 = vpop.f32.mrb[71].mxu1 }
0x104e   : > { %3988 = vst.msk [vmem:[%s822_s9 + $0x20] sm:$0xff] %vm867_vm2, %v3970_v15  ;;  %v3973_v49 = vadd.f32 %v4237_v52, %v3972_v45 }
0x104f   : > { %3991 = vst.msk [vmem:[%s822_s9 + $0x38] sm:$0xff] %vm867_vm2, %v3981_v14 }
0x1050   : > { %3989 = vst.msk [vmem:[%s822_s9 + $0x28] sm:$0xff] %vm867_vm2, %v3973_v49 }
0x1051 PF: > { %s6465_s3 = sld [smem:[#allocation3_spill]] }
0x1057   : > { %s36_s27 = sadd.s32 1, %s6465_s3  }
0x1058   : > { %p33_p4 = scmp.ge.s32.totalorder %s36_s27, 4  }
0x105a   :  { %35 = sbr.rel (!%p33_p4) target bundleno = 12 (0xc), region = 160 }

</bundles_post_ra>
